<compile_context>
chip_gen: v7x
topology: tpu7x:2x2x1
jax: 0.10.0
libtpu: 0.0.40
codegen_flags: <defaults>
</compile_context>

<pallas_src>
import functools

import jax
import jax.numpy as jnp
import numpy as np
from jax.experimental import pallas as pl
from jax.experimental.pallas import tpu as pltpu

_EPS = 1e-5


# ----------------------------------------------------------------------------
# Fused kernel: the whole DecoderNet forward
# ----------------------------------------------------------------------------
def _decoder_kernel(x_ref,
                    rb1_B, rb1_b1, rb1_D, rb1_b2,
                    bn1_P, bn1_g, bn1_b,
                    rb2_B, rb2_b1, rb2_D, rb2_b2,
                    ct1_wt, ct1_wb, ct1_bias,
                    bn2_P, bn2_g, bn2_b,
                    ct2_wt, ct2_wb, ct2_bias,
                    o_ref, *, n, c):
    """x_ref : (N*H, W*C) lane-dense input;  o_ref : (N, Cout, 4H, 4W) NCHW."""
    R1, WC1 = x_ref.shape
    H1, W1 = R1 // n, WC1 // c
    H2, W2 = 2 * H1, 2 * W1
    R2, WC2 = n * H2, W2 * c
    Cout, H4, W4 = o_ref.shape[1], o_ref.shape[2], o_ref.shape[3]
    f32 = jnp.float32

    def mm(a, b):
        return jnp.dot(a, b, preferred_element_type=f32)

    def row_taps(v, rows):
        """Per-sample +-1 row shifts (zero rows at sample boundaries)."""
        L = v.shape[-1]
        v3 = v.reshape(n, rows, L)
        z = jnp.zeros((n, 1, L), f32)
        vm = jnp.concatenate([z, v3[:, :rows - 1, :]], axis=1).reshape(n * rows, L)
        vp = jnp.concatenate([v3[:, 1:, :], z], axis=1).reshape(n * rows, L)
        return vm, vp

    def resblock(v, B, b1, D, b2):
        # x + Conv1x1(ReLU(Conv3x3(ReLU(x)))); column taps folded into banded B.
        t = jnp.maximum(v, 0.0)
        tm, tp = row_taps(t, H1)
        y = mm(tm, B[0]) + mm(t, B[1]) + mm(tp, B[2]) + b1[...]
        y = jnp.maximum(y, 0.0)
        y = mm(y, D[...]) + b2[...]
        return v + y

    def batchnorm(v, P, g, b, inv_count):
        # Training-mode batch stats; two-pass (mean-shifted) biased variance.
        # P = 0/1 channel-group projector over the (col, channel) lane axis.
        mean = jnp.sum(mm(v, P[...]), axis=0, keepdims=True) * inv_count
        d = v - mean
        var = jnp.sum(mm(d * d, P[...]), axis=0, keepdims=True) * inv_count
        return d * (g[...] * jax.lax.rsqrt(var + _EPS)) + b[...]

    h = x_ref[...]
    h = resblock(h, rb1_B, rb1_b1, rb1_D, rb1_b2)
    h = batchnorm(h, bn1_P, bn1_g, bn1_b, 1.0 / (R1 * W1))
    h = resblock(h, rb2_B, rb2_b1, rb2_D, rb2_b2)

    # ConvTranspose2d(d, d, 4, 2, 1): sub-pixel phases.  Column taps + column
    # phases are folded into the packed weights (output columns already in the
    # interleaved (2j+pc)*C + c lane order), so only the two output-row
    # parities remain -> one fat (R, 2*W*C)@(2*W*C, 2*W*C) matmul each.
    hm, hp = row_taps(h, H1)
    y_even = mm(jnp.concatenate([hm, h], axis=1), ct1_wt[...]) + ct1_bias[...]
    y_odd = mm(jnp.concatenate([h, hp], axis=1), ct1_wb[...]) + ct1_bias[...]
    # Row-interleave the two parities -> (N*2H, 2W*C) lane-dense layout.
    h1 = jnp.stack([y_even, y_odd], axis=1).reshape(R2, WC2)

    h2 = jnp.maximum(batchnorm(h1, bn2_P, bn2_g, bn2_b, 1.0 / (R2 * W2)), 0.0)

    # ConvTranspose2d(d, num_channels, 4, 2, 1) + tanh.  Output columns are
    # channel-major (co*W4 + w4), so final stores are dense (H4, W4) slabs.
    hm2, hp2 = row_taps(h2, H2)
    z_even = mm(jnp.concatenate([hm2, h2], axis=1), ct2_wt[...]) + ct2_bias[...]
    z_odd = mm(jnp.concatenate([h2, hp2], axis=1), ct2_wb[...]) + ct2_bias[...]
    z = jnp.tanh(jnp.stack([z_even, z_odd], axis=1).reshape(n * H4, Cout * W4))

    for s in range(n):                           # static: N=2, Cout=3
        zi = z[s * H4:(s + 1) * H4, :]
        for co in range(Cout):
            o_ref[s, co, :, :] = zi[:, co * W4:(co + 1) * W4]


# ----------------------------------------------------------------------------
# pallas_call wrapper
# ----------------------------------------------------------------------------
def _full_spec(shape):
    nd = len(shape)
    return pl.BlockSpec(shape, lambda *_: (0,) * nd)


def decoder_net_forward(x_nchw, pk):
    """tanh(DecoderNet.decoder(x)); x in PyTorch NCHW layout."""
    N, C, H, W = x_nchw.shape
    # Only XLA glue: tiny NCHW->NHWC relayout; the (N*H, W*C) flatten is free.
    x2 = jnp.transpose(x_nchw, (0, 2, 3, 1)).astype(jnp.float32).reshape(N * H, W * C)
    Cout = pk["ct2_b"].shape[-1] // (4 * W)
    out_shape = (N, Cout, 4 * H, 4 * W)

    args = (x2,
            pk["rb1_B"], pk["rb1_b1"], pk["rb1_D"], pk["rb1_b2"],
            pk["bn1_P"], pk["bn1_g"], pk["bn1_b"],
            pk["rb2_B"], pk["rb2_b1"], pk["rb2_D"], pk["rb2_b2"],
            pk["ct1_wt"], pk["ct1_wb"], pk["ct1_b"],
            pk["bn2_P"], pk["bn2_g"], pk["bn2_b"],
            pk["ct2_wt"], pk["ct2_wb"], pk["ct2_b"])

    return pl.pallas_call(
        functools.partial(_decoder_kernel, n=N, c=C),
        grid=(1,),
        in_specs=[_full_spec(a.shape) for a in args],
        out_specs=_full_spec(out_shape),
        out_shape=jax.ShapeDtypeStruct(out_shape, jnp.float32),
        compiler_params=pltpu.CompilerParams(dimension_semantics=("arbitrary",)),
    )(*args)


# ----------------------------------------------------------------------------
# Parameters: raw (PyTorch layouts) + host-side packing into kernel matrices
# ----------------------------------------------------------------------------
def init_raw_params(key, d=16, num_channels=3):
    """Raw params in PyTorch layouts (Conv: (O,I,kh,kw); ConvT: (I,O,kh,kw))."""
    ki = iter(jax.random.split(key, 12))

    def conv_w(cout, cin, k):
        w = jax.random.normal(next(ki), (cout, cin, k, k), jnp.float32)
        return w / jnp.sqrt(float(cin * k * k))

    def tconv_w(cin, cout):
        w = jax.random.normal(next(ki), (cin, cout, 4, 4), jnp.float32)
        return w / jnp.sqrt(float(cin * 16))

    def bias(c_):
        return jax.random.normal(next(ki), (c_,), jnp.float32) * 0.01

    return {
        "rb1_w1": conv_w(d, d, 3), "rb1_b1": bias(d),
        "rb1_w2": conv_w(d, d, 1), "rb1_b2": bias(d),
        "bn1_g": jnp.ones((d,), jnp.float32), "bn1_b": jnp.zeros((d,), jnp.float32),
        "rb2_w1": conv_w(d, d, 3), "rb2_b1": bias(d),
        "rb2_w2": conv_w(d, d, 1), "rb2_b2": bias(d),
        "ct1_w": tconv_w(d, d), "ct1_b": bias(d),
        "bn2_g": jnp.ones((d,), jnp.float32), "bn2_b": jnp.zeros((d,), jnp.float32),
        "ct2_w": tconv_w(d, num_channels), "ct2_b": bias(num_channels),
    }


def pack_params(raw, W):
    """Host-side (numpy) packing of raw weights into lane-dense kernel matrices
    for spatial width W.  Done once, outside jit."""
    r = {k: np.asarray(v, np.float32) for k, v in raw.items()}
    d = r["rb1_w1"].shape[0]
    W2, W4 = 2 * W, 4 * W

    def band3(w):                      # (O,I,3,3) -> (3, W*I, W*O), column taps folded
        o_, i_ = w.shape[0], w.shape[1]
        B = np.zeros((3, W * i_, W * o_), np.float32)
        for kh in range(3):
            for kw in range(3):
                tap = w[:, :, kh, kw].T           # (I, O)
                for j in range(W):
                    jin = j + kw - 1
                    if 0 <= jin < W:
                        B[kh, jin * i_:(jin + 1) * i_, j * o_:(j + 1) * o_] += tap
        return B

    def blockdiag(w):                  # (O,I,1,1) -> (W*I, W*O)
        o_, i_ = w.shape[0], w.shape[1]
        tap = w[:, :, 0, 0].T
        D = np.zeros((W * i_, W * o_), np.float32)
        for j in range(W):
            D[j * i_:(j + 1) * i_, j * o_:(j + 1) * o_] = tap
        return D

    def tconv_pair(w, win, channel_major):
        # ConvTranspose2d(k=4, s=2, p=1) sub-pixel phases (exact):
        #   y[2m+pr, 2j+pc, co] = sum_{a,b in {0,1}, ci}
        #       x[m+pr+a-1, j+pc+b-1, ci] * w[ci, co, 3-pr-2a, 3-pc-2b]
        # One fat matrix per output-row parity pr; rows = (a, jin, ci) matching
        # the kernel's concat([row_shift, base]); output columns:
        #   channel_major=False -> (2j+pc)*Cout + co   (lane-dense, feeds ConvT2)
        #   channel_major=True  -> co*(2*win) + (2j+pc) (final NCHW image rows)
        i_, o_ = w.shape[0], w.shape[1]
        wo = 2 * win
        mats = []
        for pr in range(2):
            M = np.zeros((2 * win * i_, wo * o_), np.float32)
            for a in range(2):
                for pc in range(2):
                    for b in range(2):
                        tap = w[:, :, 3 - pr - 2 * a, 3 - pc - 2 * b]   # (I, O)
                        for j in range(win):
                            jin = j + pc + b - 1
                            if not (0 <= jin < win):
                                continue
                            r0 = a * win * i_ + jin * i_
                            jo = 2 * j + pc
                            if channel_major:
                                for co in range(o_):
                                    M[r0:r0 + i_, co * wo + jo] += tap[:, co]
                            else:
                                M[r0:r0 + i_, jo * o_:(jo + 1) * o_] += tap
            mats.append(M)
        return mats

    def bn_proj(width, ch):            # 0/1 channel-group projector over (col, ch) lanes
        lane_ch = np.arange(width * ch) % ch
        return (lane_ch[:, None] == lane_ch[None, :]).astype(np.float32)

    ct1_top, ct1_bot = tconv_pair(r["ct1_w"], W, channel_major=False)
    ct2_top, ct2_bot = tconv_pair(r["ct2_w"], W2, channel_major=True)

    pk = {
        "rb1_B": band3(r["rb1_w1"]), "rb1_b1": np.tile(r["rb1_b1"], W)[None, :],
        "rb1_D": blockdiag(r["rb1_w2"]), "rb1_b2": np.tile(r["rb1_b2"], W)[None, :],
        "bn1_P": bn_proj(W, d),
        "bn1_g": np.tile(r["bn1_g"], W)[None, :], "bn1_b": np.tile(r["bn1_b"], W)[None, :],
        "rb2_B": band3(r["rb2_w1"]), "rb2_b1": np.tile(r["rb2_b1"], W)[None, :],
        "rb2_D": blockdiag(r["rb2_w2"]), "rb2_b2": np.tile(r["rb2_b2"], W)[None, :],
        "ct1_wt": ct1_top, "ct1_wb": ct1_bot, "ct1_b": np.tile(r["ct1_b"], W2)[None, :],
        "bn2_P": bn_proj(W2, d),
        "bn2_g": np.tile(r["bn2_g"], W2)[None, :], "bn2_b": np.tile(r["bn2_b"], W2)[None, :],
        "ct2_wt": ct2_top, "ct2_wb": ct2_bot, "ct2_b": np.repeat(r["ct2_b"], W4)[None, :],
    }
    return {k: jnp.asarray(v) for k, v in pk.items()}


# ----------------------------------------------------------------------------
if __name__ == "__main__":
    d, num_channels = 16, 3
    N, H, W = 2, 8, 8
    key = jax.random.PRNGKey(0)
    kx, kp = jax.random.split(key)

    # PyTorch-style NCHW input: (batch=2, channels=d, 8, 8)
    x = jax.random.normal(kx, (N, d, H, W), jnp.float32)
    raw = init_raw_params(kp, d=d, num_channels=num_channels)
    packed = pack_params(raw, W=W)

    fwd = jax.jit(decoder_net_forward)
    y = fwd(x, packed)
    jax.block_until_ready(y)

    assert y.shape == (N, num_channels, 4 * H, 4 * W), y.shape
    assert bool(jnp.all(jnp.isfinite(y)))
    assert bool(jnp.all(jnp.abs(y) <= 1.0 + 1e-6))          # tanh output range
    print("KERNEL_OK")
</pallas_src>

<mosaic_0001>
module attributes {stable_mosaic.version = 11 : i64} {
  func.func @_decoder_kernel(%arg0: i32, %arg1: memref<16x128xf32, #tpu.memory_space<vmem>>, %arg2: memref<3x128x128xf32, #tpu.memory_space<vmem>>, %arg3: memref<1x128xf32, #tpu.memory_space<vmem>>, %arg4: memref<128x128xf32, #tpu.memory_space<vmem>>, %arg5: memref<1x128xf32, #tpu.memory_space<vmem>>, %arg6: memref<128x128xf32, #tpu.memory_space<vmem>>, %arg7: memref<1x128xf32, #tpu.memory_space<vmem>>, %arg8: memref<1x128xf32, #tpu.memory_space<vmem>>, %arg9: memref<3x128x128xf32, #tpu.memory_space<vmem>>, %arg10: memref<1x128xf32, #tpu.memory_space<vmem>>, %arg11: memref<128x128xf32, #tpu.memory_space<vmem>>, %arg12: memref<1x128xf32, #tpu.memory_space<vmem>>, %arg13: memref<256x256xf32, #tpu.memory_space<vmem>>, %arg14: memref<256x256xf32, #tpu.memory_space<vmem>>, %arg15: memref<1x256xf32, #tpu.memory_space<vmem>>, %arg16: memref<256x256xf32, #tpu.memory_space<vmem>>, %arg17: memref<1x256xf32, #tpu.memory_space<vmem>>, %arg18: memref<1x256xf32, #tpu.memory_space<vmem>>, %arg19: memref<512x96xf32, #tpu.memory_space<vmem>>, %arg20: memref<512x96xf32, #tpu.memory_space<vmem>>, %arg21: memref<1x96xf32, #tpu.memory_space<vmem>>, %arg22: memref<2x3x32x32xf32, #tpu.memory_space<vmem>>) attributes {dimension_semantics = [#tpu.dimension_semantics<arbitrary>], iteration_bounds = array<i64: 1>, scalar_prefetch = 0 : i64, scratch_operands = 0 : i64, tpu.core_type = #tpu.core_type<tc>, window_params = [{pipeline_mode = #tpu.pipeline_mode<synchronous>, transform_indices = @transform_0, window_bounds = array<i64: 16, 128>}, {pipeline_mode = #tpu.pipeline_mode<synchronous>, transform_indices = @transform_1, window_bounds = array<i64: 3, 128, 128>}, {pipeline_mode = #tpu.pipeline_mode<synchronous>, transform_indices = @transform_2, window_bounds = array<i64: 1, 128>}, {pipeline_mode = #tpu.pipeline_mode<synchronous>, transform_indices = @transform_3, window_bounds = array<i64: 128, 128>}, {pipeline_mode = #tpu.pipeline_mode<synchronous>, transform_indices = @transform_4, window_bounds = array<i64: 1, 128>}, {pipeline_mode = #tpu.pipeline_mode<synchronous>, transform_indices = @transform_5, window_bounds = array<i64: 128, 128>}, {pipeline_mode = #tpu.pipeline_mode<synchronous>, transform_indices = @transform_6, window_bounds = array<i64: 1, 128>}, {pipeline_mode = #tpu.pipeline_mode<synchronous>, transform_indices = @transform_7, window_bounds = array<i64: 1, 128>}, {pipeline_mode = #tpu.pipeline_mode<synchronous>, transform_indices = @transform_8, window_bounds = array<i64: 3, 128, 128>}, {pipeline_mode = #tpu.pipeline_mode<synchronous>, transform_indices = @transform_9, window_bounds = array<i64: 1, 128>}, {pipeline_mode = #tpu.pipeline_mode<synchronous>, transform_indices = @transform_10, window_bounds = array<i64: 128, 128>}, {pipeline_mode = #tpu.pipeline_mode<synchronous>, transform_indices = @transform_11, window_bounds = array<i64: 1, 128>}, {pipeline_mode = #tpu.pipeline_mode<synchronous>, transform_indices = @transform_12, window_bounds = array<i64: 256, 256>}, {pipeline_mode = #tpu.pipeline_mode<synchronous>, transform_indices = @transform_13, window_bounds = array<i64: 256, 256>}, {pipeline_mode = #tpu.pipeline_mode<synchronous>, transform_indices = @transform_14, window_bounds = array<i64: 1, 256>}, {pipeline_mode = #tpu.pipeline_mode<synchronous>, transform_indices = @transform_15, window_bounds = array<i64: 256, 256>}, {pipeline_mode = #tpu.pipeline_mode<synchronous>, transform_indices = @transform_16, window_bounds = array<i64: 1, 256>}, {pipeline_mode = #tpu.pipeline_mode<synchronous>, transform_indices = @transform_17, window_bounds = array<i64: 1, 256>}, {pipeline_mode = #tpu.pipeline_mode<synchronous>, transform_indices = @transform_18, window_bounds = array<i64: 512, 96>}, {pipeline_mode = #tpu.pipeline_mode<synchronous>, transform_indices = @transform_19, window_bounds = array<i64: 512, 96>}, {pipeline_mode = #tpu.pipeline_mode<synchronous>, transform_indices = @transform_20, window_bounds = array<i64: 1, 96>}, {pipeline_mode = #tpu.pipeline_mode<synchronous>, transform_indices = @transform_21, window_bounds = array<i64: 2, 3, 32, 32>}]} {
    %c0 = arith.constant 0 : index
    %c0_0 = arith.constant 0 : index
    %0 = vector.load %arg1[%c0, %c0_0] : memref<16x128xf32, #tpu.memory_space<vmem>>, vector<16x128xf32>
    %cst = arith.constant 0.000000e+00 : f32
    %1 = vector.broadcast %cst : f32 to vector<16x128xf32>
    %2 = arith.maximumf %0, %1 : vector<16x128xf32>
    %3 = vector.shape_cast %2 : vector<16x128xf32> to vector<2x8x128xf32>
    %cst_1 = arith.constant 0.000000e+00 : f32
    %4 = vector.broadcast %cst_1 : f32 to vector<2x1x128xf32>
    %5 = vector.extract_strided_slice %3 {offsets = [0, 0, 0], sizes = [2, 7, 128], strides = [1, 1, 1]} : vector<2x8x128xf32> to vector<2x7x128xf32>
    %6 = tpu.concatenate %4, %5 in 1 : vector<2x1x128xf32>, vector<2x7x128xf32> -> vector<2x8x128xf32>
    %7 = vector.shape_cast %6 : vector<2x8x128xf32> to vector<16x128xf32>
    %8 = vector.extract_strided_slice %3 {offsets = [0, 1, 0], sizes = [2, 7, 128], strides = [1, 1, 1]} : vector<2x8x128xf32> to vector<2x7x128xf32>
    %9 = tpu.concatenate %8, %4 in 1 : vector<2x7x128xf32>, vector<2x1x128xf32> -> vector<2x8x128xf32>
    %10 = vector.shape_cast %9 : vector<2x8x128xf32> to vector<16x128xf32>
    %c0_2 = arith.constant 0 : index
    %c0_3 = arith.constant 0 : index
    %c0_4 = arith.constant 0 : index
    %11 = vector.load %arg2[%c0_2, %c0_3, %c0_4] : memref<3x128x128xf32, #tpu.memory_space<vmem>>, vector<1x128x128xf32>
    %12 = vector.shape_cast %11 : vector<1x128x128xf32> to vector<128x128xf32>
    %cst_5 = arith.constant dense<0.000000e+00> : vector<16x128xf32>
    %13 = tpu.matmul %7, %12, %cst_5 {dimension_numbers = #tpu.dot_dimension_numbers<[1], [0], [0], [1], [0, 0, 1, 1], [], []>} : vector<16x128xf32>, vector<128x128xf32>, vector<16x128xf32> -> vector<16x128xf32>
    %c1 = arith.constant 1 : index
    %c0_6 = arith.constant 0 : index
    %c0_7 = arith.constant 0 : index
    %14 = vector.load %arg2[%c1, %c0_6, %c0_7] : memref<3x128x128xf32, #tpu.memory_space<vmem>>, vector<1x128x128xf32>
    %15 = vector.shape_cast %14 : vector<1x128x128xf32> to vector<128x128xf32>
    %cst_8 = arith.constant dense<0.000000e+00> : vector<16x128xf32>
    %16 = tpu.matmul %2, %15, %cst_8 {dimension_numbers = #tpu.dot_dimension_numbers<[1], [0], [0], [1], [0, 0, 1, 1], [], []>} : vector<16x128xf32>, vector<128x128xf32>, vector<16x128xf32> -> vector<16x128xf32>
    %17 = arith.addf %13, %16 : vector<16x128xf32>
    %c2 = arith.constant 2 : index
    %c0_9 = arith.constant 0 : index
    %c0_10 = arith.constant 0 : index
    %18 = vector.load %arg2[%c2, %c0_9, %c0_10] : memref<3x128x128xf32, #tpu.memory_space<vmem>>, vector<1x128x128xf32>
    %19 = vector.shape_cast %18 : vector<1x128x128xf32> to vector<128x128xf32>
    %cst_11 = arith.constant dense<0.000000e+00> : vector<16x128xf32>
    %20 = tpu.matmul %10, %19, %cst_11 {dimension_numbers = #tpu.dot_dimension_numbers<[1], [0], [0], [1], [0, 0, 1, 1], [], []>} : vector<16x128xf32>, vector<128x128xf32>, vector<16x128xf32> -> vector<16x128xf32>
    %21 = arith.addf %17, %20 : vector<16x128xf32>
    %c0_12 = arith.constant 0 : index
    %c0_13 = arith.constant 0 : index
    %22 = vector.load %arg3[%c0_12, %c0_13] : memref<1x128xf32, #tpu.memory_space<vmem>>, vector<1x128xf32>
    %23 = vector.broadcast %22 : vector<1x128xf32> to vector<16x128xf32>
    %24 = arith.addf %21, %23 : vector<16x128xf32>
    %cst_14 = arith.constant 0.000000e+00 : f32
    %25 = vector.broadcast %cst_14 : f32 to vector<16x128xf32>
    %26 = arith.maximumf %24, %25 : vector<16x128xf32>
    %c0_15 = arith.constant 0 : index
    %c0_16 = arith.constant 0 : index
    %27 = vector.load %arg4[%c0_15, %c0_16] : memref<128x128xf32, #tpu.memory_space<vmem>>, vector<128x128xf32>
    %cst_17 = arith.constant dense<0.000000e+00> : vector<16x128xf32>
    %28 = tpu.matmul %26, %27, %cst_17 {dimension_numbers = #tpu.dot_dimension_numbers<[1], [0], [0], [1], [0, 0, 1, 1], [], []>} : vector<16x128xf32>, vector<128x128xf32>, vector<16x128xf32> -> vector<16x128xf32>
    %c0_18 = arith.constant 0 : index
    %c0_19 = arith.constant 0 : index
    %29 = vector.load %arg5[%c0_18, %c0_19] : memref<1x128xf32, #tpu.memory_space<vmem>>, vector<1x128xf32>
    %30 = vector.broadcast %29 : vector<1x128xf32> to vector<16x128xf32>
    %31 = arith.addf %28, %30 : vector<16x128xf32>
    %32 = arith.addf %0, %31 : vector<16x128xf32>
    %c0_20 = arith.constant 0 : index
    %c0_21 = arith.constant 0 : index
    %33 = vector.load %arg6[%c0_20, %c0_21] : memref<128x128xf32, #tpu.memory_space<vmem>>, vector<128x128xf32>
    %cst_22 = arith.constant dense<0.000000e+00> : vector<16x128xf32>
    %34 = tpu.matmul %32, %33, %cst_22 {dimension_numbers = #tpu.dot_dimension_numbers<[1], [0], [0], [1], [0, 0, 1, 1], [], []>} : vector<16x128xf32>, vector<128x128xf32>, vector<16x128xf32> -> vector<16x128xf32>
    %cst_23 = arith.constant dense<0.000000e+00> : vector<128xf32>
    %35 = vector.multi_reduction <add>, %34, %cst_23 [0] : vector<16x128xf32> to vector<128xf32>
    %36 = vector.shape_cast %35 : vector<128xf32> to vector<1x128xf32>
    %cst_24 = arith.constant 7.812500e-03 : f32
    %37 = vector.broadcast %cst_24 : f32 to vector<1x128xf32>
    %38 = arith.mulf %36, %37 : vector<1x128xf32>
    %39 = vector.broadcast %38 : vector<1x128xf32> to vector<16x128xf32>
    %40 = arith.subf %32, %39 : vector<16x128xf32>
    %41 = arith.mulf %40, %40 : vector<16x128xf32>
    %c0_25 = arith.constant 0 : index
    %c0_26 = arith.constant 0 : index
    %42 = vector.load %arg6[%c0_25, %c0_26] : memref<128x128xf32, #tpu.memory_space<vmem>>, vector<128x128xf32>
    %cst_27 = arith.constant dense<0.000000e+00> : vector<16x128xf32>
    %43 = tpu.matmul %41, %42, %cst_27 {dimension_numbers = #tpu.dot_dimension_numbers<[1], [0], [0], [1], [0, 0, 1, 1], [], []>} : vector<16x128xf32>, vector<128x128xf32>, vector<16x128xf32> -> vector<16x128xf32>
    %cst_28 = arith.constant dense<0.000000e+00> : vector<128xf32>
    %44 = vector.multi_reduction <add>, %43, %cst_28 [0] : vector<16x128xf32> to vector<128xf32>
    %45 = vector.shape_cast %44 : vector<128xf32> to vector<1x128xf32>
    %cst_29 = arith.constant 7.812500e-03 : f32
    %46 = vector.broadcast %cst_29 : f32 to vector<1x128xf32>
    %47 = arith.mulf %45, %46 : vector<1x128xf32>
    %c0_30 = arith.constant 0 : index
    %c0_31 = arith.constant 0 : index
    %48 = vector.load %arg7[%c0_30, %c0_31] : memref<1x128xf32, #tpu.memory_space<vmem>>, vector<1x128xf32>
    %cst_32 = arith.constant 9.99999974E-6 : f32
    %49 = vector.broadcast %cst_32 : f32 to vector<1x128xf32>
    %50 = arith.addf %47, %49 : vector<1x128xf32>
    %51 = math.rsqrt %50 : vector<1x128xf32>
    %52 = arith.mulf %48, %51 : vector<1x128xf32>
    %53 = vector.broadcast %52 : vector<1x128xf32> to vector<16x128xf32>
    %54 = arith.mulf %40, %53 : vector<16x128xf32>
    %c0_33 = arith.constant 0 : index
    %c0_34 = arith.constant 0 : index
    %55 = vector.load %arg8[%c0_33, %c0_34] : memref<1x128xf32, #tpu.memory_space<vmem>>, vector<1x128xf32>
    %56 = vector.broadcast %55 : vector<1x128xf32> to vector<16x128xf32>
    %57 = arith.addf %54, %56 : vector<16x128xf32>
    %cst_35 = arith.constant 0.000000e+00 : f32
    %58 = vector.broadcast %cst_35 : f32 to vector<16x128xf32>
    %59 = arith.maximumf %57, %58 : vector<16x128xf32>
    %60 = vector.shape_cast %59 : vector<16x128xf32> to vector<2x8x128xf32>
    %cst_36 = arith.constant 0.000000e+00 : f32
    %61 = vector.broadcast %cst_36 : f32 to vector<2x1x128xf32>
    %62 = vector.extract_strided_slice %60 {offsets = [0, 0, 0], sizes = [2, 7, 128], strides = [1, 1, 1]} : vector<2x8x128xf32> to vector<2x7x128xf32>
    %63 = tpu.concatenate %61, %62 in 1 : vector<2x1x128xf32>, vector<2x7x128xf32> -> vector<2x8x128xf32>
    %64 = vector.shape_cast %63 : vector<2x8x128xf32> to vector<16x128xf32>
    %65 = vector.extract_strided_slice %60 {offsets = [0, 1, 0], sizes = [2, 7, 128], strides = [1, 1, 1]} : vector<2x8x128xf32> to vector<2x7x128xf32>
    %66 = tpu.concatenate %65, %61 in 1 : vector<2x7x128xf32>, vector<2x1x128xf32> -> vector<2x8x128xf32>
    %67 = vector.shape_cast %66 : vector<2x8x128xf32> to vector<16x128xf32>
    %c0_37 = arith.constant 0 : index
    %c0_38 = arith.constant 0 : index
    %c0_39 = arith.constant 0 : index
    %68 = vector.load %arg9[%c0_37, %c0_38, %c0_39] : memref<3x128x128xf32, #tpu.memory_space<vmem>>, vector<1x128x128xf32>
    %69 = vector.shape_cast %68 : vector<1x128x128xf32> to vector<128x128xf32>
    %cst_40 = arith.constant dense<0.000000e+00> : vector<16x128xf32>
    %70 = tpu.matmul %64, %69, %cst_40 {dimension_numbers = #tpu.dot_dimension_numbers<[1], [0], [0], [1], [0, 0, 1, 1], [], []>} : vector<16x128xf32>, vector<128x128xf32>, vector<16x128xf32> -> vector<16x128xf32>
    %c1_41 = arith.constant 1 : index
    %c0_42 = arith.constant 0 : index
    %c0_43 = arith.constant 0 : index
    %71 = vector.load %arg9[%c1_41, %c0_42, %c0_43] : memref<3x128x128xf32, #tpu.memory_space<vmem>>, vector<1x128x128xf32>
    %72 = vector.shape_cast %71 : vector<1x128x128xf32> to vector<128x128xf32>
    %cst_44 = arith.constant dense<0.000000e+00> : vector<16x128xf32>
    %73 = tpu.matmul %59, %72, %cst_44 {dimension_numbers = #tpu.dot_dimension_numbers<[1], [0], [0], [1], [0, 0, 1, 1], [], []>} : vector<16x128xf32>, vector<128x128xf32>, vector<16x128xf32> -> vector<16x128xf32>
    %74 = arith.addf %70, %73 : vector<16x128xf32>
    %c2_45 = arith.constant 2 : index
    %c0_46 = arith.constant 0 : index
    %c0_47 = arith.constant 0 : index
    %75 = vector.load %arg9[%c2_45, %c0_46, %c0_47] : memref<3x128x128xf32, #tpu.memory_space<vmem>>, vector<1x128x128xf32>
    %76 = vector.shape_cast %75 : vector<1x128x128xf32> to vector<128x128xf32>
    %cst_48 = arith.constant dense<0.000000e+00> : vector<16x128xf32>
    %77 = tpu.matmul %67, %76, %cst_48 {dimension_numbers = #tpu.dot_dimension_numbers<[1], [0], [0], [1], [0, 0, 1, 1], [], []>} : vector<16x128xf32>, vector<128x128xf32>, vector<16x128xf32> -> vector<16x128xf32>
    %78 = arith.addf %74, %77 : vector<16x128xf32>
    %c0_49 = arith.constant 0 : index
    %c0_50 = arith.constant 0 : index
    %79 = vector.load %arg10[%c0_49, %c0_50] : memref<1x128xf32, #tpu.memory_space<vmem>>, vector<1x128xf32>
    %80 = vector.broadcast %79 : vector<1x128xf32> to vector<16x128xf32>
    %81 = arith.addf %78, %80 : vector<16x128xf32>
    %cst_51 = arith.constant 0.000000e+00 : f32
    %82 = vector.broadcast %cst_51 : f32 to vector<16x128xf32>
    %83 = arith.maximumf %81, %82 : vector<16x128xf32>
    %c0_52 = arith.constant 0 : index
    %c0_53 = arith.constant 0 : index
    %84 = vector.load %arg11[%c0_52, %c0_53] : memref<128x128xf32, #tpu.memory_space<vmem>>, vector<128x128xf32>
    %cst_54 = arith.constant dense<0.000000e+00> : vector<16x128xf32>
    %85 = tpu.matmul %83, %84, %cst_54 {dimension_numbers = #tpu.dot_dimension_numbers<[1], [0], [0], [1], [0, 0, 1, 1], [], []>} : vector<16x128xf32>, vector<128x128xf32>, vector<16x128xf32> -> vector<16x128xf32>
    %c0_55 = arith.constant 0 : index
    %c0_56 = arith.constant 0 : index
    %86 = vector.load %arg12[%c0_55, %c0_56] : memref<1x128xf32, #tpu.memory_space<vmem>>, vector<1x128xf32>
    %87 = vector.broadcast %86 : vector<1x128xf32> to vector<16x128xf32>
    %88 = arith.addf %85, %87 : vector<16x128xf32>
    %89 = arith.addf %57, %88 : vector<16x128xf32>
    %90 = vector.shape_cast %89 : vector<16x128xf32> to vector<2x8x128xf32>
    %cst_57 = arith.constant 0.000000e+00 : f32
    %91 = vector.broadcast %cst_57 : f32 to vector<2x1x128xf32>
    %92 = vector.extract_strided_slice %90 {offsets = [0, 0, 0], sizes = [2, 7, 128], strides = [1, 1, 1]} : vector<2x8x128xf32> to vector<2x7x128xf32>
    %93 = tpu.concatenate %91, %92 in 1 : vector<2x1x128xf32>, vector<2x7x128xf32> -> vector<2x8x128xf32>
    %94 = vector.shape_cast %93 : vector<2x8x128xf32> to vector<16x128xf32>
    %95 = vector.extract_strided_slice %90 {offsets = [0, 1, 0], sizes = [2, 7, 128], strides = [1, 1, 1]} : vector<2x8x128xf32> to vector<2x7x128xf32>
    %96 = tpu.concatenate %95, %91 in 1 : vector<2x7x128xf32>, vector<2x1x128xf32> -> vector<2x8x128xf32>
    %97 = vector.shape_cast %96 : vector<2x8x128xf32> to vector<16x128xf32>
    %98 = tpu.concatenate %94, %89 in 1 : vector<16x128xf32>, vector<16x128xf32> -> vector<16x256xf32>
    %c0_58 = arith.constant 0 : index
    %c0_59 = arith.constant 0 : index
    %99 = vector.load %arg13[%c0_58, %c0_59] : memref<256x256xf32, #tpu.memory_space<vmem>>, vector<256x256xf32>
    %cst_60 = arith.constant dense<0.000000e+00> : vector<16x256xf32>
    %100 = tpu.matmul %98, %99, %cst_60 {dimension_numbers = #tpu.dot_dimension_numbers<[1], [0], [0], [1], [0, 0, 1, 1], [], []>} : vector<16x256xf32>, vector<256x256xf32>, vector<16x256xf32> -> vector<16x256xf32>
    %c0_61 = arith.constant 0 : index
    %c0_62 = arith.constant 0 : index
    %101 = vector.load %arg15[%c0_61, %c0_62] : memref<1x256xf32, #tpu.memory_space<vmem>>, vector<1x256xf32>
    %102 = vector.broadcast %101 : vector<1x256xf32> to vector<16x256xf32>
    %103 = arith.addf %100, %102 : vector<16x256xf32>
    %104 = tpu.concatenate %89, %97 in 1 : vector<16x128xf32>, vector<16x128xf32> -> vector<16x256xf32>
    %c0_63 = arith.constant 0 : index
    %c0_64 = arith.constant 0 : index
    %105 = vector.load %arg14[%c0_63, %c0_64] : memref<256x256xf32, #tpu.memory_space<vmem>>, vector<256x256xf32>
    %cst_65 = arith.constant dense<0.000000e+00> : vector<16x256xf32>
    %106 = tpu.matmul %104, %105, %cst_65 {dimension_numbers = #tpu.dot_dimension_numbers<[1], [0], [0], [1], [0, 0, 1, 1], [], []>} : vector<16x256xf32>, vector<256x256xf32>, vector<16x256xf32> -> vector<16x256xf32>
    %c0_66 = arith.constant 0 : index
    %c0_67 = arith.constant 0 : index
    %107 = vector.load %arg15[%c0_66, %c0_67] : memref<1x256xf32, #tpu.memory_space<vmem>>, vector<1x256xf32>
    %108 = vector.broadcast %107 : vector<1x256xf32> to vector<16x256xf32>
    %109 = arith.addf %106, %108 : vector<16x256xf32>
    %110 = vector.shape_cast %103 : vector<16x256xf32> to vector<16x1x256xf32>
    %111 = vector.shape_cast %109 : vector<16x256xf32> to vector<16x1x256xf32>
    %112 = tpu.concatenate %110, %111 in 1 : vector<16x1x256xf32>, vector<16x1x256xf32> -> vector<16x2x256xf32>
    %113 = vector.shape_cast %112 : vector<16x2x256xf32> to vector<32x256xf32>
    %c0_68 = arith.constant 0 : index
    %c0_69 = arith.constant 0 : index
    %114 = vector.load %arg16[%c0_68, %c0_69] : memref<256x256xf32, #tpu.memory_space<vmem>>, vector<256x256xf32>
    %cst_70 = arith.constant dense<0.000000e+00> : vector<32x256xf32>
    %115 = tpu.matmul %113, %114, %cst_70 {dimension_numbers = #tpu.dot_dimension_numbers<[1], [0], [0], [1], [0, 0, 1, 1], [], []>} : vector<32x256xf32>, vector<256x256xf32>, vector<32x256xf32> -> vector<32x256xf32>
    %cst_71 = arith.constant dense<0.000000e+00> : vector<256xf32>
    %116 = vector.multi_reduction <add>, %115, %cst_71 [0] : vector<32x256xf32> to vector<256xf32>
    %117 = vector.shape_cast %116 : vector<256xf32> to vector<1x256xf32>
    %cst_72 = arith.constant 0.001953125 : f32
    %118 = vector.broadcast %cst_72 : f32 to vector<1x256xf32>
    %119 = arith.mulf %117, %118 : vector<1x256xf32>
    %120 = vector.broadcast %119 : vector<1x256xf32> to vector<32x256xf32>
    %121 = arith.subf %113, %120 : vector<32x256xf32>
    %122 = arith.mulf %121, %121 : vector<32x256xf32>
    %c0_73 = arith.constant 0 : index
    %c0_74 = arith.constant 0 : index
    %123 = vector.load %arg16[%c0_73, %c0_74] : memref<256x256xf32, #tpu.memory_space<vmem>>, vector<256x256xf32>
    %cst_75 = arith.constant dense<0.000000e+00> : vector<32x256xf32>
    %124 = tpu.matmul %122, %123, %cst_75 {dimension_numbers = #tpu.dot_dimension_numbers<[1], [0], [0], [1], [0, 0, 1, 1], [], []>} : vector<32x256xf32>, vector<256x256xf32>, vector<32x256xf32> -> vector<32x256xf32>
    %cst_76 = arith.constant dense<0.000000e+00> : vector<256xf32>
    %125 = vector.multi_reduction <add>, %124, %cst_76 [0] : vector<32x256xf32> to vector<256xf32>
    %126 = vector.shape_cast %125 : vector<256xf32> to vector<1x256xf32>
    %cst_77 = arith.constant 0.001953125 : f32
    %127 = vector.broadcast %cst_77 : f32 to vector<1x256xf32>
    %128 = arith.mulf %126, %127 : vector<1x256xf32>
    %c0_78 = arith.constant 0 : index
    %c0_79 = arith.constant 0 : index
    %129 = vector.load %arg17[%c0_78, %c0_79] : memref<1x256xf32, #tpu.memory_space<vmem>>, vector<1x256xf32>
    %cst_80 = arith.constant 9.99999974E-6 : f32
    %130 = vector.broadcast %cst_80 : f32 to vector<1x256xf32>
    %131 = arith.addf %128, %130 : vector<1x256xf32>
    %132 = math.rsqrt %131 : vector<1x256xf32>
    %133 = arith.mulf %129, %132 : vector<1x256xf32>
    %134 = vector.broadcast %133 : vector<1x256xf32> to vector<32x256xf32>
    %135 = arith.mulf %121, %134 : vector<32x256xf32>
    %c0_81 = arith.constant 0 : index
    %c0_82 = arith.constant 0 : index
    %136 = vector.load %arg18[%c0_81, %c0_82] : memref<1x256xf32, #tpu.memory_space<vmem>>, vector<1x256xf32>
    %137 = vector.broadcast %136 : vector<1x256xf32> to vector<32x256xf32>
    %138 = arith.addf %135, %137 : vector<32x256xf32>
    %cst_83 = arith.constant 0.000000e+00 : f32
    %139 = vector.broadcast %cst_83 : f32 to vector<32x256xf32>
    %140 = arith.maximumf %138, %139 : vector<32x256xf32>
    %141 = vector.shape_cast %140 : vector<32x256xf32> to vector<2x16x256xf32>
    %cst_84 = arith.constant 0.000000e+00 : f32
    %142 = vector.broadcast %cst_84 : f32 to vector<2x1x256xf32>
    %143 = vector.extract_strided_slice %141 {offsets = [0, 0, 0], sizes = [2, 15, 256], strides = [1, 1, 1]} : vector<2x16x256xf32> to vector<2x15x256xf32>
    %144 = tpu.concatenate %142, %143 in 1 : vector<2x1x256xf32>, vector<2x15x256xf32> -> vector<2x16x256xf32>
    %145 = vector.shape_cast %144 : vector<2x16x256xf32> to vector<32x256xf32>
    %146 = vector.extract_strided_slice %141 {offsets = [0, 1, 0], sizes = [2, 15, 256], strides = [1, 1, 1]} : vector<2x16x256xf32> to vector<2x15x256xf32>
    %147 = tpu.concatenate %146, %142 in 1 : vector<2x15x256xf32>, vector<2x1x256xf32> -> vector<2x16x256xf32>
    %148 = vector.shape_cast %147 : vector<2x16x256xf32> to vector<32x256xf32>
    %149 = tpu.concatenate %145, %140 in 1 : vector<32x256xf32>, vector<32x256xf32> -> vector<32x512xf32>
    %c0_85 = arith.constant 0 : index
    %c0_86 = arith.constant 0 : index
    %150 = vector.load %arg19[%c0_85, %c0_86] : memref<512x96xf32, #tpu.memory_space<vmem>>, vector<512x96xf32>
    %cst_87 = arith.constant dense<0.000000e+00> : vector<32x96xf32>
    %151 = tpu.matmul %149, %150, %cst_87 {dimension_numbers = #tpu.dot_dimension_numbers<[1], [0], [0], [1], [0, 0, 1, 1], [], []>} : vector<32x512xf32>, vector<512x96xf32>, vector<32x96xf32> -> vector<32x96xf32>
    %c0_88 = arith.constant 0 : index
    %c0_89 = arith.constant 0 : index
    %152 = vector.load %arg21[%c0_88, %c0_89] : memref<1x96xf32, #tpu.memory_space<vmem>>, vector<1x96xf32>
    %153 = vector.broadcast %152 : vector<1x96xf32> to vector<32x96xf32>
    %154 = arith.addf %151, %153 : vector<32x96xf32>
    %155 = tpu.concatenate %140, %148 in 1 : vector<32x256xf32>, vector<32x256xf32> -> vector<32x512xf32>
    %c0_90 = arith.constant 0 : index
    %c0_91 = arith.constant 0 : index
    %156 = vector.load %arg20[%c0_90, %c0_91] : memref<512x96xf32, #tpu.memory_space<vmem>>, vector<512x96xf32>
    %cst_92 = arith.constant dense<0.000000e+00> : vector<32x96xf32>
    %157 = tpu.matmul %155, %156, %cst_92 {dimension_numbers = #tpu.dot_dimension_numbers<[1], [0], [0], [1], [0, 0, 1, 1], [], []>} : vector<32x512xf32>, vector<512x96xf32>, vector<32x96xf32> -> vector<32x96xf32>
    %c0_93 = arith.constant 0 : index
    %c0_94 = arith.constant 0 : index
    %158 = vector.load %arg21[%c0_93, %c0_94] : memref<1x96xf32, #tpu.memory_space<vmem>>, vector<1x96xf32>
    %159 = vector.broadcast %158 : vector<1x96xf32> to vector<32x96xf32>
    %160 = arith.addf %157, %159 : vector<32x96xf32>
    %161 = vector.shape_cast %154 : vector<32x96xf32> to vector<32x1x96xf32>
    %162 = vector.shape_cast %160 : vector<32x96xf32> to vector<32x1x96xf32>
    %163 = tpu.concatenate %161, %162 in 1 : vector<32x1x96xf32>, vector<32x1x96xf32> -> vector<32x2x96xf32>
    %164 = vector.shape_cast %163 : vector<32x2x96xf32> to vector<64x96xf32>
    %165 = math.tanh %164 : vector<64x96xf32>
    %166 = vector.extract_strided_slice %165 {offsets = [0, 0], sizes = [32, 96], strides = [1, 1]} : vector<64x96xf32> to vector<32x96xf32>
    %167 = vector.extract_strided_slice %166 {offsets = [0, 0], sizes = [32, 32], strides = [1, 1]} : vector<32x96xf32> to vector<32x32xf32>
    %c0_95 = arith.constant 0 : index
    %c0_96 = arith.constant 0 : index
    %c0_97 = arith.constant 0 : index
    %c0_98 = arith.constant 0 : index
    %168 = vector.load %arg22[%c0_95, %c0_96, %c0_97, %c0_98] : memref<2x3x32x32xf32, #tpu.memory_space<vmem>>, vector<1x1x32x32xf32>
    %169 = vector.shape_cast %168 : vector<1x1x32x32xf32> to vector<32x32xf32>
    %170 = vector.shape_cast %167 : vector<32x32xf32> to vector<1x1x32x32xf32>
    tpu.vector_store %arg22[%c0_95, %c0_96, %c0_97, %c0_98], %170 {strides = array<i32>} : memref<2x3x32x32xf32, #tpu.memory_space<vmem>>, vector<1x1x32x32xf32>,
    %171 = vector.extract_strided_slice %166 {offsets = [0, 32], sizes = [32, 32], strides = [1, 1]} : vector<32x96xf32> to vector<32x32xf32>
    %c0_99 = arith.constant 0 : index
    %c1_100 = arith.constant 1 : index
    %c0_101 = arith.constant 0 : index
    %c0_102 = arith.constant 0 : index
    %172 = vector.load %arg22[%c0_99, %c1_100, %c0_101, %c0_102] : memref<2x3x32x32xf32, #tpu.memory_space<vmem>>, vector<1x1x32x32xf32>
    %173 = vector.shape_cast %172 : vector<1x1x32x32xf32> to vector<32x32xf32>
    %174 = vector.shape_cast %171 : vector<32x32xf32> to vector<1x1x32x32xf32>
    tpu.vector_store %arg22[%c0_99, %c1_100, %c0_101, %c0_102], %174 {strides = array<i32>} : memref<2x3x32x32xf32, #tpu.memory_space<vmem>>, vector<1x1x32x32xf32>,
    %175 = vector.extract_strided_slice %166 {offsets = [0, 64], sizes = [32, 32], strides = [1, 1]} : vector<32x96xf32> to vector<32x32xf32>
    %c0_103 = arith.constant 0 : index
    %c2_104 = arith.constant 2 : index
    %c0_105 = arith.constant 0 : index
    %c0_106 = arith.constant 0 : index
    %176 = vector.load %arg22[%c0_103, %c2_104, %c0_105, %c0_106] : memref<2x3x32x32xf32, #tpu.memory_space<vmem>>, vector<1x1x32x32xf32>
    %177 = vector.shape_cast %176 : vector<1x1x32x32xf32> to vector<32x32xf32>
    %178 = vector.shape_cast %175 : vector<32x32xf32> to vector<1x1x32x32xf32>
    tpu.vector_store %arg22[%c0_103, %c2_104, %c0_105, %c0_106], %178 {strides = array<i32>} : memref<2x3x32x32xf32, #tpu.memory_space<vmem>>, vector<1x1x32x32xf32>,
    %179 = vector.extract_strided_slice %165 {offsets = [32, 0], sizes = [32, 96], strides = [1, 1]} : vector<64x96xf32> to vector<32x96xf32>
    %180 = vector.extract_strided_slice %179 {offsets = [0, 0], sizes = [32, 32], strides = [1, 1]} : vector<32x96xf32> to vector<32x32xf32>
    %c1_107 = arith.constant 1 : index
    %c0_108 = arith.constant 0 : index
    %c0_109 = arith.constant 0 : index
    %c0_110 = arith.constant 0 : index
    %181 = vector.load %arg22[%c1_107, %c0_108, %c0_109, %c0_110] : memref<2x3x32x32xf32, #tpu.memory_space<vmem>>, vector<1x1x32x32xf32>
    %182 = vector.shape_cast %181 : vector<1x1x32x32xf32> to vector<32x32xf32>
    %183 = vector.shape_cast %180 : vector<32x32xf32> to vector<1x1x32x32xf32>
    tpu.vector_store %arg22[%c1_107, %c0_108, %c0_109, %c0_110], %183 {strides = array<i32>} : memref<2x3x32x32xf32, #tpu.memory_space<vmem>>, vector<1x1x32x32xf32>,
    %184 = vector.extract_strided_slice %179 {offsets = [0, 32], sizes = [32, 32], strides = [1, 1]} : vector<32x96xf32> to vector<32x32xf32>
    %c1_111 = arith.constant 1 : index
    %c1_112 = arith.constant 1 : index
    %c0_113 = arith.constant 0 : index
    %c0_114 = arith.constant 0 : index
    %185 = vector.load %arg22[%c1_111, %c1_112, %c0_113, %c0_114] : memref<2x3x32x32xf32, #tpu.memory_space<vmem>>, vector<1x1x32x32xf32>
    %186 = vector.shape_cast %185 : vector<1x1x32x32xf32> to vector<32x32xf32>
    %187 = vector.shape_cast %184 : vector<32x32xf32> to vector<1x1x32x32xf32>
    tpu.vector_store %arg22[%c1_111, %c1_112, %c0_113, %c0_114], %187 {strides = array<i32>} : memref<2x3x32x32xf32, #tpu.memory_space<vmem>>, vector<1x1x32x32xf32>,
    %188 = vector.extract_strided_slice %179 {offsets = [0, 64], sizes = [32, 32], strides = [1, 1]} : vector<32x96xf32> to vector<32x32xf32>
    %c1_115 = arith.constant 1 : index
    %c2_116 = arith.constant 2 : index
    %c0_117 = arith.constant 0 : index
    %c0_118 = arith.constant 0 : index
    %189 = vector.load %arg22[%c1_115, %c2_116, %c0_117, %c0_118] : memref<2x3x32x32xf32, #tpu.memory_space<vmem>>, vector<1x1x32x32xf32>
    %190 = vector.shape_cast %189 : vector<1x1x32x32xf32> to vector<32x32xf32>
    %191 = vector.shape_cast %188 : vector<32x32xf32> to vector<1x1x32x32xf32>
    tpu.vector_store %arg22[%c1_115, %c2_116, %c0_117, %c0_118], %191 {strides = array<i32>} : memref<2x3x32x32xf32, #tpu.memory_space<vmem>>, vector<1x1x32x32xf32>,
    return
  }
  func.func @transform_0(%arg0: i32) -> (i32, i32) {
    %c0_i32 = arith.constant 0 : i32
    %c0_i32_0 = arith.constant 0 : i32
    %c0_i32_1 = arith.constant 0 : i32
    return %c0_i32, %c0_i32_0 : i32, i32
  }
  func.func @transform_1(%arg0: i32) -> (i32, i32, i32) {
    %c0_i32 = arith.constant 0 : i32
    %c0_i32_0 = arith.constant 0 : i32
    %c0_i32_1 = arith.constant 0 : i32
    %c0_i32_2 = arith.constant 0 : i32
    return %c0_i32, %c0_i32_0, %c0_i32_1 : i32, i32, i32
  }
  func.func @transform_2(%arg0: i32) -> (i32, i32) {
    %c0_i32 = arith.constant 0 : i32
    %c0_i32_0 = arith.constant 0 : i32
    %c0_i32_1 = arith.constant 0 : i32
    return %c0_i32, %c0_i32_0 : i32, i32
  }
  func.func @transform_3(%arg0: i32) -> (i32, i32) {
    %c0_i32 = arith.constant 0 : i32
    %c0_i32_0 = arith.constant 0 : i32
    %c0_i32_1 = arith.constant 0 : i32
    return %c0_i32, %c0_i32_0 : i32, i32
  }
  func.func @transform_4(%arg0: i32) -> (i32, i32) {
    %c0_i32 = arith.constant 0 : i32
    %c0_i32_0 = arith.constant 0 : i32
    %c0_i32_1 = arith.constant 0 : i32
    return %c0_i32, %c0_i32_0 : i32, i32
  }
  func.func @transform_5(%arg0: i32) -> (i32, i32) {
    %c0_i32 = arith.constant 0 : i32
    %c0_i32_0 = arith.constant 0 : i32
    %c0_i32_1 = arith.constant 0 : i32
    return %c0_i32, %c0_i32_0 : i32, i32
  }
  func.func @transform_6(%arg0: i32) -> (i32, i32) {
    %c0_i32 = arith.constant 0 : i32
    %c0_i32_0 = arith.constant 0 : i32
    %c0_i32_1 = arith.constant 0 : i32
    return %c0_i32, %c0_i32_0 : i32, i32
  }
  func.func @transform_7(%arg0: i32) -> (i32, i32) {
    %c0_i32 = arith.constant 0 : i32
    %c0_i32_0 = arith.constant 0 : i32
    %c0_i32_1 = arith.constant 0 : i32
    return %c0_i32, %c0_i32_0 : i32, i32
  }
  func.func @transform_8(%arg0: i32) -> (i32, i32, i32) {
    %c0_i32 = arith.constant 0 : i32
    %c0_i32_0 = arith.constant 0 : i32
    %c0_i32_1 = arith.constant 0 : i32
    %c0_i32_2 = arith.constant 0 : i32
    return %c0_i32, %c0_i32_0, %c0_i32_1 : i32, i32, i32
  }
  func.func @transform_9(%arg0: i32) -> (i32, i32) {
    %c0_i32 = arith.constant 0 : i32
    %c0_i32_0 = arith.constant 0 : i32
    %c0_i32_1 = arith.constant 0 : i32
    return %c0_i32, %c0_i32_0 : i32, i32
  }
  func.func @transform_10(%arg0: i32) -> (i32, i32) {
    %c0_i32 = arith.constant 0 : i32
    %c0_i32_0 = arith.constant 0 : i32
    %c0_i32_1 = arith.constant 0 : i32
    return %c0_i32, %c0_i32_0 : i32, i32
  }
  func.func @transform_11(%arg0: i32) -> (i32, i32) {
    %c0_i32 = arith.constant 0 : i32
    %c0_i32_0 = arith.constant 0 : i32
    %c0_i32_1 = arith.constant 0 : i32
    return %c0_i32, %c0_i32_0 : i32, i32
  }
  func.func @transform_12(%arg0: i32) -> (i32, i32) {
    %c0_i32 = arith.constant 0 : i32
    %c0_i32_0 = arith.constant 0 : i32
    %c0_i32_1 = arith.constant 0 : i32
    return %c0_i32, %c0_i32_0 : i32, i32
  }
  func.func @transform_13(%arg0: i32) -> (i32, i32) {
    %c0_i32 = arith.constant 0 : i32
    %c0_i32_0 = arith.constant 0 : i32
    %c0_i32_1 = arith.constant 0 : i32
    return %c0_i32, %c0_i32_0 : i32, i32
  }
  func.func @transform_14(%arg0: i32) -> (i32, i32) {
    %c0_i32 = arith.constant 0 : i32
    %c0_i32_0 = arith.constant 0 : i32
    %c0_i32_1 = arith.constant 0 : i32
    return %c0_i32, %c0_i32_0 : i32, i32
  }
  func.func @transform_15(%arg0: i32) -> (i32, i32) {
    %c0_i32 = arith.constant 0 : i32
    %c0_i32_0 = arith.constant 0 : i32
    %c0_i32_1 = arith.constant 0 : i32
    return %c0_i32, %c0_i32_0 : i32, i32
  }
  func.func @transform_16(%arg0: i32) -> (i32, i32) {
    %c0_i32 = arith.constant 0 : i32
    %c0_i32_0 = arith.constant 0 : i32
    %c0_i32_1 = arith.constant 0 : i32
    return %c0_i32, %c0_i32_0 : i32, i32
  }
  func.func @transform_17(%arg0: i32) -> (i32, i32) {
    %c0_i32 = arith.constant 0 : i32
    %c0_i32_0 = arith.constant 0 : i32
    %c0_i32_1 = arith.constant 0 : i32
    return %c0_i32, %c0_i32_0 : i32, i32
  }
  func.func @transform_18(%arg0: i32) -> (i32, i32) {
    %c0_i32 = arith.constant 0 : i32
    %c0_i32_0 = arith.constant 0 : i32
    %c0_i32_1 = arith.constant 0 : i32
    return %c0_i32, %c0_i32_0 : i32, i32
  }
  func.func @transform_19(%arg0: i32) -> (i32, i32) {
    %c0_i32 = arith.constant 0 : i32
    %c0_i32_0 = arith.constant 0 : i32
    %c0_i32_1 = arith.constant 0 : i32
    return %c0_i32, %c0_i32_0 : i32, i32
  }
  func.func @transform_20(%arg0: i32) -> (i32, i32) {
    %c0_i32 = arith.constant 0 : i32
    %c0_i32_0 = arith.constant 0 : i32
    %c0_i32_1 = arith.constant 0 : i32
    return %c0_i32, %c0_i32_0 : i32, i32
  }
  func.func @transform_21(%arg0: i32) -> (i32, i32, i32, i32) {
    %c0_i32 = arith.constant 0 : i32
    %c0_i32_0 = arith.constant 0 : i32
    %c0_i32_1 = arith.constant 0 : i32
    %c0_i32_2 = arith.constant 0 : i32
    %c0_i32_3 = arith.constant 0 : i32
    return %c0_i32, %c0_i32_0, %c0_i32_1, %c0_i32_2 : i32, i32, i32, i32
  }
}

</mosaic_0001>

<bundles_post_ra>
// kernel: decoder_net_forward.1
= control target key start
LH: loop header
LB: loop body
LE: loop exit
PB: predicated region body
PF: predicated region fallthrough
CT: control target
= control target key end

     0   :  { %s8426_s0 = inlined_call_operand.vmem [shape: f32[16,128], index: 0, kind: input, shape index: {}]   ;;  %s8427_s1 = inlined_call_operand.hbm [shape: f32[3,128,128], index: 1, kind: input, shape index: {}]   ;;  %s8428_s2 = inlined_call_operand.vmem [shape: f32[1,128], index: 2, kind: input, shape index: {}]   ;;  %s8429_s3 = inlined_call_operand.hbm [shape: f32[128,128], index: 3, kind: input, shape index: {}]   ;;  %s8430_s4 = inlined_call_operand.vmem [shape: f32[1,128], index: 4, kind: input, shape index: {}]   ;;  %s8431_s5 = inlined_call_operand.hbm [shape: f32[128,128], index: 5, kind: input, shape index: {}]   ;;  %s8432_s6 = inlined_call_operand.vmem [shape: f32[1,128], index: 6, kind: input, shape index: {}]   ;;  %s8433_s7 = inlined_call_operand.vmem [shape: f32[1,128], index: 7, kind: input, shape index: {}]   ;;  %s8434_s8 = inlined_call_operand.hbm [shape: f32[3,128,128], index: 8, kind: input, shape index: {}]   ;;  %s8435_s9 = inlined_call_operand.vmem [shape: f32[1,128], index: 9, kind: input, shape index: {}]   ;;  %s8436_s10 = inlined_call_operand.hbm [shape: f32[128,128], index: 10, kind: input, shape index: {}]   ;;  %s8437_s11 = inlined_call_operand.vmem [shape: f32[1,128], index: 11, kind: input, shape index: {}]   ;;  %s8438_s12 = inlined_call_operand.vmem [shape: f32[256,256], index: 12, kind: input, shape index: {}]   ;;  %s8439_s13 = inlined_call_operand.vmem [shape: f32[256,256], index: 13, kind: input, shape index: {}]   ;;  %s8440_s14 = inlined_call_operand.vmem [shape: f32[1,256], index: 14, kind: input, shape index: {}]   ;;  %s8441_s15 = inlined_call_operand.vmem [shape: f32[256,256], index: 15, kind: input, shape index: {}]   ;;  %s8442_s16 = inlined_call_operand.vmem [shape: f32[1,256], index: 16, kind: input, shape index: {}]   ;;  %s8443_s17 = inlined_call_operand.vmem [shape: f32[1,256], index: 17, kind: input, shape index: {}]   ;;  %s8444_s18 = inlined_call_operand.vmem [shape: f32[512,96], index: 18, kind: input, shape index: {}]   ;;  %s8445_s19 = inlined_call_operand.vmem [shape: f32[512,96], index: 19, kind: input, shape index: {}]   ;;  %s8446_s20 = inlined_call_operand.vmem [shape: f32[1,96], index: 20, kind: input, shape index: {}]   ;;  %s8447_s21 = inlined_call_operand.hbm [shape: f32[2,3,32,32], index: 21, kind: output, shape index: {}]  }
   0x1   :  { %8453 = sst [smem:[#allocation16_spill]] %s8426_s0 }
   0x2   :  { %8454 = sst [smem:[#allocation17_spill]] %s8427_s1 }
   0x3   :  { %8455 = sst [smem:[#allocation18_spill]] %s8428_s2 }
   0x4   :  { %8456 = sst [smem:[#allocation19_spill]] %s8429_s3 }
   0x5   :  { %8457 = sst [smem:[#allocation20_spill]] %s8430_s4 }
   0x6   :  { %8458 = sst [smem:[#allocation21_spill]] %s8431_s5 }
   0x7   :  { %8459 = sst [smem:[#allocation22_spill]] %s8446_s20 }
   0x8   :  { %8460 = sst [smem:[#allocation23_spill]] %s8447_s21 }
   0x9   :  { %26 = vsyncpa [#allocation3], 0 }
   0xa   :  { %27 = vsyncpa [#allocation6], 0 }
   0xb   :  { %28 = vsyncpa [#allocation9], 0 }
   0xc   :  { %29 = vsyncpa [#allocation4], 0  ;;  %s6085_s2 = smov [#allocation5]   ;;  %s6086_s26 = smov [#allocation8]  }
   0xd   :  { %s51_s25 = sshll.u32 %s6085_s2, 4  ;;  %s81_s27 = sshll.u32 %s6086_s26, 4  ;;  %s52_s25 = int_to_ptr.vmem [resolvable:$true] %s51_s25  ;;  %s6207_s27 = int_to_ptr.vmem [resolvable:$true] %s81_s27 }
   0xe   :  { %s8461_s29 = sld [smem:[#allocation19_spill]] }
  0x14   :  { %s5945_s0 = scalar_lea.hbm %s8461_s29, 2048 }
  0x15   :  { %p5946_p0 = scmp.ne.s32.totalorder %s8461_s29, %s5945_s0  ;;  %p5949_p1 = scmp.lt.u32.totalorder %s5945_s0, %s8461_s29 }
  0x17   :  { %p5951_p2 = pnand %p5949_p1, %p5946_p0 }
  0x19   :  { %5954 = shalt.err (!%p5951_p2)
}
  0x1a   :  { %s5955_s23 = scalar_lea.vmem %s52_s25, 2048  ;;  %p5960_p4 = scmp.lt.s32.totalorder %s52_s25, %s52_s25 }
  0x1b   :  { %p5956_p3 = scmp.ne.s32.totalorder %s52_s25, %s5955_s23  ;;  %p5961_p5 = scmp.lt.s32.totalorder %s5955_s23, %s5955_s23 }
  0x1d   :  { %p5962_p6 = por %p5961_p5, %p5960_p4 }
  0x1f   :  { %p5963_p7 = pnand %p5962_p6, %p5956_p3 }
  0x21   :  { %5966 = shalt.err (!%p5963_p7)
}
  0x22   :  { %s6087_s1 = smov 128   ;;  %s6088_s24 = smov 8  }
  0x23   :  { %57 = dma.hbm_to_vmem [thread:$0]  %s8461_s29, 2048, %s52_s25, [#allocation6], %s6087_s1, %s6087_s1, %s6088_s24  }
  0x24   :  { %s5967_s0 = scalar_lea.hbm %s8434_s8, 6144 }
  0x25   :  { %p5968_p8 = scmp.ne.s32.totalorder %s8434_s8, %s5967_s0  ;;  %p5971_p9 = scmp.lt.u32.totalorder %s5967_s0, %s8434_s8 }
  0x27   :  { %p5973_p10 = pnand %p5971_p9, %p5968_p8 }
  0x29   :  { %5976 = shalt.err (!%p5973_p10)
}
  0x2a   :  { %s5977_s23 = scalar_lea.vmem %s6207_s27, 6144  ;;  %p5982_p12 = scmp.lt.s32.totalorder %s6207_s27, %s6207_s27 }
  0x2b   :  { %p5978_p11 = scmp.ne.s32.totalorder %s6207_s27, %s5977_s23  ;;  %p5983_p13 = scmp.lt.s32.totalorder %s5977_s23, %s5977_s23 }
  0x2d   :  { %p5984_p0 = por %p5983_p13, %p5982_p12 }
  0x2f   :  { %p5985_p1 = pnand %p5984_p0, %p5978_p11 }
  0x31   :  { %5988 = shalt.err (!%p5985_p1)
}
  0x32   :  { %87 = dma.hbm_to_vmem [thread:$0]  %s8434_s8, 6144, %s6207_s27, [#allocation9], %s6087_s1, %s6087_s1, %s6088_s24  }
  0x33   :  { %s6089_s2 = smov [#allocation2]   ;;  %s6090_s3 = smov [#allocation7]  }
  0x34   :  { %s37_s26 = sshll.u32 %s6089_s2, 4  ;;  %s65_s28 = sshll.u32 %s6090_s3, 4  ;;  %s38_s26 = int_to_ptr.vmem [resolvable:$true] %s37_s26  ;;  %s6244_s28 = int_to_ptr.vmem [resolvable:$true] %s65_s28 }
  0x35   :  { %s8462_s30 = sld [smem:[#allocation17_spill]] }
  0x3b   :  { %s5989_s5 = scalar_lea.hbm %s8462_s30, 6144 }
  0x3c   :  { %p5990_p2 = scmp.ne.s32.totalorder %s8462_s30, %s5989_s5  ;;  %p5993_p3 = scmp.lt.u32.totalorder %s5989_s5, %s8462_s30 }
  0x3e   :  { %p5995_p4 = pnand %p5993_p3, %p5990_p2 }
  0x40   :  { %5998 = shalt.err (!%p5995_p4)
}
  0x41   :  { %s5999_s8 = scalar_lea.vmem %s38_s26, 6144  ;;  %p6004_p6 = scmp.lt.s32.totalorder %s38_s26, %s38_s26 }
  0x42   :  { %p6000_p5 = scmp.ne.s32.totalorder %s38_s26, %s5999_s8  ;;  %p6005_p7 = scmp.lt.s32.totalorder %s5999_s8, %s5999_s8 }
  0x44   :  { %p6006_p8 = por %p6005_p7, %p6004_p6 }
  0x46   :  { %p6007_p9 = pnand %p6006_p8, %p6000_p5 }
  0x48   :  { %6010 = shalt.err (!%p6007_p9)
}
  0x49   :  { %43 = dma.hbm_to_vmem [thread:$0]  %s8462_s30, 6144, %s38_s26, [#allocation3], %s6087_s1, %s6087_s1, %s6088_s24  }
  0x4a   :  { %s8463_s20 = sld [smem:[#allocation21_spill]] }
  0x50   :  { %s6011_s21 = scalar_lea.hbm %s8463_s20, 2048 }
  0x51   :  { %p6012_p10 = scmp.ne.s32.totalorder %s8463_s20, %s6011_s21  ;;  %p6015_p11 = scmp.lt.u32.totalorder %s6011_s21, %s8463_s20 }
  0x53   :  { %p6017_p12 = pnand %p6015_p11, %p6012_p10 }
  0x55   :  { %6020 = shalt.err (!%p6017_p12)
}
  0x56   :  { %s6021_s22 = scalar_lea.vmem %s6244_s28, 2048  ;;  %p6026_p0 = scmp.lt.s32.totalorder %s6244_s28, %s6244_s28 }
  0x57   :  { %p6022_p13 = scmp.ne.s32.totalorder %s6244_s28, %s6021_s22  ;;  %p6027_p1 = scmp.lt.s32.totalorder %s6021_s22, %s6021_s22 }
  0x59   :  { %p6028_p2 = por %p6027_p1, %p6026_p0 }
  0x5b   :  { %p6029_p3 = pnand %p6028_p2, %p6022_p13 }
  0x5d   :  { %6032 = shalt.err (!%p6029_p3)
}
  0x5e   :  { %71 = dma.hbm_to_vmem [thread:$0]  %s8463_s20, 2048, %s6244_s28, [#allocation6], %s6087_s1, %s6087_s1, %s6088_s24  }
  0x5f   :  { %s6091_s23 = smov [#allocation10]   ;;  %s6033_s29 = scalar_lea.hbm %s8436_s10, 2048 }
  0x60   :  { %s95_s8 = sshll.u32 %s6091_s23, 4  ;;  %p6034_p4 = scmp.ne.s32.totalorder %s8436_s10, %s6033_s29  ;;  %s96_s8 = int_to_ptr.vmem [resolvable:$true] %s95_s8 }
  0x61   :  { %p6037_p5 = scmp.lt.u32.totalorder %s6033_s29, %s8436_s10 }
  0x63   :  { %p6039_p6 = pnand %p6037_p5, %p6034_p4 }
  0x65   :  { %6042 = shalt.err (!%p6039_p6)
}
  0x66   :  { %s6043_s4 = scalar_lea.vmem %s96_s8, 2048  ;;  %p6048_p8 = scmp.lt.s32.totalorder %s96_s8, %s96_s8 }
  0x67   :  { %p6044_p7 = scmp.ne.s32.totalorder %s96_s8, %s6043_s4  ;;  %p6049_p9 = scmp.lt.s32.totalorder %s6043_s4, %s6043_s4 }
  0x69   :  { %p6050_p10 = por %p6049_p9, %p6048_p8 }
  0x6b   :  { %p6051_p11 = pnand %p6050_p10, %p6044_p7 }
  0x6d   :  { %6054 = shalt.err (!%p6051_p11)
}
  0x6e   :  { %101 = dma.hbm_to_vmem [thread:$0]  %s8436_s10, 2048, %s96_s8, [#allocation9], %s6087_s1, %s6087_s1, %s6088_s24  }
  0x6f   :  { %6077 = dma.done.wait [#allocation3], 6144  }
  0x70   :  { %6078 = vsyncadd [#allocation3], 4294961152 }
  0x71   :  { %6079 = dma.done.wait [#allocation6], 4096  }
  0x72   :  { %6080 = vsyncadd [#allocation6], 4294963200 }
  0x73   :  { %6081 = dma.done.wait [#allocation9], 8192  }
  0x74   :  { %6082 = vsyncadd [#allocation9], 4294959104  ;;  %v174_v0 = vld [vmem:[#allocation2 + $0x80] sm:$0xff]  ;;  %v175_v1 = vld [vmem:[#allocation2 + $0x88] sm:$0xff]  ;;  %s8464_s22 = sld [smem:[#allocation16_spill]]  ;;  %vm147_vm0 = vcmask 1040384  }
  0x75   :  { %v176_v2 = vld [vmem:[#allocation2 + $0x90] sm:$0xff]  ;;  %v5139_v3 = vpack.c.bf16 %v175_v1, %v174_v0  ;;  %v177_v4 = vld [vmem:[#allocation2 + $0x98] sm:$0xff]  ;;  %v178_v6 = vld [vmem:[#allocation2 + $0xa0] sm:$0xff]  ;;  %vm154_vm2 = vcmask 1046528   ;;  %s8467_s27 = sld [smem:[#allocation18_spill]]  ;;  %s8468_s2 = sld [smem:[#allocation20_spill]] }
  0x76   :  { %v5143_v5 = vpack.c.bf16 %v177_v4, %v176_v2  ;;  %v179_v7 = vld [vmem:[#allocation2 + $0xa8] sm:$0xff]  ;;  %v180_v10 = vld [vmem:[#allocation2 + $0xb0] sm:$0xff]  ;;  %v181_v11 = vld [vmem:[#allocation2 + $0xb8] sm:$0xff]  ;;  %s8489_s21 = sld [smem:[#allocation22_spill]]  ;;  %vm4212_vm3 = vcmask 261120   ;;  %s6094_s3 = smov 96  }
  0x77   :  { %5140 = vmatprep.subr.bf16.mxu0 %v5139_v3  ;;  %v5147_v8 = vpack.c.bf16 %v179_v7, %v178_v6  ;;  %v5151_v13 = vpack.c.bf16 %v181_v11, %v180_v10  ;;  %v182_v14 = vld [vmem:[#allocation2 + $0xc0] sm:$0xff]  ;;  %v183_v15 = vld [vmem:[#allocation2 + $0xc8] sm:$0xff]  ;;  %v184_v17 = vld [vmem:[#allocation2 + $0xd0] sm:$0xff] }
  0x78   :  { %5142 = vmatpush3.bf16.msra.mxu0 %v5139_v3  ;;  %v5155_v16 = vpack.c.bf16 %v183_v15, %v182_v14  ;;  %v185_v18 = vld [vmem:[#allocation2 + $0xd8] sm:$0xff]  ;;  %v445_v19 = vld [vmem:[#allocation5] sm:$0xff]  ;;  %v446_v21 = vld [vmem:[#allocation5 + $0x8] sm:$0xff] }
  0x79   :  { %5144 = vmatprep.subr.bf16.mxu0 %v5143_v5  ;;  %v5159_v20 = vpack.c.bf16 %v185_v18, %v184_v17  ;;  %v447_v22 = vld [vmem:[#allocation5 + $0x10] sm:$0xff]  ;;  %v448_v23 = vld [vmem:[#allocation5 + $0x18] sm:$0xff]  ;;  %v186_v24 = vld [vmem:[#allocation2 + $0xe0] sm:$0xff]  ;;  %v5235_v26 = vpack.c.bf16 %v446_v21, %v445_v19 }
  0x7a   :  { %v6299_v9 = vld [vmem:[%s8464_s22] sm:$0xff]  ;;  %v187_v25 = vld [vmem:[#allocation2 + $0xe8] sm:$0xff]  ;;  %v5239_v27 = vpack.c.bf16 %v448_v23, %v447_v22  ;;  %v188_v31 = vld [vmem:[#allocation2 + $0xf0] sm:$0xff] }
  0x7b   :  { %v6302_v12 = vmax.f32 %v6299_v9, 0.0  ;;  %v449_v28 = vld [vmem:[#allocation5 + $0x20] sm:$0xff]  ;;  %v450_v29 = vld [vmem:[#allocation5 + $0x28] sm:$0xff]  ;;  %5236 = vmatprep.subr.bf16.mxu1 %v5235_v26  ;;  %v5163_v30 = vpack.c.bf16 %v187_v25, %v186_v24  ;;  %v189_v32 = vld [vmem:[#allocation2 + $0xf8] sm:$0xff] }
  0x7c   :  { %5146 = vmatpush3.bf16.msra.mxu0 %v5143_v5  ;;  %5238 = vmatpush3.bf16.msra.mxu1 %v5235_v26  ;;  %v5243_v33 = vpack.c.bf16 %v450_v29, %v449_v28  ;;  %v451_v34 = vld [vmem:[#allocation5 + $0x30] sm:$0xff]  ;;  %v452_v35 = vld [vmem:[#allocation5 + $0x38] sm:$0xff]  ;;  %v5167_v36 = vpack.c.bf16 %v189_v32, %v188_v31  ;;  %v157_v37 = vld [vmem:[#allocation2] sm:$0xff] }
  0x7d   :  { %4821 = vmatprep.mubr.f32.mxu0 %v6302_v12  ;;  %5148 = vmatprep.subr.bf16.mxu0 %v5147_v8  ;;  %v158_v38 = vld [vmem:[#allocation2 + $0x8] sm:$0xff]  ;;  %v5247_v39 = vpack.c.bf16 %v452_v35, %v451_v34  ;;  %v453_v40 = vld [vmem:[#allocation5 + $0x40] sm:$0xff]  ;;  %v159_v44 = vld [vmem:[#allocation2 + $0x10] sm:$0xff]  ;;  %v143_v50 = vrot.slane %v6302_v12, 7  ;;  %v150_v19 = vrot.slane %v6302_v12, 1 }
  0x7e   :  { %5240 = vmatprep.subr.bf16.mxu1 %v5239_v27  ;;  %v454_v41 = vld [vmem:[#allocation5 + $0x48] sm:$0xff]  ;;  %v5171_v43 = vpack.c.bf16 %v158_v38, %v157_v37  ;;  %v160_v45 = vld [vmem:[#allocation2 + $0x18] sm:$0xff]  ;;  %v455_v48 = vld [vmem:[#allocation5 + $0x50] sm:$0xff] }
  0x7f   :  { %v6308_v42 = vld [vmem:[%s8464_s22 + $0x8] sm:$0xff]  ;;  %v5251_v46 = vpack.c.bf16 %v454_v41, %v453_v40  ;;  %v456_v49 = vld [vmem:[#allocation5 + $0x58] sm:$0xff]  ;;  %v5175_v51 = vpack.c.bf16 %v160_v45, %v159_v44  ;;  %vm6315_vm1 = vmneg %vm147_vm0 }
  0x80   :  { %5150 = vmatpush3.bf16.msra.mxu0 %v5147_v8  ;;  %5242 = vmatpush3.bf16.msra.mxu1 %v5239_v27  ;;  %v6311_v47 = vmax.f32 %v6308_v42, 0.0  ;;  %v161_v53 = vld [vmem:[#allocation2 + $0x20] sm:$0xff]  ;;  %v162_v54 = vld [vmem:[#allocation2 + $0x28] sm:$0xff]  ;;  %v5255_v55 = vpack.c.bf16 %v456_v49, %v455_v48  ;;  %v163_v59 = vld [vmem:[#allocation2 + $0x30] sm:$0xff] }
  0x81   :  { %5152 = vmatprep.subr.bf16.mxu0 %v5151_v13  ;;  %5244 = vmatprep.subr.bf16.mxu1 %v5243_v33  ;;  %v457_v56 = vld [vmem:[#allocation5 + $0x60] sm:$0xff]  ;;  %v458_v57 = vld [vmem:[#allocation5 + $0x68] sm:$0xff]  ;;  %v5179_v58 = vpack.c.bf16 %v162_v54, %v161_v53  ;;  %v164_v60 = vld [vmem:[#allocation2 + $0x38] sm:$0xff] }
  0x82   :  { %v5259_v61 = vpack.c.bf16 %v458_v57, %v457_v56  ;;  %v5183_v62 = vpack.c.bf16 %v164_v60, %v163_v59  ;;  %v165_v63 = vld [vmem:[#allocation2 + $0x40] sm:$0xff]  ;;  %v166_v0 = vld [vmem:[#allocation2 + $0x48] sm:$0xff]  ;;  %v167_v2 = vld [vmem:[#allocation2 + $0x50] sm:$0xff]  ;;  %v144_v18 = vrot.slane %v6311_v47, 7  ;;  %v151_v38 = vrot.slane %v6311_v47, 1 }
  0x83   :  { %v5187_v1 = vpack.c.bf16 %v166_v0, %v165_v63  ;;  %v168_v3 = vld [vmem:[#allocation2 + $0x58] sm:$0xff]  ;;  %v169_v5 = vld [vmem:[#allocation2 + $0x60] sm:$0xff]  ;;  %v170_v6 = vld [vmem:[#allocation2 + $0x68] sm:$0xff] }
  0x84   :  { %5154 = vmatpush3.bf16.msra.mxu0 %v5151_v13  ;;  %5246 = vmatpush3.bf16.msra.mxu1 %v5243_v33  ;;  %v5191_v4 = vpack.c.bf16 %v168_v3, %v167_v2  ;;  %v5195_v7 = vpack.c.bf16 %v170_v6, %v169_v5  ;;  %v171_v8 = vld [vmem:[#allocation2 + $0x70] sm:$0xff]  ;;  %v172_v10 = vld [vmem:[#allocation2 + $0x78] sm:$0xff]  ;;  %v341_v13 = vld [vmem:[#allocation2 + $0x100] sm:$0xff] }
  0x85   :  { %5156 = vmatprep.subr.bf16.mxu0 %v5155_v16  ;;  %5248 = vmatprep.subr.bf16.mxu1 %v5247_v39  ;;  %v5199_v11 = vpack.c.bf16 %v172_v10, %v171_v8  ;;  %v342_v14 = vld [vmem:[#allocation2 + $0x108] sm:$0xff]  ;;  %v344_v17 = vld [vmem:[#allocation2 + $0x118] sm:$0xff]  ;;  %v345_v21 = vld [vmem:[#allocation2 + $0x120] sm:$0xff] }
  0x86   :  { %v5203_v15 = vpack.c.bf16 %v342_v14, %v341_v13  ;;  %v346_v22 = vld [vmem:[#allocation2 + $0x128] sm:$0xff]  ;;  %v347_v24 = vld [vmem:[#allocation2 + $0x130] sm:$0xff]  ;;  %v348_v25 = vld [vmem:[#allocation2 + $0x138] sm:$0xff] }
  0x87   :  { %v5211_v23 = vpack.c.bf16 %v346_v22, %v345_v21  ;;  %v5215_v26 = vpack.c.bf16 %v348_v25, %v347_v24  ;;  %v349_v27 = vld [vmem:[#allocation2 + $0x140] sm:$0xff]  ;;  %v350_v12 = vld [vmem:[#allocation2 + $0x148] sm:$0xff]  ;;  %v351_v29 = vld [vmem:[#allocation2 + $0x150] sm:$0xff] }
  0x88   :  { %5158 = vmatpush3.bf16.msra.mxu0 %v5155_v16  ;;  %5250 = vmatpush3.bf16.msra.mxu1 %v5247_v39  ;;  %v343_v16 = vld [vmem:[#allocation2 + $0x110] sm:$0xff]  ;;  %v5219_v28 = vpack.c.bf16 %v350_v12, %v349_v27  ;;  %v353_v32 = vld [vmem:[#allocation2 + $0x160] sm:$0xff]  ;;  %v354_v33 = vld [vmem:[#allocation2 + $0x168] sm:$0xff] }
  0x89   :  { %5160 = vmatprep.subr.bf16.mxu0 %v5159_v20  ;;  %5252 = vmatprep.subr.bf16.mxu1 %v5251_v46  ;;  %v5227_v34 = vpack.c.bf16 %v354_v33, %v353_v32  ;;  %v355_v35 = vld [vmem:[#allocation2 + $0x170] sm:$0xff]  ;;  %v460_v40 = vld [vmem:[#allocation5 + $0x78] sm:$0xff]  ;;  %v546_v44 = vld [vmem:[#allocation7 + $0x8] sm:$0xff] }
  0x8a   :  { %v459_v39 = vld [vmem:[#allocation5 + $0x70] sm:$0xff]  ;;  %v548_v53 = vld [vmem:[#allocation7 + $0x18] sm:$0xff]  ;;  %v549_v57 = vld [vmem:[#allocation7 + $0x20] sm:$0xff] }
  0x8b   :  { %v5263_v41 = vpack.c.bf16 %v460_v40, %v459_v39  ;;  %v551_v60 = vld [vmem:[#allocation7 + $0x30] sm:$0xff]  ;;  %v553_v63 = vld [vmem:[#allocation7 + $0x40] sm:$0xff]  ;;  %v554_v0 = vld [vmem:[#allocation7 + $0x48] sm:$0xff] }
  0x8c   :  { %5162 = vmatpush3.bf16.msra.mxu0 %v5159_v20  ;;  %5254 = vmatpush3.bf16.msra.mxu1 %v5251_v46  ;;  %v5207_v20 = vpack.c.bf16 %v344_v17, %v343_v16  ;;  %v4403_v46 = vld [vmem:[%s8467_s27] ss:$0 sm:$0xff]  ;;  %v555_v2 = vld [vmem:[#allocation7 + $0x50] sm:$0xff]  ;;  %v556_v3 = vld [vmem:[#allocation7 + $0x58] sm:$0xff] }
  0x8d   :  { %5164 = vmatprep.subr.bf16.mxu0 %v5163_v30  ;;  %5256 = vmatprep.subr.bf16.mxu1 %v5255_v55  ;;  %v557_v5 = vld [vmem:[#allocation7 + $0x60] sm:$0xff]  ;;  %v558_v6 = vld [vmem:[#allocation7 + $0x68] sm:$0xff]  ;;  %v559_v8 = vld [vmem:[#allocation7 + $0x70] sm:$0xff] }
  0x8e   :  { %v560_v10 = vld [vmem:[#allocation7 + $0x78] sm:$0xff]  ;;  %v4404_v13 = vld [vmem:[%s8468_s2] ss:$0 sm:$0xff]  ;;  %v786_v32 = vld [vmem:[#allocation8 + $0x88] sm:$0xff] }
  0x8f   :  { %v791_v40 = vld [vmem:[#allocation8 + $0xb0] sm:$0xff]  ;;  %v3033_v52 = vld [vmem:[%s8444_s18 + $0x140] sm:$0xff] }
  0x90   :  { %5166 = vmatpush3.bf16.msra.mxu0 %v5163_v30  ;;  %5258 = vmatpush3.bf16.msra.mxu1 %v5255_v55  ;;  %v352_v30 = vld [vmem:[#allocation2 + $0x158] sm:$0xff] }
  0x91   :  { %5168 = vmatprep.subr.bf16.mxu0 %v5167_v36  ;;  %5260 = vmatprep.subr.bf16.mxu1 %v5259_v61  ;;  %v5223_v31 = vpack.c.bf16 %v352_v30, %v351_v29 }
  0x94   :  { %5170 = vmatpush3.bf16.msra.mxu0 %v5167_v36  ;;  %5262 = vmatpush3.bf16.msra.mxu1 %v5259_v61  ;;  %v356_v36 = vld [vmem:[#allocation2 + $0x178] sm:$0xff] }
  0x95   :  { %5172 = vmatprep.subr.bf16.mxu0 %v5171_v43  ;;  %v5231_v37 = vpack.c.bf16 %v356_v36, %v355_v35  ;;  %5264 = vmatprep.subr.bf16.mxu1 %v5263_v41  ;;  %v552_v61 = vld [vmem:[#allocation7 + $0x38] sm:$0xff] }
  0x96   :  { %v788_v35 = vld [vmem:[#allocation8 + $0x98] sm:$0xff] }
  0x97   :  { %4822 = vmatmul.mubr.f32.vlgmr.msra.gmra.mrb[0].mxu0 %v6311_v47 }
  0x98   :  { %5174 = vmatpush3.bf16.msra.mxu0 %v5171_v43  ;;  %4856 = vmatprep.mubr.msk.f32.mxu0 %vm6315_vm1, %v143_v50  ;;  %v545_v43 = vld [vmem:[#allocation7] sm:$0xff] }
  0x99   :  { %5176 = vmatprep.subr.bf16.mxu0 %v5175_v51  ;;  %5266 = vmatpush3.bf16.msra.mxu1 %v5263_v41  ;;  %v5267_v45 = vpack.c.bf16 %v546_v44, %v545_v43  ;;  %v792_v41 = vld [vmem:[#allocation8 + $0xb8] sm:$0xff]  ;;  %v793_v44 = vld [vmem:[#allocation8 + $0xc0] sm:$0xff] }
  0x9a   :  { %v5343_v43 = vpack.c.bf16 %v792_v41, %v791_v40  ;;  %v770_v41 = vld [vmem:[#allocation8 + $0x10] sm:$0xff] }
  0x9b   :  { %5268 = vmatprep.subr.bf16.mxu1 %v5267_v45 }
  0x9c   :  { %5178 = vmatpush3.bf16.msra.mxu0 %v5175_v51  ;;  %v547_v51 = vld [vmem:[#allocation7 + $0x10] sm:$0xff] }
  0x9d   :  { %5180 = vmatprep.subr.bf16.mxu0 %v5179_v58  ;;  %v5271_v56 = vpack.c.bf16 %v548_v53, %v547_v51  ;;  %v798_v51 = vld [vmem:[#allocation8 + $0xe8] sm:$0xff] }
  0xa0   :  { %5182 = vmatpush3.bf16.msra.mxu0 %v5179_v58  ;;  %v550_v58 = vld [vmem:[#allocation7 + $0x28] sm:$0xff] }
  0xa1   :  { %5184 = vmatprep.subr.bf16.mxu0 %v5183_v62  ;;  %v5275_v59 = vpack.c.bf16 %v550_v58, %v549_v57  ;;  %v768_v57 = vld [vmem:[#allocation8] sm:$0xff]  ;;  %v769_v58 = vld [vmem:[#allocation8 + $0x8] sm:$0xff] }
  0xa4   :  { %5186 = vmatpush3.bf16.msra.mxu0 %v5183_v62  ;;  %v5279_v62 = vpack.c.bf16 %v552_v61, %v551_v60  ;;  %v1056_v60 = vld [vmem:[#allocation10] sm:$0xff]  ;;  %v1057_v61 = vld [vmem:[#allocation10 + $0x8] sm:$0xff] }
  0xa5   :  { %5188 = vmatprep.subr.bf16.mxu0 %v5187_v1 }
  0xa8   :  { %5190 = vmatpush3.bf16.msra.mxu0 %v5187_v1  ;;  %v5283_v1 = vpack.c.bf16 %v554_v0, %v553_v63  ;;  %v5427_v63 = vpack.c.bf16 %v1057_v61, %v1056_v60  ;;  %v1059_v0 = vld [vmem:[#allocation10 + $0x18] sm:$0xff]  ;;  %v781_v60 = vld [vmem:[#allocation8 + $0x68] sm:$0xff] }
  0xa9   :  { %5192 = vmatprep.subr.bf16.mxu0 %v5191_v4 }
  0xac   :  { %5194 = vmatpush3.bf16.msra.mxu0 %v5191_v4  ;;  %v5287_v4 = vpack.c.bf16 %v556_v3, %v555_v2  ;;  %v1060_v2 = vld [vmem:[#allocation10 + $0x20] sm:$0xff]  ;;  %v1061_v3 = vld [vmem:[#allocation10 + $0x28] sm:$0xff] }
  0xad   :  { %5196 = vmatprep.subr.bf16.mxu0 %v5195_v7 }
  0xb0   :  { %5198 = vmatpush3.bf16.msra.mxu0 %v5195_v7  ;;  %v5291_v7 = vpack.c.bf16 %v558_v6, %v557_v5  ;;  %v1062_v5 = vld [vmem:[#allocation10 + $0x30] sm:$0xff]  ;;  %v1063_v6 = vld [vmem:[#allocation10 + $0x38] sm:$0xff] }
  0xb1   :  { %5200 = vmatprep.subr.bf16.mxu0 %v5199_v11 }
  0xb4   :  { %5202 = vmatpush3.bf16.msra.mxu0 %v5199_v11  ;;  %v5295_v11 = vpack.c.bf16 %v560_v10, %v559_v8  ;;  %v1064_v8 = vld [vmem:[#allocation10 + $0x40] sm:$0xff]  ;;  %v1065_v10 = vld [vmem:[#allocation10 + $0x48] sm:$0xff] }
  0xb5   :  { %5204 = vmatprep.subr.bf16.mxu0 %v5203_v15 }
  0xb7   :  { %4857 = vmatmul.mubr.msk.f32.vlgmr.msra.gmra.mrb[0].mxu0 %vm6315_vm1, %v144_v18 }
  0xb8   :  { %5206 = vmatpush3.bf16.msra.mxu0 %v5203_v15  ;;  %4891 = vmatprep.mubr.msk.f32.mxu0 %vm154_vm2, %v150_v19 }
  0xb9   :  { %5208 = vmatprep.subr.bf16.mxu0 %v5207_v20 }
  0xbc   :  { %5210 = vmatpush3.bf16.msra.mxu0 %v5207_v20 }
  0xbd   :  { %5212 = vmatprep.subr.bf16.mxu0 %v5211_v23 }
  0xc0   :  { %5214 = vmatpush3.bf16.msra.mxu0 %v5211_v23 }
  0xc1   :  { %5216 = vmatprep.subr.bf16.mxu0 %v5215_v26 }
  0xc4   :  { %5218 = vmatpush3.bf16.msra.mxu0 %v5215_v26 }
  0xc5   :  { %5220 = vmatprep.subr.bf16.mxu0 %v5219_v28 }
  0xc8   :  { %5222 = vmatpush3.bf16.msra.mxu0 %v5219_v28 }
  0xc9   :  { %5224 = vmatprep.subr.bf16.mxu0 %v5223_v31 }
  0xcc   :  { %5226 = vmatpush3.bf16.msra.mxu0 %v5223_v31  ;;  %v785_v31 = vld [vmem:[#allocation8 + $0x80] sm:$0xff] }
  0xcd   :  { %5228 = vmatprep.subr.bf16.mxu0 %v5227_v34  ;;  %v5331_v33 = vpack.c.bf16 %v786_v32, %v785_v31  ;;  %v731_v31 = vld [vmem:[%s8432_s6] sm:$0x1] }
  0xd0   :  { %5230 = vmatpush3.bf16.msra.mxu0 %v5227_v34  ;;  %v787_v34 = vld [vmem:[#allocation8 + $0x90] sm:$0xff] }
  0xd1   :  { %5232 = vmatprep.subr.bf16.mxu0 %v5231_v37  ;;  %v5335_v36 = vpack.c.bf16 %v788_v35, %v787_v34 }
  0xd4   :  { %5234 = vmatpush3.bf16.msra.mxu0 %v5231_v37  ;;  %v789_v37 = vld [vmem:[#allocation8 + $0xa0] sm:$0xff] }
  0xd5   :  { %5332 = vmatprep.subr.bf16.mxu0 %v5331_v33 }
  0xd7   :  { %4892 = vmatmul.mubr.msk.f32.vlgmr.msra.gmra.mrb[0].mxu0 %vm154_vm2, %v151_v38  ;;  %v790_v38 = vld [vmem:[#allocation8 + $0xa8] sm:$0xff] }
  0xd8   :  { %5334 = vmatpush3.bf16.msra.mxu0 %v5331_v33  ;;  %v5339_v39 = vpack.c.bf16 %v790_v38, %v789_v37 }
  0xd9   :  { %5336 = vmatprep.subr.bf16.mxu0 %v5335_v36 }
  0xdc   :  { %5338 = vmatpush3.bf16.msra.mxu0 %v5335_v36  ;;  %v4405_v36 = vld [vmem:[%s8433_s7] ss:$0 sm:$0xff] }
  0xdd   :  { %5340 = vmatprep.subr.bf16.mxu0 %v5339_v39 }
  0xe0   :  { %5342 = vmatpush3.bf16.msra.mxu0 %v5339_v39 }
  0xe1   :  { %5344 = vmatprep.subr.bf16.mxu0 %v5343_v43 }
  0xe4   :  { %5346 = vmatpush3.bf16.msra.mxu0 %v5343_v43  ;;  %v771_v43 = vld [vmem:[#allocation8 + $0x18] sm:$0xff] }
 0x1aa   :  { %v4893_v48 = vpop.f32.mrb[0].mxu0 }
 0x1ab   :  { %v442_v49 = vadd.f32 %v4893_v48, %v4403_v46  ;;  %v423_v50 = vpop.f32.mrb[1].mxu0 }
 0x1ac   :  { %v441_v47 = vadd.f32 %v4403_v46, %v423_v50  ;;  %v795_v46 = vld [vmem:[#allocation8 + $0xd0] sm:$0xff] }
 0x1ad   :  { %v444_v55 = vmax.f32 %v442_v49, 0.0  ;;  %v796_v49 = vld [vmem:[#allocation8 + $0xd8] sm:$0xff] }
 0x1ae   :  { %v443_v54 = vmax.f32 %v441_v47, 0.0  ;;  %v5351_v50 = vpack.c.bf16 %v796_v49, %v795_v46  ;;  %v797_v47 = vld [vmem:[#allocation8 + $0xe0] sm:$0xff]  ;;  %v5367_v46 = vpack.c.bf16 %v771_v43, %v770_v41 }
 0x1af   :  { %v5355_v53 = vpack.c.bf16 %v798_v51, %v797_v47  ;;  %v772_v49 = vld [vmem:[#allocation8 + $0x20] sm:$0xff]  ;;  %v775_v47 = vld [vmem:[#allocation8 + $0x38] sm:$0xff] }
 0x1b0   :  { %4926 = vmatprep.mubr.f32.mxu1 %v443_v54  ;;  %v799_v54 = vld [vmem:[#allocation8 + $0xf0] sm:$0xff]  ;;  %v1323_v43 = vld [vmem:[%s8439_s13] sm:$0xff] }
 0x1b1   :  { %4927 = vmatmul.mubr.f32.vlgmr.msra.gmra.mrb[0].mxu1 %v444_v55  ;;  %v800_v55 = vld [vmem:[#allocation8 + $0xf8] sm:$0xff] }
 0x1b2   :  { %5270 = vmatpush3.bf16.msra.mxu1 %v5267_v45 }
 0x1b3   :  { %5272 = vmatprep.subr.bf16.mxu1 %v5271_v56 }
 0x1b6   :  { %5274 = vmatpush3.bf16.msra.mxu1 %v5271_v56 }
 0x1b7   :  { %5276 = vmatprep.subr.bf16.mxu1 %v5275_v59 }
 0x1ba   :  { %5278 = vmatpush3.bf16.msra.mxu1 %v5275_v59 }
 0x1bb   :  { %5280 = vmatprep.subr.bf16.mxu1 %v5279_v62 }
 0x1be   :  { %5282 = vmatpush3.bf16.msra.mxu1 %v5279_v62 }
 0x1bf   :  { %5284 = vmatprep.subr.bf16.mxu1 %v5283_v1 }
 0x1c2   :  { %5286 = vmatpush3.bf16.msra.mxu1 %v5283_v1 }
 0x1c3   :  { %5288 = vmatprep.subr.bf16.mxu1 %v5287_v4 }
 0x1c6   :  { %5290 = vmatpush3.bf16.msra.mxu1 %v5287_v4 }
 0x1c7   :  { %5292 = vmatprep.subr.bf16.mxu1 %v5291_v7 }
 0x1ca   :  { %5294 = vmatpush3.bf16.msra.mxu1 %v5291_v7 }
 0x1cb   :  { %5296 = vmatprep.subr.bf16.mxu1 %v5295_v11 }
 0x1ce   :  { %5298 = vmatpush3.bf16.msra.mxu1 %v5295_v11 }
 0x1cf   :  { %5300 = vmatprep.subr.bf16.mxu1 %v5267_v45 }
 0x284   :  { %v4928_v14 = vpop.f32.mrb[0].mxu1 }
 0x285   :  { %v540_v15 = vadd.f32 %v4928_v14, %v4404_v13  ;;  %v534_v16 = vpop.f32.mrb[1].mxu1  ;;  %v1067_v14 = vld [vmem:[#allocation10 + $0x58] sm:$0xff] }
 0x286   :  { %v535_v17 = vadd.f32 %v4404_v13, %v534_v16  ;;  %v1066_v13 = vld [vmem:[#allocation10 + $0x50] sm:$0xff]  ;;  %v1068_v16 = vld [vmem:[#allocation10 + $0x60] sm:$0xff] }
 0x287   :  { %v544_v19 = vadd.f32 %v540_v15, %v6308_v42  ;;  %v5447_v15 = vpack.c.bf16 %v1067_v14, %v1066_v13  ;;  %v958_v14 = vld [vmem:[#allocation8 + $0x130] sm:$0xff] }
 0x288   :  { %v543_v18 = vadd.f32 %v535_v17, %v6299_v9  ;;  %v1069_v17 = vld [vmem:[#allocation10 + $0x68] sm:$0xff] }
 0x28a   :  { %4961 = vmatprep.mubr.f32.mxu1 %v543_v18 }
 0x28b   :  { %4962 = vmatmul.mubr.f32.vlgmr.msra.gmra.mrb[2].mxu1 %v544_v19 }
 0x28c   :  { %5302 = vmatpush3.bf16.msra.mxu1 %v5267_v45  ;;  %v794_v45 = vld [vmem:[#allocation8 + $0xc8] sm:$0xff] }
 0x28d   :  { %5304 = vmatprep.subr.bf16.mxu1 %v5271_v56  ;;  %v5347_v48 = vpack.c.bf16 %v794_v45, %v793_v44 }
 0x28f   :  { %5348 = vmatprep.subr.bf16.mxu0 %v5347_v48 }
 0x290   :  { %5306 = vmatpush3.bf16.msra.mxu1 %v5271_v56  ;;  %5350 = vmatpush3.bf16.msra.mxu0 %v5347_v48  ;;  %v5359_v56 = vpack.c.bf16 %v800_v55, %v799_v54  ;;  %v777_v54 = vld [vmem:[#allocation8 + $0x48] sm:$0xff] }
 0x291   :  { %5308 = vmatprep.subr.bf16.mxu1 %v5275_v59  ;;  %5352 = vmatprep.subr.bf16.mxu0 %v5351_v50 }
 0x294   :  { %5310 = vmatpush3.bf16.msra.mxu1 %v5275_v59  ;;  %5354 = vmatpush3.bf16.msra.mxu0 %v5351_v50  ;;  %v6345_v59 = vpack.c.bf16 %v769_v58, %v768_v57  ;;  %v773_v50 = vld [vmem:[#allocation8 + $0x28] sm:$0xff]  ;;  %v779_v57 = vld [vmem:[#allocation8 + $0x58] sm:$0xff] }
 0x295   :  { %5312 = vmatprep.subr.bf16.mxu1 %v5279_v62  ;;  %5356 = vmatprep.subr.bf16.mxu0 %v5355_v53 }
 0x298   :  { %5314 = vmatpush3.bf16.msra.mxu1 %v5279_v62  ;;  %5358 = vmatpush3.bf16.msra.mxu0 %v5355_v53  ;;  %v1058_v62 = vld [vmem:[#allocation10 + $0x10] sm:$0xff]  ;;  %v776_v53 = vld [vmem:[#allocation8 + $0x40] sm:$0xff] }
 0x299   :  { %5316 = vmatprep.subr.bf16.mxu1 %v5283_v1  ;;  %5360 = vmatprep.subr.bf16.mxu0 %v5359_v56  ;;  %v5379_v55 = vpack.c.bf16 %v777_v54, %v776_v53  ;;  %v1331_v53 = vld [vmem:[%s8439_s13 + $0x40] sm:$0xff] }
 0x29c   :  { %5318 = vmatpush3.bf16.msra.mxu1 %v5283_v1  ;;  %5362 = vmatpush3.bf16.msra.mxu0 %v5359_v56  ;;  %v5431_v1 = vpack.c.bf16 %v1059_v0, %v1058_v62  ;;  %v778_v56 = vld [vmem:[#allocation8 + $0x50] sm:$0xff] }
 0x29d   :  { %5320 = vmatprep.subr.bf16.mxu1 %v5287_v4  ;;  %5364 = vmatprep.subr.bf16.mxu0 %v6345_v59  ;;  %v5383_v58 = vpack.c.bf16 %v779_v57, %v778_v56  ;;  %v782_v62 = vld [vmem:[#allocation8 + $0x70] sm:$0xff]  ;;  %v1336_v57 = vld [vmem:[%s8439_s13 + $0x68] sm:$0xff] }
 0x2a0   :  { %5322 = vmatpush3.bf16.msra.mxu1 %v5287_v4  ;;  %v5435_v4 = vpack.c.bf16 %v1061_v3, %v1060_v2  ;;  %v953_v2 = vld [vmem:[#allocation8 + $0x108] sm:$0xff] }
 0x2a1   :  { %5324 = vmatprep.subr.bf16.mxu1 %v5291_v7 }
 0x2a4   :  { %5326 = vmatpush3.bf16.msra.mxu1 %v5291_v7  ;;  %v5439_v7 = vpack.c.bf16 %v1063_v6, %v1062_v5  ;;  %v955_v5 = vld [vmem:[#allocation8 + $0x118] sm:$0xff] }
 0x2a5   :  { %5328 = vmatprep.subr.bf16.mxu1 %v5295_v11 }
 0x2a8   :  { %5330 = vmatpush3.bf16.msra.mxu1 %v5295_v11  ;;  %v5443_v11 = vpack.c.bf16 %v1065_v10, %v1064_v8  ;;  %v956_v10 = vld [vmem:[#allocation8 + $0x120] sm:$0xff] }
 0x2a9   :  { %5428 = vmatprep.subr.bf16.mxu1 %v5427_v63 }
 0x35e   :  { %v4963_v9 = vpop.f32.mrb[2].mxu1 }
 0x35f   :  { %v627_v20 = vpop.f32.mrb[3].mxu1 }
 0x360   :  { %v636_v42 = vadd.f32 %v4963_v9, %v627_v20 }
 0x362   :  { %v637_v21 = vrot.slane %v636_v42, 4 }
 0x364   :  { %v638_v22 = vadd.f32 %v637_v21, %v636_v42 }
 0x366   :  { %v639_v23 = vrot.slane %v638_v22, 2 }
 0x368   :  { %v640_v24 = vadd.f32 %v639_v23, %v638_v22 }
 0x36a   :  { %v641_v25 = vrot.slane %v640_v24, 1 }
 0x36c   :  { %v642_v26 = vadd.f32 %v641_v25, %v640_v24 }
 0x36e   :  { %v643_v27 = vmul.f32 0.0078125, %v642_v26 }
 0x370   :  { %v6337_v12 = vsub.f32 %v544_v19, %v643_v27  ;;  %v6339_v28 = vsub.f32 %v543_v18, %v643_v27  ;;  %v5451_v18 = vpack.c.bf16 %v1069_v17, %v1068_v16  ;;  %v960_v17 = vld [vmem:[#allocation8 + $0x140] sm:$0xff] }
 0x372   :  { %v646_v29 = vmul.f32 %v6339_v28, %v6339_v28  ;;  %v647_v30 = vmul.f32 %v6337_v12, %v6337_v12 }
 0x374   :  { %4996 = vmatprep.mubr.f32.mxu1 %v646_v29  ;;  %v736_v29 = vlaneseq }
 0x375   :  { %4997 = vmatmul.mubr.f32.vlgmr.msra.gmra.mrb[4].mxu1 %v647_v30 }
 0x376   :  { %5430 = vmatpush3.bf16.msra.mxu1 %v5427_v63  ;;  %v6348_v30 = vshrl.u32 %v736_v29, 7  ;;  %v783_v63 = vld [vmem:[#allocation8 + $0x78] sm:$0xff]  ;;  %v1070_v29 = vld [vmem:[#allocation10 + $0x70] sm:$0xff] }
 0x377   :  { %5432 = vmatprep.subr.bf16.mxu1 %v5431_v1  ;;  %v5391_v0 = vpack.c.bf16 %v783_v63, %v782_v62  ;;  %v1340_v63 = vld [vmem:[%s8439_s13 + $0x88] sm:$0xff] }
 0x378   :  { %v6354_v32 = vsub.s32 0, %v6348_v30 }
 0x37a   :  { %5434 = vmatpush3.bf16.msra.mxu1 %v5431_v1  ;;  %v952_v1 = vld [vmem:[#allocation8 + $0x100] sm:$0xff] }
 0x37b   :  { %5436 = vmatprep.subr.bf16.mxu1 %v5435_v4  ;;  %v5395_v3 = vpack.c.bf16 %v953_v2, %v952_v1  ;;  %v1339_v1 = vld [vmem:[%s8439_s13 + $0x80] sm:$0xff] }
 0x37e   :  { %5438 = vmatpush3.bf16.msra.mxu1 %v5435_v4  ;;  %v954_v4 = vld [vmem:[#allocation8 + $0x110] sm:$0xff] }
 0x37f   :  { %5440 = vmatprep.subr.bf16.mxu1 %v5439_v7 }
 0x382   :  { %5442 = vmatpush3.bf16.msra.mxu1 %v5439_v7  ;;  %v5399_v7 = vpack.c.bf16 %v955_v5, %v954_v4  ;;  %v1344_v5 = vld [vmem:[%s8439_s13 + $0xa8] sm:$0xff] }
 0x383   :  { %5444 = vmatprep.subr.bf16.mxu1 %v5443_v11 }
 0x386   :  { %5446 = vmatpush3.bf16.msra.mxu1 %v5443_v11  ;;  %v957_v11 = vld [vmem:[#allocation8 + $0x128] sm:$0xff] }
 0x387   :  { %5448 = vmatprep.subr.bf16.mxu1 %v5447_v15  ;;  %v5403_v13 = vpack.c.bf16 %v957_v11, %v956_v10  ;;  %v1345_v10 = vld [vmem:[%s8439_s13 + $0xb0] sm:$0xff] }
 0x38a   :  { %5450 = vmatpush3.bf16.msra.mxu1 %v5447_v15  ;;  %v959_v15 = vld [vmem:[#allocation8 + $0x138] sm:$0xff] }
 0x38b   :  { %5452 = vmatprep.subr.bf16.mxu1 %v5451_v18  ;;  %v5407_v16 = vpack.c.bf16 %v959_v15, %v958_v14  ;;  %v1350_v14 = vld [vmem:[%s8439_s13 + $0xd8] sm:$0xff]  ;;  %v1347_v15 = vld [vmem:[%s8439_s13 + $0xc0] sm:$0xff] }
 0x38e   :  { %5454 = vmatpush3.bf16.msra.mxu1 %v5451_v18  ;;  %v961_v18 = vld [vmem:[#allocation8 + $0x148] sm:$0xff] }
 0x448   :  { %v4998_v19 = vpop.f32.mrb[4].mxu1 }
 0x449   :  { %v714_v9 = vpop.f32.mrb[5].mxu1 }
 0x44a   :  { %v723_v20 = vadd.f32 %v4998_v19, %v714_v9  ;;  %v5411_v19 = vpack.c.bf16 %v961_v18, %v960_v17  ;;  %v962_v9 = vld [vmem:[#allocation8 + $0x150] sm:$0xff] }
 0x44b   :  { %v1349_v17 = vld [vmem:[%s8439_s13 + $0xd0] sm:$0xff] }
 0x44c   :  { %v724_v42 = vrot.slane %v723_v20, 4  ;;  %v5549_v18 = vpack.c.bf16 %v1349_v17, %v1347_v15  ;;  %v1174_v15 = vld [vmem:[%s8438_s12 + $0x20] sm:$0xff]  ;;  %v1179_v17 = vld [vmem:[%s8438_s12 + $0x48] sm:$0xff] }
 0x44e   :  { %v725_v21 = vadd.f32 %v724_v42, %v723_v20  ;;  %v963_v20 = vld [vmem:[#allocation8 + $0x158] sm:$0xff] }
 0x44f   :  { %v5415_v42 = vpack.c.bf16 %v963_v20, %v962_v9  ;;  %v1354_v9 = vld [vmem:[%s8439_s13 + $0xf8] sm:$0xff]  ;;  %v1351_v20 = vld [vmem:[%s8439_s13 + $0xe0] sm:$0xff] }
 0x450   :  { %v726_v22 = vrot.slane %v725_v21, 2 }
 0x452   :  { %v727_v23 = vadd.f32 %v726_v22, %v725_v21  ;;  %v964_v21 = vld [vmem:[#allocation8 + $0x160] sm:$0xff]  ;;  %v965_v22 = vld [vmem:[#allocation8 + $0x168] sm:$0xff] }
 0x454   :  { %v728_v24 = vrot.slane %v727_v23, 1 }
 0x456   :  { %v729_v25 = vadd.f32 %v728_v24, %v727_v23  ;;  %v5419_v23 = vpack.c.bf16 %v965_v22, %v964_v21  ;;  %v966_v24 = vld [vmem:[#allocation8 + $0x170] sm:$0xff] }
 0x457   :  { %v1353_v21 = vld [vmem:[%s8439_s13 + $0xf0] sm:$0xff] }
 0x458   :  { %v730_v26 = vmul.f32 0.0078125, %v729_v25  ;;  %v967_v25 = vld [vmem:[#allocation8 + $0x178] sm:$0xff]  ;;  %v5553_v22 = vpack.c.bf16 %v1353_v21, %v1351_v20  ;;  %v1178_v20 = vld [vmem:[%s8438_s12 + $0x40] sm:$0xff]  ;;  %v1183_v21 = vld [vmem:[%s8438_s12 + $0x68] sm:$0xff] }
 0x45a   :  { %v732_v27 = vadd.f32 1e-05, %v730_v26  ;;  %v5423_v26 = vpack.c.bf16 %v967_v25, %v966_v24  ;;  %v1358_v24 = vld [vmem:[%s8439_s13 + $0x118] sm:$0xff]  ;;  %v1355_v25 = vld [vmem:[%s8439_s13 + $0x100] sm:$0xff] }
 0x45c   :  { %5875 = vrsqrt.f32 %v732_v27 }
 0x466   :  { %v5876_v33 = vpop.eup %5875 }
 0x467   :  { %v734_v34 = vmul.f32 %v5876_v33, %v731_v31  ;;  %v1071_v31 = vld [vmem:[#allocation10 + $0x78] sm:$0xff] }
 0x468   :  { %v5455_v33 = vpack.c.bf16 %v1071_v31, %v1070_v29  ;;  %v1360_v31 = vld [vmem:[%s8439_s13 + $0x128] sm:$0xff] }
 0x469   :  { %v739_v35 = vrot.slane %v734_v34, %v6354_v32  ;;  %v1171_v34 = vld [vmem:[%s8438_s12 + $0x8] sm:$0xff] }
 0x46a   :  { %5456 = vmatprep.subr.bf16.mxu1 %v5455_v33 }
 0x46b   :  { %v741_v37 = vmul.f32 %v739_v35, %v6339_v28  ;;  %v742_v38 = vmul.f32 %v739_v35, %v6337_v12  ;;  %v5371_v12 = vpack.c.bf16 %v773_v50, %v772_v49  ;;  %v774_v28 = vld [vmem:[#allocation8 + $0x30] sm:$0xff]  ;;  %5458 = vmatpush3.bf16.msra.mxu1 %v5455_v33  ;;  %v1173_v35 = vld [vmem:[%s8438_s12 + $0x18] sm:$0xff]  ;;  %v1327_v49 = vld [vmem:[%s8439_s13 + $0x20] sm:$0xff] }
 0x46c   :  { %v5375_v51 = vpack.c.bf16 %v775_v47, %v774_v28  ;;  %v1332_v47 = vld [vmem:[%s8439_s13 + $0x48] sm:$0xff]  ;;  %v1362_v33 = vld [vmem:[%s8439_s13 + $0x138] sm:$0xff] }
 0x46d   :  { %v6362_v39 = vadd.f32 %v4405_v36, %v741_v37  ;;  %v6364_v40 = vadd.f32 %v4405_v36, %v742_v38  ;;  %v5459_v36 = vpack.c.bf16 %v1173_v35, %v1171_v34  ;;  %v1324_v37 = vld [vmem:[%s8439_s13 + $0x8] sm:$0xff]  ;;  %v1326_v38 = vld [vmem:[%s8439_s13 + $0x18] sm:$0xff]  ;;  %v1359_v34 = vld [vmem:[%s8439_s13 + $0x120] sm:$0xff]  ;;  %v5559_v35 = vpack.c.bf16 %v1362_v33, %v1360_v31 }
 0x46e   :  { %v5523_v41 = vpack.c.bf16 %v1326_v38, %v1324_v37  ;;  %v1364_v38 = vld [vmem:[%s8439_s13 + $0x148] sm:$0xff] }
 0x46f   :  { %v752_v44 = vmax.f32 %v6362_v39, 0.0  ;;  %v6368_v45 = vmax.f32 %v6364_v40, 0.0  ;;  %5460 = vmatprep.subr.bf16.mxu1 %v5459_v36  ;;  %v1361_v36 = vld [vmem:[%s8439_s13 + $0x130] sm:$0xff] }
 0x470   :  { %v5561_v37 = vpack.c.bf16 %v1361_v36, %v1359_v34  ;;  %v1186_v34 = vld [vmem:[%s8438_s12 + $0x80] sm:$0xff]  ;;  %v1191_v36 = vld [vmem:[%s8438_s12 + $0xa8] sm:$0xff] }
 0x471   :  { %5031 = vmatprep.mubr.f32.mxu0 %v752_v44  ;;  %v756_v48 = vrot.slane %v752_v44, 7  ;;  %v757_v6 = vrot.slane %v6368_v45, 7  ;;  %v762_v8 = vrot.slane %v752_v44, 1  ;;  %v763_v27 = vrot.slane %v6368_v45, 1  ;;  %v1325_v44 = vld [vmem:[%s8439_s13 + $0x10] sm:$0xff] }
 0x472   :  { %5032 = vmatmul.mubr.f32.vlgmr.msra.gmra.mrb[2].mxu0 %v6368_v45  ;;  %v5525_v45 = vpack.c.bf16 %v1325_v44, %v1323_v43  ;;  %v1363_v43 = vld [vmem:[%s8439_s13 + $0x140] sm:$0xff] }
 0x473   :  { %5366 = vmatpush3.bf16.msra.mxu0 %v6345_v59  ;;  %5066 = vmatprep.mubr.msk.f32.mxu0 %vm6315_vm1, %v756_v48  ;;  %v780_v59 = vld [vmem:[#allocation8 + $0x60] sm:$0xff]  ;;  %v1330_v48 = vld [vmem:[%s8439_s13 + $0x38] sm:$0xff] }
 0x474   :  { %5368 = vmatprep.subr.bf16.mxu0 %v5367_v46  ;;  %v5387_v61 = vpack.c.bf16 %v781_v60, %v780_v59  ;;  %v1335_v59 = vld [vmem:[%s8439_s13 + $0x60] sm:$0xff] }
 0x477   :  { %5370 = vmatpush3.bf16.msra.mxu0 %v5367_v46  ;;  %v1328_v46 = vld [vmem:[%s8439_s13 + $0x28] sm:$0xff] }
 0x478   :  { %5372 = vmatprep.subr.bf16.mxu0 %v5371_v12  ;;  %v5527_v50 = vpack.c.bf16 %v1330_v48, %v1328_v46  ;;  %v1368_v48 = vld [vmem:[%s8439_s13 + $0x168] sm:$0xff] }
 0x47b   :  { %5374 = vmatpush3.bf16.msra.mxu0 %v5371_v12  ;;  %v1329_v12 = vld [vmem:[%s8439_s13 + $0x30] sm:$0xff] }
 0x47c   :  { %5376 = vmatprep.subr.bf16.mxu0 %v5375_v51  ;;  %v5529_v28 = vpack.c.bf16 %v1329_v12, %v1327_v49  ;;  %v1370_v49 = vld [vmem:[%s8439_s13 + $0x178] sm:$0xff] }
 0x47d   :  { %v5567_v12 = vpack.c.bf16 %v1370_v49, %v1368_v48 }
 0x47f   :  { %5378 = vmatpush3.bf16.msra.mxu0 %v5375_v51  ;;  %v1334_v51 = vld [vmem:[%s8439_s13 + $0x58] sm:$0xff] }
 0x480   :  { %5380 = vmatprep.subr.bf16.mxu0 %v5379_v55  ;;  %v5531_v54 = vpack.c.bf16 %v1334_v51, %v1332_v47  ;;  %v1372_v51 = vld [vmem:[%s8439_s13 + $0x188] sm:$0xff] }
 0x483   :  { %5382 = vmatpush3.bf16.msra.mxu0 %v5379_v55  ;;  %v1333_v55 = vld [vmem:[%s8439_s13 + $0x50] sm:$0xff] }
 0x484   :  { %5384 = vmatprep.subr.bf16.mxu0 %v5383_v58  ;;  %v5533_v56 = vpack.c.bf16 %v1333_v55, %v1331_v53  ;;  %v1374_v53 = vld [vmem:[%s8439_s13 + $0x198] sm:$0xff] }
 0x485   :  { %v5571_v55 = vpack.c.bf16 %v1374_v53, %v1372_v51 }
 0x487   :  { %5386 = vmatpush3.bf16.msra.mxu0 %v5383_v58  ;;  %v1338_v58 = vld [vmem:[%s8439_s13 + $0x78] sm:$0xff] }
 0x488   :  { %5388 = vmatprep.subr.bf16.mxu0 %v5387_v61  ;;  %v5535_v60 = vpack.c.bf16 %v1338_v58, %v1336_v57  ;;  %v1376_v58 = vld [vmem:[%s8439_s13 + $0x1a8] sm:$0xff] }
 0x48b   :  { %5390 = vmatpush3.bf16.msra.mxu0 %v5387_v61  ;;  %v1337_v61 = vld [vmem:[%s8439_s13 + $0x70] sm:$0xff] }
 0x48c   :  { %5392 = vmatprep.subr.bf16.mxu0 %v5391_v0  ;;  %v5537_v62 = vpack.c.bf16 %v1337_v61, %v1335_v59  ;;  %v1378_v59 = vld [vmem:[%s8439_s13 + $0x1b8] sm:$0xff] }
 0x48d   :  { %v5575_v61 = vpack.c.bf16 %v1378_v59, %v1376_v58 }
 0x48f   :  { %5394 = vmatpush3.bf16.msra.mxu0 %v5391_v0  ;;  %v1342_v0 = vld [vmem:[%s8439_s13 + $0x98] sm:$0xff] }
 0x490   :  { %5396 = vmatprep.subr.bf16.mxu0 %v5395_v3  ;;  %v5539_v2 = vpack.c.bf16 %v1342_v0, %v1340_v63  ;;  %v4412_v0 = vld [vmem:[%s8435_s9] ss:$0 sm:$0xff] }
 0x492   :  { %5067 = vmatmul.mubr.msk.f32.vlgmr.msra.gmra.mrb[2].mxu0 %vm6315_vm1, %v757_v6  ;;  %v1346_v6 = vld [vmem:[%s8439_s13 + $0xb8] sm:$0xff] }
 0x493   :  { %5398 = vmatpush3.bf16.msra.mxu0 %v5395_v3  ;;  %5101 = vmatprep.mubr.msk.f32.mxu0 %vm154_vm2, %v762_v8  ;;  %v1341_v3 = vld [vmem:[%s8439_s13 + $0x90] sm:$0xff]  ;;  %v5543_v8 = vpack.c.bf16 %v1346_v6, %v1344_v5 }
 0x494   :  { %5400 = vmatprep.subr.bf16.mxu0 %v5399_v7  ;;  %v5541_v4 = vpack.c.bf16 %v1341_v3, %v1339_v1  ;;  %v1172_v5 = vld [vmem:[%s8438_s12 + $0x10] sm:$0xff] }
 0x497   :  { %5402 = vmatpush3.bf16.msra.mxu0 %v5399_v7  ;;  %v1343_v7 = vld [vmem:[%s8439_s13 + $0xa0] sm:$0xff] }
 0x498   :  { %5404 = vmatprep.subr.bf16.mxu0 %v5403_v13  ;;  %v5545_v11 = vpack.c.bf16 %v1345_v10, %v1343_v7  ;;  %v1175_v7 = vld [vmem:[%s8438_s12 + $0x28] sm:$0xff] }
 0x49b   :  { %5406 = vmatpush3.bf16.msra.mxu0 %v5403_v13  ;;  %v1348_v13 = vld [vmem:[%s8439_s13 + $0xc8] sm:$0xff] }
 0x49c   :  { %5408 = vmatprep.subr.bf16.mxu0 %v5407_v16 }
 0x49f   :  { %5410 = vmatpush3.bf16.msra.mxu0 %v5407_v16  ;;  %v5547_v16 = vpack.c.bf16 %v1350_v14, %v1348_v13 }
 0x4a0   :  { %5412 = vmatprep.subr.bf16.mxu0 %v5411_v19 }
 0x4a3   :  { %5414 = vmatpush3.bf16.msra.mxu0 %v5411_v19  ;;  %v1352_v19 = vld [vmem:[%s8439_s13 + $0xe8] sm:$0xff] }
 0x4a4   :  { %5416 = vmatprep.subr.bf16.mxu0 %v5415_v42 }
 0x4a7   :  { %5418 = vmatpush3.bf16.msra.mxu0 %v5415_v42  ;;  %v5551_v42 = vpack.c.bf16 %v1354_v9, %v1352_v19 }
 0x4a8   :  { %5420 = vmatprep.subr.bf16.mxu0 %v5419_v23 }
 0x4ab   :  { %5422 = vmatpush3.bf16.msra.mxu0 %v5419_v23  ;;  %v1356_v23 = vld [vmem:[%s8439_s13 + $0x108] sm:$0xff] }
 0x4ac   :  { %5424 = vmatprep.subr.bf16.mxu0 %v5423_v26 }
 0x4af   :  { %5426 = vmatpush3.bf16.msra.mxu0 %v5423_v26  ;;  %v5555_v26 = vpack.c.bf16 %v1358_v24, %v1356_v23 }
 0x4b0   :  { %5524 = vmatprep.subr.bf16.mxu0 %v5523_v41  ;;  %v1366_v41 = vld [vmem:[%s8439_s13 + $0x158] sm:$0xff] }
 0x4b1   :  { %v5563_v44 = vpack.c.bf16 %v1366_v41, %v1364_v38 }
 0x4b2   :  { %5102 = vmatmul.mubr.msk.f32.vlgmr.msra.gmra.mrb[2].mxu0 %vm154_vm2, %v763_v27  ;;  %v1357_v27 = vld [vmem:[%s8439_s13 + $0x110] sm:$0xff] }
 0x4b3   :  { %5526 = vmatpush1.bf16.msra.mxu0 %v5525_v45  ;;  %v5557_v29 = vpack.c.bf16 %v1357_v27, %v1355_v25  ;;  %v1365_v45 = vld [vmem:[%s8439_s13 + $0x150] sm:$0xff]  ;;  %v1182_v25 = vld [vmem:[%s8438_s12 + $0x60] sm:$0xff]  ;;  %v1187_v27 = vld [vmem:[%s8438_s12 + $0x88] sm:$0xff] }
 0x4b4   :  { %5528 = vmatprep.subr.bf16.mxu0 %v5527_v50  ;;  %v5565_v46 = vpack.c.bf16 %v1365_v45, %v1363_v43  ;;  %v1367_v50 = vld [vmem:[%s8439_s13 + $0x160] sm:$0xff]  ;;  %v1195_v45 = vld [vmem:[%s8438_s12 + $0xc8] sm:$0xff] }
 0x4b5   :  { %v1190_v43 = vld [vmem:[%s8438_s12 + $0xa0] sm:$0xff] }
 0x4b7   :  { %5530 = vmatpush1.bf16.msra.mxu0 %v5529_v28  ;;  %v1369_v28 = vld [vmem:[%s8439_s13 + $0x170] sm:$0xff] }
 0x4b8   :  { %5532 = vmatprep.subr.bf16.mxu0 %v5531_v54  ;;  %v5569_v47 = vpack.c.bf16 %v1369_v28, %v1367_v50  ;;  %v1371_v54 = vld [vmem:[%s8439_s13 + $0x180] sm:$0xff]  ;;  %v1199_v28 = vld [vmem:[%s8438_s12 + $0xe8] sm:$0xff] }
 0x4b9   :  { %v1194_v50 = vld [vmem:[%s8438_s12 + $0xc0] sm:$0xff] }
 0x4bb   :  { %5534 = vmatpush1.bf16.msra.mxu0 %v5533_v56  ;;  %v1373_v56 = vld [vmem:[%s8439_s13 + $0x190] sm:$0xff] }
 0x4bc   :  { %5536 = vmatprep.subr.bf16.mxu0 %v5535_v60  ;;  %v5573_v57 = vpack.c.bf16 %v1373_v56, %v1371_v54  ;;  %v1375_v60 = vld [vmem:[%s8439_s13 + $0x1a0] sm:$0xff]  ;;  %v1203_v56 = vld [vmem:[%s8438_s12 + $0x108] sm:$0xff] }
 0x4bd   :  { %v1198_v54 = vld [vmem:[%s8438_s12 + $0xe0] sm:$0xff] }
 0x4bf   :  { %5538 = vmatpush1.bf16.msra.mxu0 %v5537_v62  ;;  %v1377_v62 = vld [vmem:[%s8439_s13 + $0x1b0] sm:$0xff] }
 0x4c0   :  { %5540 = vmatprep.subr.bf16.mxu0 %v5539_v2  ;;  %v5577_v63 = vpack.c.bf16 %v1377_v62, %v1375_v60  ;;  %v1202_v60 = vld [vmem:[%s8438_s12 + $0x100] sm:$0xff]  ;;  %v1207_v62 = vld [vmem:[%s8438_s12 + $0x128] sm:$0xff] }
 0x4c3   :  { %5542 = vmatpush1.bf16.msra.mxu0 %v5541_v4  ;;  %v1170_v4 = vld [vmem:[%s8438_s12] sm:$0xff] }
 0x4c4   :  { %5544 = vmatprep.subr.bf16.mxu0 %v5543_v8  ;;  %v1177_v8 = vld [vmem:[%s8438_s12 + $0x38] sm:$0xff] }
 0x4c5   :  { %v5463_v14 = vpack.c.bf16 %v1177_v8, %v1175_v7  ;;  %v1210_v8 = vld [vmem:[%s8438_s12 + $0x140] sm:$0xff] }
 0x4c7   :  { %5546 = vmatpush1.bf16.msra.mxu0 %v5545_v11  ;;  %v5461_v11 = vpack.c.bf16 %v1172_v5, %v1170_v4  ;;  %v1211_v4 = vld [vmem:[%s8438_s12 + $0x148] sm:$0xff]  ;;  %v1213_v5 = vld [vmem:[%s8438_s12 + $0x158] sm:$0xff] }
 0x4c8   :  { %5548 = vmatprep.subr.bf16.mxu0 %v5547_v16  ;;  %v1176_v16 = vld [vmem:[%s8438_s12 + $0x30] sm:$0xff]  ;;  %v5499_v7 = vpack.c.bf16 %v1213_v5, %v1211_v4 }
 0x4c9   :  { %v5465_v19 = vpack.c.bf16 %v1176_v16, %v1174_v15  ;;  %v1214_v16 = vld [vmem:[%s8438_s12 + $0x160] sm:$0xff] }
 0x4cb   :  { %5550 = vmatpush1.bf16.msra.mxu0 %v5549_v18  ;;  %v1181_v18 = vld [vmem:[%s8438_s12 + $0x58] sm:$0xff] }
 0x4cc   :  { %5552 = vmatprep.subr.bf16.mxu0 %v5551_v42  ;;  %v5467_v9 = vpack.c.bf16 %v1181_v18, %v1179_v17  ;;  %v1180_v42 = vld [vmem:[%s8438_s12 + $0x50] sm:$0xff]  ;;  %v1219_v18 = vld [vmem:[%s8438_s12 + $0x188] sm:$0xff] }
 0x4cd   :  { %v5469_v23 = vpack.c.bf16 %v1180_v42, %v1178_v20  ;;  %v1216_v17 = vld [vmem:[%s8438_s12 + $0x170] sm:$0xff]  ;;  %v1218_v42 = vld [vmem:[%s8438_s12 + $0x180] sm:$0xff] }
 0x4cf   :  { %5554 = vmatpush1.bf16.msra.mxu0 %v5553_v22  ;;  %v1185_v22 = vld [vmem:[%s8438_s12 + $0x78] sm:$0xff] }
 0x4d0   :  { %5556 = vmatprep.subr.bf16.mxu0 %v5555_v26  ;;  %v5471_v24 = vpack.c.bf16 %v1185_v22, %v1183_v21  ;;  %v1184_v26 = vld [vmem:[%s8438_s12 + $0x70] sm:$0xff]  ;;  %v1223_v22 = vld [vmem:[%s8438_s12 + $0x1a8] sm:$0xff] }
 0x4d1   :  { %v5473_v31 = vpack.c.bf16 %v1184_v26, %v1182_v25  ;;  %v1220_v21 = vld [vmem:[%s8438_s12 + $0x190] sm:$0xff]  ;;  %v1222_v26 = vld [vmem:[%s8438_s12 + $0x1a0] sm:$0xff] }
 0x4d3   :  { %5558 = vmatpush1.bf16.msra.mxu0 %v5557_v29  ;;  %v1189_v29 = vld [vmem:[%s8438_s12 + $0x98] sm:$0xff] }
 0x4d4   :  { %5560 = vmatprep.subr.bf16.mxu0 %v5559_v35  ;;  %v5475_v33 = vpack.c.bf16 %v1189_v29, %v1187_v27  ;;  %v1188_v35 = vld [vmem:[%s8438_s12 + $0x90] sm:$0xff] }
 0x4d5   :  { %v5477_v38 = vpack.c.bf16 %v1188_v35, %v1186_v34  ;;  %v1224_v27 = vld [vmem:[%s8438_s12 + $0x1b0] sm:$0xff]  ;;  %v1226_v35 = vld [vmem:[%s8438_s12 + $0x1c0] sm:$0xff] }
 0x4d6   :  { %v5513_v29 = vpack.c.bf16 %v1224_v27, %v1222_v26  ;;  %v2217_v26 = vld [vmem:[%s8441_s15 + $0x88] sm:$0xff]  ;;  %v2219_v27 = vld [vmem:[%s8441_s15 + $0x98] sm:$0xff] }
 0x4d7   :  { %5562 = vmatpush1.bf16.msra.mxu0 %v5561_v37  ;;  %v1193_v37 = vld [vmem:[%s8438_s12 + $0xb8] sm:$0xff] }
 0x4d8   :  { %5564 = vmatprep.subr.bf16.mxu0 %v5563_v44  ;;  %v5479_v41 = vpack.c.bf16 %v1193_v37, %v1191_v36  ;;  %v1192_v44 = vld [vmem:[%s8438_s12 + $0xb0] sm:$0xff]  ;;  %v1380_v37 = vld [vmem:[%s8439_s13 + $0x1c8] sm:$0xff] }
 0x4d9   :  { %v5481_v48 = vpack.c.bf16 %v1192_v44, %v1190_v43  ;;  %v1228_v36 = vld [vmem:[%s8438_s12 + $0x1d0] sm:$0xff]  ;;  %v1379_v43 = vld [vmem:[%s8439_s13 + $0x1c0] sm:$0xff] }
 0x4da   :  { %v1381_v44 = vld [vmem:[%s8439_s13 + $0x1d0] sm:$0xff] }
 0x4db   :  { %5566 = vmatpush1.bf16.msra.mxu0 %v5565_v46  ;;  %v1197_v46 = vld [vmem:[%s8438_s12 + $0xd8] sm:$0xff] }
 0x4dc   :  { %5568 = vmatprep.subr.bf16.mxu0 %v5567_v12  ;;  %v5483_v49 = vpack.c.bf16 %v1197_v46, %v1195_v45  ;;  %v1196_v12 = vld [vmem:[%s8438_s12 + $0xd0] sm:$0xff]  ;;  %v5581_v46 = vpack.c.bf16 %v1381_v44, %v1379_v43  ;;  %v2225_v44 = vld [vmem:[%s8441_s15 + $0xc8] sm:$0xff] }
 0x4dd   :  { %v5485_v51 = vpack.c.bf16 %v1196_v12, %v1194_v50  ;;  %v1230_v12 = vld [vmem:[%s8438_s12 + $0x1e0] sm:$0xff]  ;;  %v2222_v43 = vld [vmem:[%s8441_s15 + $0xb0] sm:$0xff] }
 0x4df   :  { %5570 = vmatpush1.bf16.msra.mxu0 %v5569_v47  ;;  %v1201_v47 = vld [vmem:[%s8438_s12 + $0xf8] sm:$0xff] }
 0x4e0   :  { %5572 = vmatprep.subr.bf16.mxu0 %v5571_v55  ;;  %v5487_v53 = vpack.c.bf16 %v1201_v47, %v1199_v28  ;;  %v1200_v55 = vld [vmem:[%s8438_s12 + $0xf0] sm:$0xff]  ;;  %v1384_v47 = vld [vmem:[%s8439_s13 + $0x1e8] sm:$0xff] }
 0x4e1   :  { %v5489_v58 = vpack.c.bf16 %v1200_v55, %v1198_v54  ;;  %v1232_v28 = vld [vmem:[%s8438_s12 + $0x1f0] sm:$0xff]  ;;  %v1383_v54 = vld [vmem:[%s8439_s13 + $0x1e0] sm:$0xff] }
 0x4e2   :  { %v1385_v55 = vld [vmem:[%s8439_s13 + $0x1f0] sm:$0xff] }
 0x4e3   :  { %5574 = vmatpush1.bf16.msra.mxu0 %v5573_v57  ;;  %v1205_v57 = vld [vmem:[%s8438_s12 + $0x118] sm:$0xff] }
 0x4e4   :  { %5576 = vmatprep.subr.bf16.mxu0 %v5575_v61  ;;  %v5491_v59 = vpack.c.bf16 %v1205_v57, %v1203_v56  ;;  %v1204_v61 = vld [vmem:[%s8438_s12 + $0x110] sm:$0xff]  ;;  %v5585_v57 = vpack.c.bf16 %v1385_v55, %v1383_v54  ;;  %v2233_v55 = vld [vmem:[%s8441_s15 + $0x108] sm:$0xff] }
 0x4e5   :  { %v2230_v54 = vld [vmem:[%s8441_s15 + $0xf0] sm:$0xff] }
 0x4e7   :  { %5578 = vmatpush1.bf16.msra.mxu0 %v5577_v63  ;;  %v1209_v63 = vld [vmem:[%s8438_s12 + $0x138] sm:$0xff] }
 0x585   :  { %v5103_v1 = vpop.f32.mrb[2].mxu0 }
 0x586   :  { %v1053_v2 = vadd.f32 %v5103_v1, %v4412_v0  ;;  %v1034_v3 = vpop.f32.mrb[3].mxu0  ;;  %v5495_v1 = vpack.c.bf16 %v1209_v63, %v1207_v62 }
 0x587   :  { %v1052_v6 = vadd.f32 %v4412_v0, %v1034_v3  ;;  %v5493_v0 = vpack.c.bf16 %v1204_v61, %v1202_v60  ;;  %v1208_v3 = vld [vmem:[%s8438_s12 + $0x130] sm:$0xff]  ;;  %v4413_v61 = vld [vmem:[%s8437_s11] ss:$0 sm:$0xff] }
 0x588   :  { %v1055_v13 = vmax.f32 %v1053_v2, 0.0  ;;  %v1206_v2 = vld [vmem:[%s8438_s12 + $0x120] sm:$0xff] }
 0x589   :  { %v1054_v10 = vmax.f32 %v1052_v6, 0.0  ;;  %v5497_v6 = vpack.c.bf16 %v1208_v3, %v1206_v2  ;;  %v2200_v2 = vld [vmem:[%s8441_s15] sm:$0xff]  ;;  %v2202_v3 = vld [vmem:[%s8441_s15 + $0x10] sm:$0xff] }
 0x58b   :  { %5136 = vmatprep.mubr.f32.mxu1 %v1054_v10  ;;  %v1212_v10 = vld [vmem:[%s8438_s12 + $0x150] sm:$0xff] }
 0x58c   :  { %5137 = vmatmul.mubr.f32.vlgmr.msra.gmra.mrb[6].mxu1 %v1055_v13  ;;  %v1217_v13 = vld [vmem:[%s8438_s12 + $0x178] sm:$0xff] }
 0x58d   :  { %5462 = vmatpush1.bf16.msra.mxu1 %v5461_v11  ;;  %v1215_v11 = vld [vmem:[%s8438_s12 + $0x168] sm:$0xff] }
 0x58e   :  { %5464 = vmatprep.subr.bf16.mxu1 %v5463_v14  ;;  %v5501_v14 = vpack.c.bf16 %v1212_v10, %v1210_v8  ;;  %v5503_v15 = vpack.c.bf16 %v1217_v13, %v1215_v11  ;;  %v5589_v11 = vpack.c.bf16 %v2202_v3, %v2200_v2  ;;  %v2238_v2 = vld [vmem:[%s8441_s15 + $0x130] sm:$0xff] }
 0x591   :  { %5466 = vmatpush1.bf16.msra.mxu1 %v5465_v19  ;;  %v1221_v19 = vld [vmem:[%s8438_s12 + $0x198] sm:$0xff] }
 0x592   :  { %5468 = vmatprep.subr.bf16.mxu1 %v5467_v9  ;;  %v5505_v9 = vpack.c.bf16 %v1216_v17, %v1214_v16  ;;  %v5507_v20 = vpack.c.bf16 %v1221_v19, %v1219_v18  ;;  %v2211_v16 = vld [vmem:[%s8441_s15 + $0x58] sm:$0xff] }
 0x595   :  { %5470 = vmatpush1.bf16.msra.mxu1 %v5469_v23  ;;  %v1225_v23 = vld [vmem:[%s8438_s12 + $0x1b8] sm:$0xff] }
 0x596   :  { %5472 = vmatprep.subr.bf16.mxu1 %v5471_v24  ;;  %v5509_v24 = vpack.c.bf16 %v1220_v21, %v1218_v42  ;;  %v5511_v25 = vpack.c.bf16 %v1225_v23, %v1223_v22  ;;  %v2213_v42 = vld [vmem:[%s8441_s15 + $0x68] sm:$0xff]  ;;  %v2215_v21 = vld [vmem:[%s8441_s15 + $0x78] sm:$0xff] }
 0x597   :  { %v5599_v23 = vpack.c.bf16 %v2215_v21, %v2213_v42  ;;  %v2253_v42 = vld [vmem:[%s8441_s15 + $0x1a8] sm:$0xff]  ;;  %v2255_v21 = vld [vmem:[%s8441_s15 + $0x1b8] sm:$0xff] }
 0x599   :  { %5474 = vmatpush1.bf16.msra.mxu1 %v5473_v31  ;;  %v1227_v31 = vld [vmem:[%s8438_s12 + $0x1c8] sm:$0xff] }
 0x59a   :  { %5476 = vmatprep.subr.bf16.mxu1 %v5475_v33  ;;  %v1229_v33 = vld [vmem:[%s8438_s12 + $0x1d8] sm:$0xff] }
 0x59b   :  { %v5515_v34 = vpack.c.bf16 %v1229_v33, %v1227_v31  ;;  %v5603_v31 = vpack.c.bf16 %v2219_v27, %v2217_v26  ;;  %v2216_v33 = vld [vmem:[%s8441_s15 + $0x80] sm:$0xff]  ;;  %v2257_v26 = vld [vmem:[%s8441_s15 + $0x1c8] sm:$0xff]  ;;  %v2259_v27 = vld [vmem:[%s8441_s15 + $0x1d8] sm:$0xff] }
 0x59d   :  { %5478 = vmatpush1.bf16.msra.mxu1 %v5477_v38  ;;  %v5517_v38 = vpack.c.bf16 %v1228_v36, %v1226_v35  ;;  %v2221_v35 = vld [vmem:[%s8441_s15 + $0xa8] sm:$0xff]  ;;  %v2223_v36 = vld [vmem:[%s8441_s15 + $0xb8] sm:$0xff] }
 0x59e   :  { %5480 = vmatprep.subr.bf16.mxu1 %v5479_v41  ;;  %v1382_v41 = vld [vmem:[%s8439_s13 + $0x1d8] sm:$0xff] }
 0x59f   :  { %v5579_v45 = vpack.c.bf16 %v1382_v41, %v1380_v37  ;;  %v2220_v41 = vld [vmem:[%s8441_s15 + $0xa0] sm:$0xff] }
 0x5a1   :  { %5482 = vmatpush1.bf16.msra.mxu1 %v5481_v48  ;;  %v1231_v48 = vld [vmem:[%s8438_s12 + $0x1e8] sm:$0xff]  ;;  %5580 = vmatprep.subr.bf16.mxu0 %v5579_v45  ;;  %v2227_v45 = vld [vmem:[%s8441_s15 + $0xd8] sm:$0xff] }
 0x5a2   :  { %5484 = vmatprep.subr.bf16.mxu1 %v5483_v49  ;;  %v1233_v49 = vld [vmem:[%s8438_s12 + $0x1f8] sm:$0xff]  ;;  %5582 = vmatpush1.bf16.msra.mxu0 %v5581_v46  ;;  %v5609_v46 = vpack.c.bf16 %v2222_v43, %v2220_v41  ;;  %v2262_v41 = vld [vmem:[%s8441_s15 + $0x1f0] sm:$0xff] }
 0x5a3   :  { %v5519_v50 = vpack.c.bf16 %v1233_v49, %v1231_v48  ;;  %v5611_v48 = vpack.c.bf16 %v2227_v45, %v2225_v44  ;;  %v2224_v49 = vld [vmem:[%s8441_s15 + $0xc0] sm:$0xff]  ;;  %v6092_v44 = vmov 1966171168  }
 0x5a4   :  { %v1471_v45 = vunpack.c.l.s4 %v6092_v44 }
 0x5a5   :  { %5486 = vmatpush1.bf16.msra.mxu1 %v5485_v51  ;;  %v5521_v51 = vpack.c.bf16 %v1232_v28, %v1230_v12  ;;  %v2229_v12 = vld [vmem:[%s8441_s15 + $0xe8] sm:$0xff]  ;;  %v2231_v28 = vld [vmem:[%s8441_s15 + $0xf8] sm:$0xff] }
 0x5a6   :  { %5488 = vmatprep.subr.bf16.mxu1 %v5487_v53  ;;  %v1386_v53 = vld [vmem:[%s8439_s13 + $0x1f8] sm:$0xff] }
 0x5a7   :  { %v5583_v56 = vpack.c.bf16 %v1386_v53, %v1384_v47  ;;  %v2228_v53 = vld [vmem:[%s8441_s15 + $0xe0] sm:$0xff] }
 0x5a9   :  { %5490 = vmatpush1.bf16.msra.mxu1 %v5489_v58  ;;  %5584 = vmatprep.subr.bf16.mxu0 %v5583_v56  ;;  %v2201_v58 = vld [vmem:[%s8441_s15 + $0x8] sm:$0xff]  ;;  %v2235_v56 = vld [vmem:[%s8441_s15 + $0x118] sm:$0xff] }
 0x5aa   :  { %5492 = vmatprep.subr.bf16.mxu1 %v5491_v59  ;;  %5586 = vmatpush1.bf16.msra.mxu0 %v5585_v57  ;;  %v2203_v59 = vld [vmem:[%s8441_s15 + $0x18] sm:$0xff]  ;;  %v5617_v57 = vpack.c.bf16 %v2230_v54, %v2228_v53 }
 0x5ab   :  { %v5587_v60 = vpack.c.bf16 %v2203_v59, %v2201_v58  ;;  %v5619_v58 = vpack.c.bf16 %v2235_v56, %v2233_v55  ;;  %v2232_v59 = vld [vmem:[%s8441_s15 + $0x100] sm:$0xff] }
 0x5ad   :  { %5494 = vmatpush1.bf16.msra.mxu1 %v5493_v0  ;;  %5652 = vmatprep.subr.bf16.mxu0 %v5587_v60 }
 0x5ae   :  { %5496 = vmatprep.subr.bf16.mxu1 %v5495_v1 }
 0x5b1   :  { %5498 = vmatpush1.bf16.msra.mxu1 %v5497_v6  ;;  %v2205_v6 = vld [vmem:[%s8441_s15 + $0x28] sm:$0xff] }
 0x5b2   :  { %5500 = vmatprep.subr.bf16.mxu1 %v5499_v7  ;;  %v2207_v7 = vld [vmem:[%s8441_s15 + $0x38] sm:$0xff] }
 0x5b3   :  { %v5591_v13 = vpack.c.bf16 %v2207_v7, %v2205_v6  ;;  %v2240_v7 = vld [vmem:[%s8441_s15 + $0x140] sm:$0xff] }
 0x5b5   :  { %5502 = vmatpush1.bf16.msra.mxu1 %v5501_v14  ;;  %v2204_v14 = vld [vmem:[%s8441_s15 + $0x20] sm:$0xff] }
 0x5b6   :  { %5504 = vmatprep.subr.bf16.mxu1 %v5503_v15  ;;  %v2209_v15 = vld [vmem:[%s8441_s15 + $0x48] sm:$0xff] }
 0x5b7   :  { %v5595_v19 = vpack.c.bf16 %v2211_v16, %v2209_v15  ;;  %v2249_v16 = vld [vmem:[%s8441_s15 + $0x188] sm:$0xff] }
 0x5b9   :  { %5506 = vmatpush1.bf16.msra.mxu1 %v5505_v9  ;;  %v2208_v9 = vld [vmem:[%s8441_s15 + $0x40] sm:$0xff] }
 0x5ba   :  { %5508 = vmatprep.subr.bf16.mxu1 %v5507_v20  ;;  %v2210_v20 = vld [vmem:[%s8441_s15 + $0x50] sm:$0xff] }
 0x5bb   :  { %v5597_v22 = vpack.c.bf16 %v2210_v20, %v2208_v9  ;;  %v2250_v9 = vld [vmem:[%s8441_s15 + $0x190] sm:$0xff] }
 0x5bd   :  { %5510 = vmatpush1.bf16.msra.mxu1 %v5509_v24  ;;  %v2212_v24 = vld [vmem:[%s8441_s15 + $0x60] sm:$0xff] }
 0x5be   :  { %5512 = vmatprep.subr.bf16.mxu1 %v5511_v25  ;;  %v2214_v25 = vld [vmem:[%s8441_s15 + $0x70] sm:$0xff] }
 0x5c1   :  { %5514 = vmatpush1.bf16.msra.mxu1 %v5513_v29  ;;  %v5601_v29 = vpack.c.bf16 %v2214_v25, %v2212_v24  ;;  %v2254_v24 = vld [vmem:[%s8441_s15 + $0x1b0] sm:$0xff] }
 0x5c2   :  { %5516 = vmatprep.subr.bf16.mxu1 %v5515_v34  ;;  %v2218_v34 = vld [vmem:[%s8441_s15 + $0x90] sm:$0xff] }
 0x5c3   :  { %v5605_v37 = vpack.c.bf16 %v2218_v34, %v2216_v33  ;;  %v2258_v33 = vld [vmem:[%s8441_s15 + $0x1d0] sm:$0xff]  ;;  %v2261_v34 = vld [vmem:[%s8441_s15 + $0x1e8] sm:$0xff] }
 0x5c5   :  { %5518 = vmatpush1.bf16.msra.mxu1 %v5517_v38  ;;  %v5607_v38 = vpack.c.bf16 %v2223_v36, %v2221_v35  ;;  %v2263_v35 = vld [vmem:[%s8441_s15 + $0x1f8] sm:$0xff] }
 0x5c6   :  { %5520 = vmatprep.subr.bf16.mxu1 %v5519_v50  ;;  %v2226_v50 = vld [vmem:[%s8441_s15 + $0xd0] sm:$0xff] }
 0x5c7   :  { %v5613_v47 = vpack.c.bf16 %v2226_v50, %v2224_v49  ;;  %v6093_v50 = vmov 1983009808  }
 0x5c9   :  { %5522 = vmatpush1.bf16.msra.mxu1 %v5521_v51  ;;  %v5615_v51 = vpack.c.bf16 %v2231_v28, %v2229_v12  ;;  %v2058_v12 = vunpack.c.l.s4 %v6093_v50  ;;  %v1472_v28 = vunpack.c.0.s8 %v1471_v45 }
 0x5ca   :  { %5588 = vmatprep.subr.bf16.mxu1 %v5587_v60  ;;  %v2234_v60 = vld [vmem:[%s8441_s15 + $0x110] sm:$0xff] }
 0x5cb   :  { %v2059_v56 = vunpack.c.0.s8 %v2058_v12 }
 0x65f   :  { %v5138_v62 = vpop.f32.mrb[6].mxu1 }
 0x660   :  { %v1151_v63 = vadd.f32 %v5138_v62, %v4413_v61  ;;  %v1145_v0 = vpop.f32.mrb[7].mxu1  ;;  %v2237_v62 = vld [vmem:[%s8441_s15 + $0x128] sm:$0xff] }
 0x661   :  { %v1146_v1 = vadd.f32 %v4413_v61, %v1145_v0  ;;  %v5621_v61 = vpack.c.bf16 %v2234_v60, %v2232_v59 }
 0x662   :  { %v1155_v4 = vadd.f32 %v1151_v63, %v6364_v40  ;;  %v2239_v63 = vld [vmem:[%s8441_s15 + $0x138] sm:$0xff] }
 0x663   :  { %v1154_v5 = vadd.f32 %v1146_v1, %v6362_v39  ;;  %v2206_v39 = vld [vmem:[%s8441_s15 + $0x30] sm:$0xff]  ;;  %v5623_v0 = vpack.c.bf16 %v2239_v63, %v2237_v62  ;;  %v2236_v1 = vld [vmem:[%s8441_s15 + $0x120] sm:$0xff] }
 0x664   :  { %v1165_v40 = vrot.slane %v1155_v4, 1  ;;  %v1159_v17 = vrot.slane %v1155_v4, 7  ;;  %v5593_v18 = vpack.c.bf16 %v2206_v39, %v2204_v14  ;;  %v5625_v3 = vpack.c.bf16 %v2238_v2, %v2236_v1  ;;  %v2244_v39 = vld [vmem:[%s8441_s15 + $0x160] sm:$0xff] }
 0x665   :  { %v1158_v8 = vrot.slane %v1154_v5, 7  ;;  %1310 = vmatprep.mubr.f32.mxu1 %v1154_v5  ;;  %v1164_v10 = vrot.slane %v1154_v5, 1 }
 0x667   :  { %4415 = vmatmul.mubr.msk.f32.vlgmr.msra.gmra.mrb[8].mxu1 %vm6315_vm1, %v1158_v8  ;;  %4418 = vmatprep.mubr.msk.f32.mxu0 %vm154_vm2, %v1164_v10  ;;  %v2242_v8 = vld [vmem:[%s8441_s15 + $0x150] sm:$0xff] }
 0x668   :  { %1316 = vmatprep.mubr.f32.mxu1 %v1155_v4  ;;  %1452 = vmatmul.mubr.f32.vlgmr.msra.gmra.mrb[4].mxu0 %v1154_v5  ;;  %v2243_v5 = vld [vmem:[%s8441_s15 + $0x158] sm:$0xff]  ;;  %v5629_v10 = vpack.c.bf16 %v2242_v8, %v2240_v7 }
 0x669   :  { %4419 = vmatprep.mubr.msk.f32.mxu0 %vm154_vm2, %v1165_v40  ;;  %5590 = vmatpush1.bf16.msra.mxu1 %v5589_v11  ;;  %v2246_v40 = vld [vmem:[%s8441_s15 + $0x170] sm:$0xff] }
 0x66a   :  { %5592 = vmatprep.subr.bf16.mxu1 %v5591_v13  ;;  %5654 = vmatpush1.bf16.msra.mxu0 %v5589_v11  ;;  %v2245_v11 = vld [vmem:[%s8441_s15 + $0x168] sm:$0xff]  ;;  %v5633_v15 = vpack.c.bf16 %v2246_v40, %v2244_v39 }
 0x66b   :  { %4417 = vmatmul.mubr.msk.f32.gmra.mrb[10].mxu1 %vm6315_vm1, %v1159_v17  ;;  %5656 = vmatprep.subr.bf16.mxu0 %v5591_v13  ;;  %v2247_v13 = vld [vmem:[%s8441_s15 + $0x178] sm:$0xff] }
 0x66c   :  { %1458 = vmatmul.mubr.f32.gmra.mrb[6].mxu0 %v1155_v4  ;;  %v2241_v4 = vld [vmem:[%s8441_s15 + $0x148] sm:$0xff]  ;;  %v5631_v14 = vpack.c.bf16 %v2247_v13, %v2245_v11  ;;  %v2251_v17 = vld [vmem:[%s8441_s15 + $0x198] sm:$0xff] }
 0x66d   :  { %5594 = vmatpush1.bf16.msra.mxu1 %v5593_v18  ;;  %v5627_v6 = vpack.c.bf16 %v2243_v5, %v2241_v4  ;;  %v6982_v5 = vsub.s32 %v2059_v56, %v6348_v30 }
 0x66e   :  { %5596 = vmatprep.subr.bf16.mxu1 %v5595_v19  ;;  %5658 = vmatpush1.bf16.msra.mxu0 %v5593_v18  ;;  %v5635_v18 = vpack.c.bf16 %v2251_v17, %v2249_v16 }
 0x66f   :  { %5660 = vmatprep.subr.bf16.mxu0 %v5595_v19  ;;  %v2248_v19 = vld [vmem:[%s8441_s15 + $0x180] sm:$0xff] }
 0x670   :  { %v5637_v20 = vpack.c.bf16 %v2250_v9, %v2248_v19 }
 0x671   :  { %5598 = vmatpush1.bf16.msra.mxu1 %v5597_v22 }
 0x672   :  { %5600 = vmatprep.subr.bf16.mxu1 %v5599_v23  ;;  %5662 = vmatpush1.bf16.msra.mxu0 %v5597_v22  ;;  %v5639_v22 = vpack.c.bf16 %v2255_v21, %v2253_v42 }
 0x673   :  { %5664 = vmatprep.subr.bf16.mxu0 %v5599_v23  ;;  %v2252_v23 = vld [vmem:[%s8441_s15 + $0x1a0] sm:$0xff] }
 0x674   :  { %v5641_v25 = vpack.c.bf16 %v2254_v24, %v2252_v23 }
 0x675   :  { %5602 = vmatpush1.bf16.msra.mxu1 %v5601_v29 }
 0x676   :  { %5604 = vmatprep.subr.bf16.mxu1 %v5603_v31  ;;  %5666 = vmatpush1.bf16.msra.mxu0 %v5601_v29  ;;  %v2256_v29 = vld [vmem:[%s8441_s15 + $0x1c0] sm:$0xff] }
 0x677   :  { %5668 = vmatprep.subr.bf16.mxu0 %v5603_v31  ;;  %v5643_v31 = vpack.c.bf16 %v2259_v27, %v2257_v26  ;;  %v5645_v36 = vpack.c.bf16 %v2258_v33, %v2256_v29 }
 0x679   :  { %5606 = vmatpush1.bf16.msra.mxu1 %v5605_v37 }
 0x67a   :  { %5608 = vmatprep.subr.bf16.mxu1 %v5607_v38  ;;  %5670 = vmatpush1.bf16.msra.mxu0 %v5605_v37  ;;  %v5647_v37 = vpack.c.bf16 %v2263_v35, %v2261_v34 }
 0x67b   :  { %5672 = vmatprep.subr.bf16.mxu0 %v5607_v38  ;;  %v2260_v38 = vld [vmem:[%s8441_s15 + $0x1e0] sm:$0xff]  ;;  %s6096_s15 = smov [#allocation11]  }
 0x67c   :  { %v5649_v43 = vpack.c.bf16 %v2262_v41, %v2260_v38  ;;  %s4383_s0 = sshll.u32 %s6096_s15, 4  ;;  %s4384_s0 = int_to_ptr.vmem [resolvable:$true] %s4383_s0 }
 0x67d   :  { %5610 = vmatpush1.bf16.msra.mxu1 %v5609_v46  ;;  %s6055_s4 = scalar_lea.vmem %s4384_s0, 3072  ;;  %p6060_p13 = scmp.lt.s32.totalorder %s4384_s0, %s4384_s0 }
 0x67e   :  { %5612 = vmatprep.subr.bf16.mxu1 %v5611_v48  ;;  %5674 = vmatpush1.bf16.msra.mxu0 %v5609_v46  ;;  %v1234_v46 = vld [vmem:[%s8440_s14] sm:$0x3]  ;;  %s6095_s14 = smov 64   ;;  %p6056_p12 = scmp.ne.s32.totalorder %s4384_s0, %s6055_s4 }
 0x67f   :  { %5676 = vmatprep.subr.bf16.mxu0 %v5611_v48  ;;  %v6974_v48 = vsub.s32 1, %v6348_v30  ;;  %v1239_v49 = vrot.slane %v1234_v46, %v6354_v32  ;;  %p6061_p0 = scmp.lt.s32.totalorder %s6055_s4, %s6055_s4 }
 0x681   :  { %5614 = vmatpush1.bf16.msra.mxu1 %v5613_v47  ;;  %p6062_p1 = por %p6061_p0, %p6060_p13 }
 0x682   :  { %5616 = vmatprep.subr.bf16.mxu1 %v5615_v51  ;;  %5678 = vmatpush1.bf16.msra.mxu0 %v5613_v47  ;;  %v1243_v47 = vrot.slane %v1234_v46, %v6974_v48 }
 0x683   :  { %5680 = vmatprep.subr.bf16.mxu0 %v5615_v51  ;;  %p6063_p2 = pnand %p6062_p1, %p6056_p12 }
 0x685   :  { %5618 = vmatpush1.bf16.msra.mxu1 %v5617_v57 }
 0x686   :  { %5620 = vmatprep.subr.bf16.mxu1 %v5619_v58  ;;  %5682 = vmatpush1.bf16.msra.mxu0 %v5617_v57  ;;  %v6979_v57 = vsub.s32 %v1472_v28, %v6348_v30 }
 0x687   :  { %5684 = vmatprep.subr.bf16.mxu0 %v5619_v58 }
 0x689   :  { %5622 = vmatpush1.bf16.msra.mxu1 %v5621_v61 }
 0x68a   :  { %5686 = vmatpush1.bf16.msra.mxu0 %v5621_v61  ;;  %5624 = vmatprep.subr.bf16.mxu1 %v5623_v0 }
 0x68b   :  { %5688 = vmatprep.subr.bf16.mxu0 %v5623_v0 }
 0x68d   :  { %5626 = vmatpush1.bf16.msra.mxu1 %v5625_v3 }
 0x68e   :  { %5690 = vmatpush1.bf16.msra.mxu0 %v5625_v3  ;;  %5628 = vmatprep.subr.bf16.mxu1 %v5627_v6 }
 0x68f   :  { %5692 = vmatprep.subr.bf16.mxu0 %v5627_v6 }
 0x691   :  { %5630 = vmatpush1.bf16.msra.mxu1 %v5629_v10 }
 0x692   :  { %5694 = vmatpush1.bf16.msra.mxu0 %v5629_v10  ;;  %5632 = vmatprep.subr.bf16.mxu1 %v5631_v14 }
 0x693   :  { %5696 = vmatprep.subr.bf16.mxu0 %v5631_v14 }
 0x695   :  { %5634 = vmatpush1.bf16.msra.mxu1 %v5633_v15 }
 0x696   :  { %5698 = vmatpush1.bf16.msra.mxu0 %v5633_v15  ;;  %5636 = vmatprep.subr.bf16.mxu1 %v5635_v18 }
 0x697   :  { %5700 = vmatprep.subr.bf16.mxu0 %v5635_v18 }
 0x699   :  { %5638 = vmatpush1.bf16.msra.mxu1 %v5637_v20 }
 0x69a   :  { %5702 = vmatpush1.bf16.msra.mxu0 %v5637_v20  ;;  %5640 = vmatprep.subr.bf16.mxu1 %v5639_v22 }
 0x69b   :  { %5704 = vmatprep.subr.bf16.mxu0 %v5639_v22 }
 0x69d   :  { %5642 = vmatpush1.bf16.msra.mxu1 %v5641_v25 }
 0x69e   :  { %5706 = vmatpush1.bf16.msra.mxu0 %v5641_v25  ;;  %5644 = vmatprep.subr.bf16.mxu1 %v5643_v31 }
 0x69f   :  { %5708 = vmatprep.subr.bf16.mxu0 %v5643_v31 }
 0x6a1   :  { %5646 = vmatpush1.bf16.msra.mxu1 %v5645_v36 }
 0x6a2   :  { %5710 = vmatpush1.bf16.msra.mxu0 %v5645_v36  ;;  %5648 = vmatprep.subr.bf16.mxu1 %v5647_v37 }
 0x6a3   :  { %5712 = vmatprep.subr.bf16.mxu0 %v5647_v37 }
 0x6a5   :  { %5650 = vmatpush1.bf16.msra.mxu1 %v5649_v43 }
 0x6a6   :  { %5714 = vmatpush1.bf16.msra.mxu0 %v5649_v43 }
 0x73a   :  { %v1312_v51 = vpop.f32.mrb[8].mxu1 }
 0x73b   :  { %v1313_v53 = vadd.f32 %v1312_v51, %v1239_v49  ;;  %v1314_v54 = vpop.f32.mrb[9].mxu1  ;;  %v1453_v55 = vpop.f32.mrb[4].mxu0 }
 0x73c   :  { %v1315_v58 = vadd.f32 %v1314_v54, %v1243_v47  ;;  %v1454_v59 = vadd.f32 %v1453_v55, %v1239_v49  ;;  %v1455_v60 = vpop.f32.mrb[5].mxu0 }
 0x73d   :  { %v1456_v61 = vadd.f32 %v1455_v60, %v1243_v47 }
 0x73e   :  { %v1468_v62 = vcombine.low %v1313_v53, %v1315_v58  ;;  %v1469_v63 = vcombine.high %v1313_v53, %v1315_v58  ;;  %v1318_v0 = vpop.f32.mrb[10].mxu1 }
 0x73f   :  { %v1572_v1 = vcombine.low %v1454_v59, %v1456_v61  ;;  %v1573_v2 = vcombine.high %v1454_v59, %v1456_v61  ;;  %v1320_v3 = vpop.f32.mrb[11].mxu1  ;;  %v1459_v4 = vpop.f32.mrb[6].mxu0  ;;  %v6986_v8 = vadd.f32 %v1318_v0, %v1239_v49 }
 0x740   :  { %v1476_v6 = vrot.slane %v1468_v62, %v6979_v57  ;;  %v1483_v7 = vrot.slane %v1469_v63, %v6979_v57  ;;  %v6988_v10 = vadd.f32 %v1320_v3, %v1243_v47  ;;  %v1461_v11 = vpop.f32.mrb[7].mxu0  ;;  %v6992_v39 = vadd.f32 %v1459_v4, %v1239_v49 }
 0x741   :  { %v1580_v13 = vrot.slane %v1572_v1, %v6979_v57  ;;  %v1587_v14 = vrot.slane %v1573_v2, %v6979_v57  ;;  %v6994_v40 = vadd.f32 %v1461_v11, %v1243_v47 }
 0x742   :  { %v1484_v15 = vcombine.high %v1476_v6, %v1476_v6  ;;  %v1485_v30 = vcombine.high %v1483_v7, %v1483_v7  ;;  %v1492_v16 = vrot.slane %v1476_v6, %v6979_v57  ;;  %v6998_v17 = vrot.slane %v1483_v7, %v6979_v57 }
 0x743   :  { %v1588_v18 = vcombine.high %v1580_v13, %v1580_v13  ;;  %v1589_v19 = vcombine.high %v1587_v14, %v1587_v14  ;;  %v1596_v9 = vrot.slane %v1580_v13, %v6979_v57  ;;  %v7002_v20 = vrot.slane %v1587_v14, %v6979_v57 }
 0x744   :  { %v1506_v42 = vrot.slane %v1484_v15, %v6979_v57  ;;  %v7006_v21 = vrot.slane %v1485_v30, %v6979_v57  ;;  %v1514_v22 = vcombine.high %v1492_v16, %v1492_v16  ;;  %v7010_v23 = vcombine.high %v6998_v17, %v6998_v17 }
 0x745   :  { %v1675_v24 = vrot.slane %v1492_v16, %v6354_v32  ;;  %v1679_v25 = vrot.slane %v1492_v16, %v6974_v48  ;;  %v1707_v26 = vrot.slane %v6998_v17, %v6354_v32  ;;  %v1711_v27 = vrot.slane %v6998_v17, %v6974_v48 }
 0x746   :  { %v1516_v29 = vcombine.high %v1506_v42, %v1506_v42  ;;  %v7020_v31 = vcombine.high %v7006_v21, %v7006_v21  ;;  %v1683_v33 = vrot.slane %v1506_v42, %v6354_v32  ;;  %v1687_v34 = vrot.slane %v1506_v42, %v6974_v48 }
 0x747   :  { %v1691_v35 = vrot.slane %v1514_v22, %v6354_v32  ;;  %v1695_v36 = vrot.slane %v1514_v22, %v6974_v48  ;;  %v1715_v37 = vrot.slane %v7006_v21, %v6354_v32  ;;  %v1719_v38 = vrot.slane %v7006_v21, %v6974_v48 }
 0x748   :  { %v1699_v41 = vrot.slane %v1516_v29, %v6354_v32  ;;  %v1703_v43 = vrot.slane %v1516_v29, %v6974_v48  ;;  %v1723_v44 = vrot.slane %v7010_v23, %v6354_v32  ;;  %v1727_v45 = vrot.slane %v7010_v23, %v6974_v48 }
 0x749   :  { %v1731_v46 = vrot.slane %v7020_v31, %v6354_v32  ;;  %v1610_v50 = vrot.slane %v1588_v18, %v6979_v57  ;;  %v7042_v12 = vrot.slane %v1589_v19, %v6979_v57  ;;  %v1618_v28 = vcombine.high %v1596_v9, %v1596_v9 }
 0x74a   :  { %v7046_v47 = vcombine.high %v7002_v20, %v7002_v20  ;;  %v1835_v51 = vrot.slane %v1596_v9, %v6354_v32  ;;  %v1839_v53 = vrot.slane %v1596_v9, %v6974_v48  ;;  %v1867_v61 = vrot.slane %v7002_v20, %v6354_v32 }
 0x74b   :  { %v1620_v54 = vcombine.high %v1610_v50, %v1610_v50  ;;  %v7052_v55 = vcombine.high %v7042_v12, %v7042_v12  ;;  %v1843_v56 = vrot.slane %v1610_v50, %v6354_v32  ;;  %v1847_v58 = vrot.slane %v1610_v50, %v6974_v48 }
 0x74c   :  { %v1851_v59 = vrot.slane %v1618_v28, %v6354_v32  ;;  %v1855_v60 = vrot.slane %v1618_v28, %v6974_v48  ;;  %v1871_v62 = vrot.slane %v7002_v20, %v6974_v48  ;;  %v1875_v1 = vrot.slane %v7042_v12, %v6354_v32 }
 0x74d   :  { %v1859_v63 = vrot.slane %v1620_v54, %v6354_v32  ;;  %v1863_v0 = vrot.slane %v1620_v54, %v6974_v48  ;;  %v1879_v2 = vrot.slane %v7042_v12, %v6974_v48  ;;  %v1883_v3 = vrot.slane %v7046_v47, %v6354_v32 }
 0x74e   :  { %v1887_v4 = vrot.slane %v7046_v47, %v6974_v48  ;;  %v1891_v6 = vrot.slane %v7052_v55, %v6354_v32  ;;  %v1518_v11 = vcombine.low %v6986_v8, %v6988_v10  ;;  %v1519_v13 = vcombine.high %v6986_v8, %v6988_v10 }
 0x74f   :  { %v1622_v14 = vcombine.low %v6992_v39, %v6994_v40  ;;  %v1623_v15 = vcombine.high %v6992_v39, %v6994_v40  ;;  %v7085_v30 = vsel %vm147_vm0, %v1675_v24, %v1835_v51  ;;  %v7088_v16 = vsel %vm147_vm0, %v1679_v25, %v1839_v53 }
 0x750   :  { %v7091_v18 = vsel %vm147_vm0, %v1683_v33, %v1843_v56  ;;  %v7094_v19 = vsel %vm147_vm0, %v1687_v34, %v1847_v58  ;;  %v1526_v8 = vrot.slane %v1518_v11, %v6979_v57  ;;  %v1533_v10 = vrot.slane %v1519_v13, %v6979_v57 }
 0x751   :  { %v1630_v9 = vrot.slane %v1622_v14, %v6979_v57  ;;  %v1637_v39 = vrot.slane %v1623_v15, %v6979_v57  ;;  %v7101_v40 = vsel %vm147_vm0, %v1691_v35, %v1851_v59  ;;  %v7104_v42 = vsel %vm147_vm0, %v1695_v36, %v1855_v60 }
 0x752   :  { %v7107_v22 = vsel %vm147_vm0, %v1699_v41, %v1859_v63  ;;  %v7110_v24 = vsel %vm147_vm0, %v1703_v43, %v1863_v0  ;;  %v1534_v25 = vcombine.high %v1526_v8, %v1526_v8  ;;  %v1535_v29 = vcombine.high %v1533_v10, %v1533_v10 }
 0x753   :  { %v7113_v33 = vrot.slane %v1526_v8, %v6979_v57  ;;  %v7116_v34 = vrot.slane %v1533_v10, %v6979_v57  ;;  %v1638_v50 = vcombine.high %v1630_v9, %v1630_v9  ;;  %v1639_v35 = vcombine.high %v1637_v39, %v1637_v39 }
 0x754   :  { %v7119_v28 = vrot.slane %v1630_v9, %v6979_v57  ;;  %v7122_v36 = vrot.slane %v1637_v39, %v6979_v57  ;;  %v7125_v41 = vrot.slane %v1534_v25, %v6979_v57  ;;  %v7128_v43 = vrot.slane %v1535_v29, %v6979_v57 }
 0x755   :  { %v7132_v51 = vcombine.high %v7113_v33, %v7113_v33  ;;  %v7136_v53 = vcombine.high %v7116_v34, %v7116_v34  ;;  %v1660_v8 = vrot.slane %v1638_v50, %v6979_v57  ;;  %v7180_v59 = vrot.slane %v1639_v35, %v6979_v57 }
 0x756   :  { %v7148_v60 = vcombine.high %v7125_v41, %v7125_v41  ;;  %v7152_v63 = vcombine.high %v7128_v43, %v7128_v43  ;;  %v1668_v58 = vcombine.high %v7119_v28, %v7119_v28  ;;  %v7186_v39 = vcombine.high %v7122_v36, %v7122_v36 }
 0x757   :  { %v1899_v25 = vrot.slane %v7119_v28, %v6354_v32  ;;  %v1903_v29 = vrot.slane %v7119_v28, %v6974_v48  ;;  %v1670_v9 = vcombine.high %v1660_v8, %v1660_v8  ;;  %v7194_v50 = vcombine.high %v7180_v59, %v7180_v59 }
 0x758   :  { %v1907_v35 = vrot.slane %v1660_v8, %v6354_v32  ;;  %v1911_v15 = vrot.slane %v1660_v8, %v6974_v48  ;;  %v1915_v10 = vrot.slane %v1668_v58, %v6354_v32  ;;  %v1919_v14 = vrot.slane %v1668_v58, %v6974_v48 }
 0x759   :  { %v1931_v13 = vrot.slane %v7122_v36, %v6354_v32  ;;  %v1935_v11 = vrot.slane %v7122_v36, %v6974_v48  ;;  %v1923_v28 = vrot.slane %v1670_v9, %v6354_v32  ;;  %v1927_v0 = vrot.slane %v1670_v9, %v6974_v48 }
 0x75a   :  { %v1939_v56 = vrot.slane %v7180_v59, %v6354_v32  ;;  %v1943_v8 = vrot.slane %v7180_v59, %v6974_v48  ;;  %v1951_v58 = vrot.slane %v7186_v39, %v6974_v48  ;;  %v1955_v49 = vrot.slane %v7194_v50, %v6354_v32 }
 0x75b   :  { %v2056_v9 = vcombine.low %v7085_v30, %v7088_v16  ;;  %v2064_v7 = vcombine.low %v7091_v18, %v7094_v19  ;;  %v2072_v59 = vcombine.low %v7101_v40, %v7104_v42  ;;  %v2080_v54 = vcombine.low %v7107_v22, %v7110_v24 }
 0x75c   :  { %v2000_v36 = vsel %vm147_vm0, %v1707_v26, %v1867_v61  ;;  %v2001_v30 = vsel %vm147_vm0, %v1711_v27, %v1871_v62  ;;  %v2002_v16 = vsel %vm147_vm0, %v1715_v37, %v1875_v1  ;;  %v2003_v20 = vsel %vm147_vm0, %v1719_v38, %v1879_v2 }
 0x75d   :  { %v7255_v17 = vrot.slane %v2056_v9, %v6982_v5  ;;  %v7258_v26 = vrot.slane %v2064_v7, %v6982_v5  ;;  %v7261_v27 = vrot.slane %v2072_v59, %v6982_v5  ;;  %v7264_v61 = vrot.slane %v2080_v54, %v6982_v5 }
 0x75e   :  { %v2004_v21 = vsel %vm147_vm0, %v1723_v44, %v1883_v3  ;;  %v2005_v37 = vsel %vm147_vm0, %v1727_v45, %v1887_v4  ;;  %v2006_v38 = vsel %vm147_vm0, %v1731_v46, %v1891_v6  ;;  %v8469_v12 = vrot.slane %v7052_v55, %v6974_v48 }
 0x75f   :  { %v8470_v44 = vrot.slane %v7020_v31, %v6974_v48  ;;  %v2264_v23 = vcombine.low %v7255_v17, %v7258_v26  ;;  %v2265_v45 = vcombine.low %v7261_v27, %v7264_v61  ;;  %v2088_v62 = vcombine.low %v2000_v36, %v2001_v30 }
 0x760   :  { %v2096_v1 = vcombine.low %v2002_v16, %v2003_v20  ;;  %v2104_v2 = vcombine.low %v2004_v21, %v2005_v37  ;;  %v8471_v46 = vrot.slane %v7113_v33, %v6354_v32  ;;  %v8472_v31 = vrot.slane %v7113_v33, %v6974_v48 }
 0x761   :  { %v2007_v47 = vsel %vm147_vm0, %v8470_v44, %v8469_v12  ;;  %v2272_v6 = vrot.slane %v2264_v23, %v6982_v5  ;;  %v2279_v7 = vrot.slane %v2265_v45, %v6982_v5  ;;  %v7309_v18 = vrot.slane %v2088_v62, %v6982_v5 }
 0x762   :  { %v2112_v3 = vcombine.low %v2006_v38, %v2007_v47  ;;  %v2008_v55 = vsel %vm147_vm0, %v8471_v46, %v1899_v25  ;;  %v2009_v4 = vsel %vm147_vm0, %v8472_v31, %v1903_v29  ;;  %v7312_v19 = vrot.slane %v2096_v1, %v6982_v5 }
 0x763   :  { %v7315_v40 = vrot.slane %v2104_v2, %v6982_v5  ;;  %v8473_v22 = vrot.slane %v7125_v41, %v6354_v32  ;;  %v8474_v33 = vrot.slane %v7125_v41, %v6974_v48  ;;  %v2280_v25 = vcombine.low %v2272_v6, %v2279_v7 }
 0x764   :  { %v7318_v42 = vrot.slane %v2112_v3, %v6982_v5  ;;  %v2281_v29 = vcombine.high %v2272_v6, %v2279_v7  ;;  %v2282_v36 = vcombine.low %v7309_v18, %v7312_v19  ;;  %v8475_v9 = vrot.slane %v7132_v51, %v6354_v32 }
 0x765   :  { %v2010_v24 = vsel %vm147_vm0, %v8473_v22, %v1907_v35  ;;  %v2011_v54 = vsel %vm147_vm0, %v8474_v33, %v1911_v15  ;;  %v8476_v35 = vrot.slane %v7132_v51, %v6974_v48  ;;  %v8477_v15 = vrot.slane %v7148_v60, %v6354_v32 }
 0x766   :  { %v2012_v59 = vsel %vm147_vm0, %v8475_v9, %v1915_v10  ;;  %v2283_v30 = vcombine.low %v7315_v40, %v7318_v42  ;;  %v8478_v20 = vrot.slane %v7148_v60, %v6974_v48  ;;  %2408 = vmatprep.mubr.f32.mxu1 %v2281_v29  ;;  %v2290_v10 = vrot.slane %v2282_v36, %v6982_v5 }
 0x767   :  { %v2013_v41 = vsel %vm147_vm0, %v8476_v35, %v1919_v14  ;;  %v2014_v16 = vsel %vm147_vm0, %v8477_v15, %v1923_v28  ;;  %v2120_v37 = vcombine.low %v2008_v55, %v2009_v4  ;;  %v2128_v38 = vcombine.low %v2010_v24, %v2011_v54  ;;  %2409 = vmatmul.mubr.f32.vlgmr.msra.gmra.mrb[12].mxu1 %v2280_v25 }
 0x768   :  { %v2015_v21 = vsel %vm147_vm0, %v8478_v20, %v1927_v0  ;;  %v2136_v12 = vcombine.low %v2012_v59, %v2013_v41  ;;  %v2297_v51 = vrot.slane %v2283_v30, %v6982_v5  ;;  %v8479_v44 = vrot.slane %v7116_v34, %v6354_v32 }
 0x769   :  { %v2144_v14 = vcombine.low %v2014_v16, %v2015_v21  ;;  %v8480_v60 = vrot.slane %v7116_v34, %v6974_v48  ;;  %v7359_v47 = vrot.slane %v2120_v37, %v6982_v5  ;;  %v7362_v23 = vrot.slane %v2128_v38, %v6982_v5 }
 0x76a   :  { %v2016_v28 = vsel %vm147_vm0, %v8479_v44, %v1931_v13  ;;  %v8481_v45 = vrot.slane %v7128_v43, %v6354_v32  ;;  %v2299_v1 = vcombine.high %v2290_v10, %v2297_v51  ;;  %v7369_v2 = vrot.slane %v2136_v12, %v6982_v5 }
 0x76b   :  { %v2017_v0 = vsel %vm147_vm0, %v8480_v60, %v1935_v11  ;;  %v7372_v13 = vrot.slane %v2144_v14, %v6982_v5  ;;  %v8482_v34 = vrot.slane %v7128_v43, %v6974_v48  ;;  %v2300_v3 = vcombine.low %v7359_v47, %v7362_v23 }
 0x76c   :  { %v2018_v62 = vsel %vm147_vm0, %v8481_v45, %v1939_v56  ;;  %v8483_v46 = vrot.slane %v7186_v39, %v6354_v32  ;;  %v8484_v56 = vrot.slane %v7136_v53, %v6354_v32  ;;  %v8485_v31 = vrot.slane %v7136_v53, %v6974_v48  ;;  %2414 = vmatprep.mubr.f32.mxu1 %v2299_v1 }
 0x76d   :  { %v2019_v11 = vsel %vm147_vm0, %v8482_v34, %v1943_v8  ;;  %v8486_v8 = vrot.slane %v7152_v63, %v6354_v32  ;;  %v2301_v6 = vcombine.low %v7369_v2, %v7372_v13  ;;  %v8487_v39 = vrot.slane %v7194_v50, %v6974_v48 }
 0x76e   :  { %v2020_v55 = vsel %vm147_vm0, %v8484_v56, %v8483_v46  ;;  %v2021_v43 = vsel %vm147_vm0, %v8485_v31, %v1951_v58  ;;  %v8488_v53 = vrot.slane %v7152_v63, %v6974_v48  ;;  %v2152_v7 = vcombine.low %v2016_v28, %v2017_v0 }
 0x76f   :  { %v2022_v4 = vsel %vm147_vm0, %v8486_v8, %v1955_v49  ;;  %v2160_v22 = vcombine.low %v2018_v62, %v2019_v11  ;;  %v2168_v24 = vcombine.low %v2020_v55, %v2021_v43  ;;  %v2298_v54 = vcombine.low %v2290_v10, %v2297_v51 }
 0x770   :  { %v2023_v58 = vsel %vm147_vm0, %v8488_v53, %v8487_v39  ;;  %v2308_v25 = vrot.slane %v2300_v3, %v6982_v5  ;;  %v2315_v49 = vrot.slane %v2301_v6, %v6982_v5  ;;  %v7416_v36 = vrot.slane %v2152_v7, %v6982_v5 }
 0x771   :  { %v2176_v33 = vcombine.low %v2022_v4, %v2023_v58  ;;  %v7413_v29 = vrot.slane %v2160_v22, %v6982_v5  ;;  %v7419_v50 = vrot.slane %v2168_v24, %v6982_v5  ;;  %2415 = vmatmul.mubr.f32.gmra.mrb[12].mxu1 %v2298_v54 }
 0x772   :  { %v2317_v9 = vcombine.high %v2308_v25, %v2315_v49  ;;  %v2316_v15 = vcombine.low %v2308_v25, %v2315_v49 }
 0x773   :  { %v7422_v63 = vrot.slane %v2176_v33, %v6982_v5  ;;  %v2318_v59 = vcombine.low %v7416_v36, %v7413_v29 }
 0x774   :  { %2420 = vmatprep.mubr.f32.mxu1 %v2317_v9 }
 0x775   :  { %v2319_v30 = vcombine.low %v7419_v50, %v7422_v63  ;;  %v2326_v41 = vrot.slane %v2318_v59, %v6982_v5 }
 0x777   :  { %v2333_v35 = vrot.slane %v2319_v30, %v6982_v5 }
 0x779   :  { %v2335_v16 = vcombine.high %v2326_v41, %v2333_v35  ;;  %2421 = vmatmul.mubr.f32.gmra.mrb[12].mxu1 %v2316_v15  ;;  %v2334_v20 = vcombine.low %v2326_v41, %v2333_v35 }
 0x77b   :  { %2426 = vmatprep.mubr.f32.mxu1 %v2335_v16 }
 0x781   :  { %2427 = vmatmul.mubr.f32.gmra.mrb[12].mxu1 %v2334_v20 }
 0x854   :  { %v2428_v21 = vpop.f32.mrb[12].mxu1 }
 0x855   :  { %v2436_v10 = vrot.slane %v2428_v21, 4  ;;  %v2430_v37 = vpop.f32.mrb[13].mxu1 }
 0x856   :  { %v2445_v38 = vrot.slane %v2430_v37, 4 }
 0x857   :  { %v2437_v12 = vadd.f32 %v2436_v10, %v2428_v21 }
 0x858   :  { %v2446_v51 = vadd.f32 %v2445_v38, %v2430_v37 }
 0x859   :  { %v2438_v14 = vrot.slane %v2437_v12, 2 }
 0x85a   :  { %v2447_v44 = vrot.slane %v2446_v51, 2 }
 0x85b   :  { %v2439_v28 = vadd.f32 %v2438_v14, %v2437_v12 }
 0x85c   :  { %v2448_v60 = vadd.f32 %v2447_v44, %v2446_v51 }
 0x85d   :  { %v2440_v0 = vrot.slane %v2439_v28, 1 }
 0x85e   :  { %v2449_v45 = vrot.slane %v2448_v60, 1 }
 0x85f   :  { %v2441_v62 = vadd.f32 %v2440_v0, %v2439_v28 }
 0x860   :  { %v2450_v1 = vadd.f32 %v2449_v45, %v2448_v60 }
 0x861   :  { %v2451_v34 = vmul.f32 0.001953125, %v2441_v62 }
 0x862   :  { %v2452_v11 = vmul.f32 0.001953125, %v2450_v1 }
 0x864   :  { %v2455_v3 = vcombine.low %v2451_v34, %v2452_v11  ;;  %v2456_v46 = vcombine.high %v2451_v34, %v2452_v11 }
 0x866   :  { %v2463_v56 = vrot.slane %v2455_v3, %v6982_v5  ;;  %v2470_v55 = vrot.slane %v2456_v46, %v6982_v5 }
 0x868   :  { %v2471_v31 = vcombine.high %v2463_v56, %v2463_v56  ;;  %v2472_v43 = vcombine.high %v2470_v55, %v2470_v55  ;;  %v7433_v8 = vsub.f32 %v7255_v17, %v2463_v56  ;;  %v7436_v4 = vsub.f32 %v7261_v27, %v2470_v55 }
 0x869   :  { %v7439_v6 = vsub.f32 %v7309_v18, %v2463_v56  ;;  %v7442_v39 = vsub.f32 %v7315_v40, %v2470_v55  ;;  %v7503_v14 = vsub.f32 %v7416_v36, %v2463_v56  ;;  %v7506_v44 = vsub.f32 %v7419_v50, %v2470_v55 }
 0x86a   :  { %v7445_v53 = vsub.f32 %v7258_v26, %v2471_v31  ;;  %v7448_v58 = vsub.f32 %v7264_v61, %v2472_v43  ;;  %v2493_v7 = vmul.f32 %v7433_v8, %v7433_v8  ;;  %v2495_v17 = vmul.f32 %v7436_v4, %v7436_v4 }
 0x86b   :  { %v7455_v27 = vsub.f32 %v7312_v19, %v2471_v31  ;;  %v7458_v18 = vsub.f32 %v7318_v42, %v2472_v43  ;;  %v7465_v61 = vsub.f32 %v7362_v23, %v2471_v31  ;;  %v7468_v22 = vsub.f32 %v7372_v13, %v2472_v43 }
 0x86c   :  { %v2494_v40 = vmul.f32 %v7445_v53, %v7445_v53  ;;  %v2496_v26 = vmul.f32 %v7448_v58, %v7448_v58  ;;  %v2497_v24 = vmul.f32 %v7439_v6, %v7439_v6  ;;  %v2499_v42 = vmul.f32 %v7442_v39, %v7442_v39 }
 0x86d   :  { %v2498_v19 = vmul.f32 %v7455_v27, %v7455_v27  ;;  %v2500_v33 = vmul.f32 %v7458_v18, %v7458_v18  ;;  %v7479_v23 = vsub.f32 %v7359_v47, %v2463_v56  ;;  %v7482_v13 = vsub.f32 %v7369_v2, %v2470_v55  ;;  %v3250_v55 = vld [vmem:[%s8445_s19 + $0x80] sm:$0xff] }
 0x86e   :  { %v2525_v54 = vcombine.low %v2493_v7, %v2494_v40  ;;  %v2526_v25 = vcombine.low %v2495_v17, %v2496_v26  ;;  %v2502_v35 = vmul.f32 %v7465_v61, %v7465_v61  ;;  %v2504_v41 = vmul.f32 %v7468_v22, %v7468_v22  ;;  %v3009_v7 = vld [vmem:[%s8444_s18 + $0x80] sm:$0xff]  ;;  %v3010_v17 = vld [vmem:[%s8444_s18 + $0x88] sm:$0xff] }
 0x86f   :  { %v2543_v49 = vcombine.low %v2497_v24, %v2498_v19  ;;  %v2544_v9 = vcombine.low %v2499_v42, %v2500_v33  ;;  %v2501_v2 = vmul.f32 %v7479_v23, %v7479_v23  ;;  %v2503_v21 = vmul.f32 %v7482_v13, %v7482_v13  ;;  %v3234_v40 = vld [vmem:[%s8445_s19] sm:$0xff]  ;;  %v3235_v24 = vld [vmem:[%s8445_s19 + $0x8] sm:$0xff] }
 0x870   :  { %v2533_v59 = vrot.slane %v2525_v54, %v6982_v5  ;;  %v2540_v30 = vrot.slane %v2526_v25, %v6982_v5  ;;  %v7497_v10 = vsub.f32 %v7413_v29, %v2471_v31  ;;  %v7500_v51 = vsub.f32 %v7422_v63, %v2472_v43  ;;  %v3251_v31 = vld [vmem:[%s8445_s19 + $0x88] sm:$0xff]  ;;  %v2993_v19 = vld [vmem:[%s8444_s18] sm:$0xff]  ;;  %v3252_v25 = vld [vmem:[%s8445_s19 + $0x90] sm:$0xff] }
 0x871   :  { %v2551_v15 = vrot.slane %v2543_v49, %v6982_v5  ;;  %v2558_v47 = vrot.slane %v2544_v9, %v6982_v5  ;;  %v2561_v38 = vcombine.low %v2501_v2, %v2502_v35  ;;  %v2562_v12 = vcombine.low %v2503_v21, %v2504_v41  ;;  %v2994_v42 = vld [vmem:[%s8444_s18 + $0x8] sm:$0xff]  ;;  %v3253_v49 = vld [vmem:[%s8445_s19 + $0x98] sm:$0xff]  ;;  %v3011_v9 = vld [vmem:[%s8444_s18 + $0x90] sm:$0xff] }
 0x872   :  { %v2541_v16 = vcombine.low %v2533_v59, %v2540_v30  ;;  %v2542_v20 = vcombine.high %v2533_v59, %v2540_v30  ;;  %v2506_v60 = vmul.f32 %v7497_v10, %v7497_v10  ;;  %v2508_v0 = vmul.f32 %v7500_v51, %v7500_v51  ;;  %v3012_v30 = vld [vmem:[%s8444_s18 + $0x98] sm:$0xff]  ;;  %v3236_v35 = vld [vmem:[%s8445_s19 + $0x10] sm:$0xff]  ;;  %v3254_v2 = vld [vmem:[%s8445_s19 + $0xa0] sm:$0xff] }
 0x873   :  { %v2560_v37 = vcombine.high %v2551_v15, %v2558_v47  ;;  %v2569_v28 = vrot.slane %v2561_v38, %v6982_v5  ;;  %v2576_v29 = vrot.slane %v2562_v12, %v6982_v5  ;;  %v2505_v63 = vmul.f32 %v7503_v14, %v7503_v14  ;;  %v3237_v41 = vld [vmem:[%s8445_s19 + $0x18] sm:$0xff]  ;;  %v3013_v38 = vld [vmem:[%s8444_s18 + $0xa0] sm:$0xff]  ;;  %v3014_v12 = vld [vmem:[%s8444_s18 + $0xa8] sm:$0xff] }
 0x874   :  { %2669 = vmatprep.mubr.f32.mxu0 %v2542_v20  ;;  %v2507_v36 = vmul.f32 %v7506_v44, %v7506_v44  ;;  %v2559_v45 = vcombine.low %v2551_v15, %v2558_v47  ;;  %v5779_v43 = vpack.c.bf16 %v3251_v31, %v3250_v55  ;;  %v5715_v26 = vpack.c.bf16 %v3010_v17, %v3009_v7  ;;  %v2996_v20 = vld [vmem:[%s8444_s18 + $0x18] sm:$0xff]  ;;  %v2999_v31 = vld [vmem:[%s8444_s18 + $0x30] sm:$0xff]  ;;  %v3258_v7 = vld [vmem:[%s8445_s19 + $0xc0] sm:$0xff] }
 0x875   :  { %2670 = vmatmul.mubr.f32.vlgmr.msra.gmra.mrb[8].mxu0 %v2541_v16  ;;  %v2578_v62 = vcombine.high %v2569_v28, %v2576_v29  ;;  %v2579_v50 = vcombine.low %v2505_v63, %v2506_v60  ;;  %v2577_v3 = vcombine.low %v2569_v28, %v2576_v29  ;;  %v5781_v33 = vpack.c.bf16 %v3235_v24, %v3234_v40  ;;  %v2995_v16 = vld [vmem:[%s8444_s18 + $0x10] sm:$0xff]  ;;  %v3238_v60 = vld [vmem:[%s8445_s19 + $0x20] sm:$0xff]  ;;  %v3241_v55 = vld [vmem:[%s8445_s19 + $0x38] sm:$0xff] }
 0x876   :  { %2675 = vmatprep.mubr.f32.mxu0 %v2560_v37  ;;  %v2580_v1 = vcombine.low %v2507_v36, %v2508_v0  ;;  %5780 = vmatprep.subr.bf16.mxu0 %v5779_v43  ;;  %v5717_v54 = vpack.c.bf16 %v2994_v42, %v2993_v19  ;;  %v5783_v59 = vpack.c.bf16 %v3253_v49, %v3252_v25  ;;  %v3255_v37 = vld [vmem:[%s8445_s19 + $0xa8] sm:$0xff]  ;;  %v2997_v63 = vld [vmem:[%s8444_s18 + $0x20] sm:$0xff]  ;;  %v3000_v43 = vld [vmem:[%s8444_s18 + $0x38] sm:$0xff] }
 0x877   :  { %v2587_v34 = vrot.slane %v2579_v50, %v6982_v5  ;;  %5716 = vmatprep.subr.bf16.mxu1 %v5715_v26  ;;  %5782 = vmatpush3.bf16.msra.mxu0 %v5781_v33  ;;  %v5719_v15 = vpack.c.bf16 %v3012_v30, %v3011_v9  ;;  %v5785_v47 = vpack.c.bf16 %v3237_v41, %v3236_v35  ;;  %v3239_v0 = vld [vmem:[%s8445_s19 + $0x28] sm:$0xff]  ;;  %v3017_v40 = vld [vmem:[%s8444_s18 + $0xc0] sm:$0xff]  ;;  %v3261_v30 = vld [vmem:[%s8445_s19 + $0xd8] sm:$0xff] }
 0x878   :  { %v2594_v11 = vrot.slane %v2580_v1, %v6982_v5  ;;  %5718 = vmatpush3.bf16.msra.mxu1 %v5717_v54  ;;  %5784 = vmatprep.subr.bf16.mxu0 %v5783_v59  ;;  %v5721_v21 = vpack.c.bf16 %v2996_v20, %v2995_v16  ;;  %v5787_v28 = vpack.c.bf16 %v3255_v37, %v3254_v2  ;;  %v2998_v36 = vld [vmem:[%s8444_s18 + $0x28] sm:$0xff]  ;;  %v3242_v42 = vld [vmem:[%s8445_s19 + $0x40] sm:$0xff]  ;;  %v3260_v59 = vld [vmem:[%s8445_s19 + $0xd0] sm:$0xff] }
 0x879   :  { %5720 = vmatprep.subr.bf16.mxu1 %v5719_v15  ;;  %v5723_v29 = vpack.c.bf16 %v3014_v12, %v3013_v38  ;;  %v5789_v50 = vpack.c.bf16 %v3239_v0, %v3238_v60  ;;  %v5725_v1 = vpack.c.bf16 %v2998_v36, %v2997_v63  ;;  %v3259_v17 = vld [vmem:[%s8445_s19 + $0xc8] sm:$0xff]  ;;  %v5729_v19 = vpack.c.bf16 %v3000_v43, %v2999_v31  ;;  %v3001_v49 = vld [vmem:[%s8444_s18 + $0x40] sm:$0xff]  ;;  %v3019_v35 = vld [vmem:[%s8444_s18 + $0xd0] sm:$0xff] }
 0x87a   :  { %v2596_v46 = vcombine.high %v2587_v34, %v2594_v11  ;;  %v2595_v56 = vcombine.low %v2587_v34, %v2594_v11  ;;  %v3015_v34 = vld [vmem:[%s8444_s18 + $0xb0] sm:$0xff]  ;;  %v3016_v11 = vld [vmem:[%s8444_s18 + $0xb8] sm:$0xff]  ;;  %v3018_v26 = vld [vmem:[%s8444_s18 + $0xc8] sm:$0xff]  ;;  %v5795_v54 = vpack.c.bf16 %v3259_v17, %v3258_v7  ;;  %v5799_v2 = vpack.c.bf16 %v3261_v30, %v3260_v59 }
 0x87b   :  { %5786 = vmatpush3.bf16.msra.mxu0 %v5785_v47  ;;  %v3243_v33 = vld [vmem:[%s8445_s19 + $0x48] sm:$0xff]  ;;  %v5731_v25 = vpack.c.bf16 %v3018_v26, %v3017_v40  ;;  %v3020_v41 = vld [vmem:[%s8444_s18 + $0xd8] sm:$0xff]  ;;  %v3244_v16 = vld [vmem:[%s8445_s19 + $0x50] sm:$0xff] }
 0x87c   :  { %5722 = vmatpush3.bf16.msra.mxu1 %v5721_v21  ;;  %5788 = vmatprep.subr.bf16.mxu0 %v5787_v28  ;;  %v3002_v9 = vld [vmem:[%s8444_s18 + $0x48] sm:$0xff]  ;;  %v5797_v15 = vpack.c.bf16 %v3243_v33, %v3242_v42  ;;  %v3245_v20 = vld [vmem:[%s8445_s19 + $0x58] sm:$0xff]  ;;  %v5735_v21 = vpack.c.bf16 %v3020_v41, %v3019_v35  ;;  %v3003_v37 = vld [vmem:[%s8444_s18 + $0x50] sm:$0xff] }
 0x87d   :  { %2676 = vmatmul.mubr.f32.gmra.mrb[8].mxu0 %v2559_v45  ;;  %v3256_v45 = vld [vmem:[%s8445_s19 + $0xb0] sm:$0xff]  ;;  %5724 = vmatprep.subr.bf16.mxu1 %v5723_v29  ;;  %v5733_v47 = vpack.c.bf16 %v3002_v9, %v3001_v49  ;;  %v3004_v38 = vld [vmem:[%s8444_s18 + $0x58] sm:$0xff]  ;;  %v3262_v12 = vld [vmem:[%s8445_s19 + $0xe0] sm:$0xff]  ;;  %v5801_v0 = vpack.c.bf16 %v3245_v20, %v3244_v16 }
 0x87e   :  { %2681 = vmatprep.mubr.f32.mxu0 %v2578_v62  ;;  %v3257_v62 = vld [vmem:[%s8445_s19 + $0xb8] sm:$0xff]  ;;  %v3263_v28 = vld [vmem:[%s8445_s19 + $0xe8] sm:$0xff]  ;;  %v3021_v29 = vld [vmem:[%s8444_s18 + $0xe0] sm:$0xff]  ;;  %v5737_v63 = vpack.c.bf16 %v3004_v38, %v3003_v37 }
 0x87f   :  { %5790 = vmatpush3.bf16.msra.mxu0 %v5789_v50  ;;  %v3022_v60 = vld [vmem:[%s8444_s18 + $0xe8] sm:$0xff]  ;;  %v3246_v36 = vld [vmem:[%s8445_s19 + $0x60] sm:$0xff]  ;;  %v3248_v43 = vld [vmem:[%s8445_s19 + $0x70] sm:$0xff] }
 0x880   :  { %5726 = vmatpush3.bf16.msra.mxu1 %v5725_v1  ;;  %v5739_v50 = vpack.c.bf16 %v3022_v60, %v3021_v29  ;;  %v3005_v1 = vld [vmem:[%s8444_s18 + $0x60] sm:$0xff]  ;;  %v3249_v40 = vld [vmem:[%s8445_s19 + $0x78] sm:$0xff]  ;;  %v3007_v26 = vld [vmem:[%s8444_s18 + $0x70] sm:$0xff] }
 0x881   :  { %v3042_v42 = vld [vmem:[%s8444_s18 + $0x188] sm:$0xff]  ;;  %v5809_v33 = vpack.c.bf16 %v3249_v40, %v3248_v43 }
 0x885   :  { %2682 = vmatmul.mubr.f32.gmra.mrb[8].mxu0 %v2577_v3  ;;  %v3240_v3 = vld [vmem:[%s8445_s19 + $0x30] sm:$0xff] }
 0x886   :  { %2687 = vmatprep.mubr.f32.mxu0 %v2596_v46  ;;  %v5791_v46 = vpack.c.bf16 %v3257_v62, %v3256_v45  ;;  %v5793_v24 = vpack.c.bf16 %v3241_v55, %v3240_v3  ;;  %v3247_v45 = vld [vmem:[%s8445_s19 + $0x68] sm:$0xff]  ;;  %v5803_v62 = vpack.c.bf16 %v3263_v28, %v3262_v12  ;;  %v3265_v3 = vld [vmem:[%s8445_s19 + $0xf8] sm:$0xff] }
 0x887   :  { %v5805_v55 = vpack.c.bf16 %v3247_v45, %v3246_v36 }
 0x888   :  { %5792 = vmatprep.subr.bf16.mxu0 %v5791_v46  ;;  %v3023_v46 = vld [vmem:[%s8444_s18 + $0xf0] sm:$0xff] }
 0x889   :  { %5794 = vmatpush3.bf16.msra.mxu0 %v5793_v24  ;;  %v3008_v24 = vld [vmem:[%s8444_s18 + $0x78] sm:$0xff] }
 0x88a   :  { %5796 = vmatprep.subr.bf16.mxu0 %v5795_v54  ;;  %v5745_v54 = vpack.c.bf16 %v3008_v24, %v3007_v26  ;;  %v7739_v26 = vld [vmem:[%s8444_s18 + $0x100] sm:$0xff]  ;;  %v7744_v24 = vld [vmem:[%s8444_s18 + $0x108] sm:$0xff] }
 0x88d   :  { %2688 = vmatmul.mubr.f32.gmra.mrb[8].mxu0 %v2595_v56  ;;  %v5727_v56 = vpack.c.bf16 %v3016_v11, %v3015_v34  ;;  %v3006_v34 = vld [vmem:[%s8444_s18 + $0x68] sm:$0xff]  ;;  %v3264_v11 = vld [vmem:[%s8445_s19 + $0xf0] sm:$0xff] }
 0x88e   :  { %5798 = vmatpush3.bf16.msra.mxu0 %v5797_v15  ;;  %v5741_v31 = vpack.c.bf16 %v3006_v34, %v3005_v1  ;;  %v5807_v7 = vpack.c.bf16 %v3265_v3, %v3264_v11  ;;  %v2714_v34 = vld [vmem:[%s8442_s16] sm:$0x3] }
 0x88f   :  { %5728 = vmatprep.subr.bf16.mxu1 %v5727_v56  ;;  %5800 = vmatprep.subr.bf16.mxu0 %v5799_v2  ;;  %v3024_v56 = vld [vmem:[%s8444_s18 + $0xf8] sm:$0xff] }
 0x890   :  { %5730 = vmatpush3.bf16.msra.mxu1 %v5729_v19  ;;  %v5743_v17 = vpack.c.bf16 %v3024_v56, %v3023_v46  ;;  %v3041_v19 = vld [vmem:[%s8444_s18 + $0x180] sm:$0xff] }
 0x891   :  { %5732 = vmatprep.subr.bf16.mxu1 %v5731_v25  ;;  %v5747_v25 = vpack.c.bf16 %v3042_v42, %v3041_v19 }
 0x892   :  { %5802 = vmatpush3.bf16.msra.mxu0 %v5801_v0 }
 0x893   :  { %5804 = vmatprep.subr.bf16.mxu0 %v5803_v62 }
 0x894   :  { %5734 = vmatpush3.bf16.msra.mxu1 %v5733_v47 }
 0x895   :  { %5736 = vmatprep.subr.bf16.mxu1 %v5735_v21 }
 0x896   :  { %5806 = vmatpush3.bf16.msra.mxu0 %v5805_v55 }
 0x897   :  { %5808 = vmatprep.subr.bf16.mxu0 %v5807_v7 }
 0x898   :  { %5738 = vmatpush3.bf16.msra.mxu1 %v5737_v63  ;;  %v2785_v63 = vld [vmem:[%s8443_s17] sm:$0x3] }
 0x899   :  { %5740 = vmatprep.subr.bf16.mxu1 %v5739_v50  ;;  %v2790_v62 = vrot.slane %v2785_v63, %v6354_v32  ;;  %v2794_v50 = vrot.slane %v2785_v63, %v6974_v48 }
 0x89a   :  { %5810 = vmatpush3.bf16.msra.mxu0 %v5809_v33 }
 0x89b   :  { %v2795_v3 = vcombine.low %v2790_v62, %v2794_v50  ;;  %v2796_v46 = vcombine.high %v2790_v62, %v2794_v50 }
 0x89c   :  { %5742 = vmatpush3.bf16.msra.mxu1 %v5741_v31 }
 0x89d   :  { %5744 = vmatprep.subr.bf16.mxu1 %v5743_v17  ;;  %v7731_v43 = vrot.slane %v2795_v3, %v6982_v5  ;;  %v7734_v7 = vrot.slane %v2796_v46, %v6982_v5 }
 0x89f   :  { %v7750_v42 = vcombine.high %v7731_v43, %v7731_v43  ;;  %v7754_v33 = vcombine.high %v7734_v7, %v7734_v7 }
 0x8a0   :  { %5746 = vmatpush3.bf16.msra.mxu1 %v5745_v54  ;;  %v5749_v54 = vpack.c.bf16 %v7744_v24, %v7739_v26  ;;  %v3030_v26 = vld [vmem:[%s8444_s18 + $0x128] sm:$0xff] }
 0x8a1   :  { %5748 = vmatprep.subr.bf16.mxu1 %v5747_v25 }
 0x960   :  { %v2689_v49 = vpop.f32.mrb[8].mxu0 }
 0x961   :  { %v2697_v9 = vrot.slane %v2689_v49, 4  ;;  %v2691_v59 = vpop.f32.mrb[9].mxu0 }
 0x962   :  { %v2706_v30 = vrot.slane %v2691_v59, 4 }
 0x963   :  { %v2698_v35 = vadd.f32 %v2697_v9, %v2689_v49 }
 0x964   :  { %v2707_v41 = vadd.f32 %v2706_v30, %v2691_v59 }
 0x965   :  { %v2699_v15 = vrot.slane %v2698_v35, 2 }
 0x966   :  { %v2708_v47 = vrot.slane %v2707_v41, 2 }
 0x967   :  { %v2700_v16 = vadd.f32 %v2699_v15, %v2698_v35 }
 0x968   :  { %v2709_v20 = vadd.f32 %v2708_v47, %v2707_v41 }
 0x969   :  { %v2701_v2 = vrot.slane %v2700_v16, 1 }
 0x96a   :  { %v2710_v21 = vrot.slane %v2709_v20, 1 }
 0x96b   :  { %v2702_v37 = vadd.f32 %v2701_v2, %v2700_v16 }
 0x96c   :  { %v2711_v38 = vadd.f32 %v2710_v21, %v2709_v20 }
 0x96d   :  { %v2712_v12 = vmul.f32 0.001953125, %v2702_v37 }
 0x96e   :  { %v2713_v28 = vmul.f32 0.001953125, %v2711_v38 }
 0x96f   :  { %v2715_v29 = vadd.f32 1e-05, %v2712_v12 }
 0x970   :  { %v2716_v60 = vadd.f32 1e-05, %v2713_v28 }
 0x971   :  { %5877 = vrsqrt.f32 %v2715_v29 }
 0x972   :  { %5879 = vrsqrt.f32 %v2716_v60 }
 0x97b   :  { %v5878_v0 = vpop.eup %5877 }
 0x97c   :  { %v5880_v36 = vpop.eup %5879 }
 0x97d   :  { %v2721_v45 = vcombine.low %v5878_v0, %v5880_v36 }
 0x97f   :  { %v2728_v1 = vrot.slane %v2721_v45, %v6979_v57 }
 0x981   :  { %v2735_v11 = vrot.slane %v2728_v1, %v6979_v57 }
 0x983   :  { %v2737_v56 = vmul.f32 %v2735_v11, %v2714_v34 }
 0x985   :  { %v2742_v55 = vrot.slane %v2737_v56, %v6354_v32  ;;  %v2746_v31 = vrot.slane %v2737_v56, %v6974_v48 }
 0x987   :  { %v2747_v17 = vcombine.low %v2742_v55, %v2746_v31  ;;  %v2748_v40 = vcombine.high %v2742_v55, %v2746_v31 }
 0x989   :  { %v2755_v48 = vrot.slane %v2747_v17, %v6982_v5  ;;  %v2762_v19 = vrot.slane %v2748_v40, %v6982_v5 }
 0x98b   :  { %v2763_v25 = vcombine.high %v2755_v48, %v2755_v48  ;;  %v2764_v49 = vcombine.high %v2762_v19, %v2762_v19  ;;  %v2769_v9 = vmul.f32 %v2755_v48, %v7433_v8  ;;  %v2771_v59 = vmul.f32 %v2762_v19, %v7436_v4 }
 0x98c   :  { %v2773_v30 = vmul.f32 %v2755_v48, %v7439_v6  ;;  %v2775_v35 = vmul.f32 %v2762_v19, %v7442_v39  ;;  %v2777_v41 = vmul.f32 %v2755_v48, %v7479_v23  ;;  %v2779_v15 = vmul.f32 %v2762_v19, %v7482_v13 }
 0x98d   :  { %v2770_v47 = vmul.f32 %v2763_v25, %v7445_v53  ;;  %v2772_v16 = vmul.f32 %v2764_v49, %v7448_v58  ;;  %v2817_v20 = vadd.f32 %v7731_v43, %v2769_v9  ;;  %v2819_v2 = vadd.f32 %v7734_v7, %v2771_v59 }
 0x98e   :  { %v2774_v8 = vmul.f32 %v2763_v25, %v7455_v27  ;;  %v2776_v4 = vmul.f32 %v2764_v49, %v7458_v18  ;;  %v2821_v6 = vadd.f32 %v7731_v43, %v2773_v30  ;;  %v2823_v39 = vadd.f32 %v7734_v7, %v2775_v35  ;;  %v3043_v35 = vld [vmem:[%s8444_s18 + $0x190] sm:$0xff] }
 0x98f   :  { %v2818_v23 = vadd.f32 %v7750_v42, %v2770_v47  ;;  %v2820_v13 = vadd.f32 %v7754_v33, %v2772_v16  ;;  %v2833_v21 = vmax.f32 %v2817_v20, 0.0  ;;  %v2835_v53 = vmax.f32 %v2819_v2, 0.0 }
 0x990   :  { %v2822_v58 = vadd.f32 %v7750_v42, %v2774_v8  ;;  %v2824_v37 = vadd.f32 %v7754_v33, %v2776_v4  ;;  %v2837_v38 = vmax.f32 %v2821_v6, 0.0  ;;  %v2839_v12 = vmax.f32 %v2823_v39, 0.0  ;;  %v3027_v4 = vld [vmem:[%s8444_s18 + $0x110] sm:$0xff]  ;;  %v3046_v6 = vld [vmem:[%s8444_s18 + $0x1a8] sm:$0xff] }
 0x991   :  { %v2834_v28 = vmax.f32 %v2818_v23, 0.0  ;;  %v2836_v27 = vmax.f32 %v2820_v13, 0.0  ;;  %v2778_v18 = vmul.f32 %v2763_v25, %v7465_v61  ;;  %v2780_v29 = vmul.f32 %v2764_v49, %v7468_v22 }
 0x992   :  { %v2838_v60 = vmax.f32 %v2822_v58, 0.0  ;;  %v2840_v0 = vmax.f32 %v2824_v37, 0.0  ;;  %v2825_v63 = vadd.f32 %v7731_v43, %v2777_v41  ;;  %v2827_v36 = vadd.f32 %v7734_v7, %v2779_v15  ;;  %v3044_v41 = vld [vmem:[%s8444_s18 + $0x198] sm:$0xff] }
 0x993   :  { %v2865_v45 = vcombine.low %v2833_v21, %v2834_v28  ;;  %v2866_v62 = vcombine.low %v2835_v53, %v2836_v27  ;;  %v2826_v50 = vadd.f32 %v7750_v42, %v2778_v18  ;;  %v2828_v1 = vadd.f32 %v7754_v33, %v2780_v29  ;;  %v3029_v18 = vld [vmem:[%s8444_s18 + $0x120] sm:$0xff] }
 0x994   :  { %v2883_v34 = vcombine.low %v2837_v38, %v2838_v60  ;;  %v2884_v11 = vcombine.low %v2839_v12, %v2840_v0  ;;  %v2841_v3 = vmax.f32 %v2825_v63, 0.0  ;;  %v2843_v46 = vmax.f32 %v2827_v36, 0.0  ;;  %v3047_v0 = vld [vmem:[%s8444_s18 + $0x1b0] sm:$0xff]  ;;  %v3048_v63 = vld [vmem:[%s8444_s18 + $0x1b8] sm:$0xff] }
 0x995   :  { %v2873_v61 = vrot.slane %v2865_v45, %v6982_v5  ;;  %v2880_v22 = vrot.slane %v2866_v62, %v6982_v5  ;;  %v2842_v56 = vmax.f32 %v2826_v50, 0.0  ;;  %v2844_v55 = vmax.f32 %v2828_v1, 0.0  ;;  %v3031_v1 = vld [vmem:[%s8444_s18 + $0x130] sm:$0xff] }
 0x996   :  { %v2891_v31 = vrot.slane %v2883_v34, %v6982_v5  ;;  %v2898_v17 = vrot.slane %v2884_v11, %v6982_v5  ;;  %v2781_v40 = vmul.f32 %v2755_v48, %v7503_v14  ;;  %v2782_v9 = vmul.f32 %v2763_v25, %v7497_v10 }
 0x997   :  { %v7788_v59 = vcombine.low %v2873_v61, %v2880_v22  ;;  %v7790_v30 = vcombine.high %v2873_v61, %v2880_v22  ;;  %v2901_v15 = vcombine.low %v2841_v3, %v2842_v56  ;;  %v2902_v47 = vcombine.low %v2843_v46, %v2844_v55  ;;  %v3032_v46 = vld [vmem:[%s8444_s18 + $0x138] sm:$0xff]  ;;  %v3049_v61 = vld [vmem:[%s8444_s18 + $0x1c0] sm:$0xff]  ;;  %v3050_v22 = vld [vmem:[%s8444_s18 + $0x1c8] sm:$0xff] }
 0x998   :  { %v7798_v16 = vcombine.high %v2891_v31, %v2898_v17  ;;  %v7800_v20 = vcombine.low %v2891_v31, %v2898_v17  ;;  %v2783_v10 = vmul.f32 %v2762_v19, %v7506_v44  ;;  %v2784_v14 = vmul.f32 %v2764_v49, %v7500_v51  ;;  %v3028_v44 = vld [vmem:[%s8444_s18 + $0x118] sm:$0xff]  ;;  %v3045_v49 = vld [vmem:[%s8444_s18 + $0x1a0] sm:$0xff] }
 0x999   :  { %3362 = vmatprep.mubr.f32.mxu0 %v7790_v30  ;;  %v2938_v48 = vrot.slane %v7790_v30, 7  ;;  %v2937_v25 = vrot.slane %v7788_v59, 7  ;;  %v2909_v2 = vrot.slane %v2901_v15, %v6982_v5  ;;  %v2916_v8 = vrot.slane %v2902_v47, %v6982_v5  ;;  %v3034_v15 = vld [vmem:[%s8444_s18 + $0x148] sm:$0xff] }
 0x99a   :  { %3363 = vmatmul.mubr.f32.vlgmr.msra.gmra.mrb[10].mxu0 %v7788_v59  ;;  %v2941_v51 = vrot.slane %v7798_v16, 7  ;;  %v5751_v19 = vpack.c.bf16 %v3044_v41, %v3043_v35  ;;  %v2829_v39 = vadd.f32 %v7731_v43, %v2781_v40  ;;  %v2830_v23 = vadd.f32 %v7750_v42, %v2782_v9 }
 0x99b   :  { %4422 = vmatprep.mubr.msk.f32.mxu1 %vm6315_vm1, %v2938_v48  ;;  %3367 = vmatprep.mubr.f32.mxu0 %v7798_v16  ;;  %v7828_v13 = vcombine.high %v2909_v2, %v2916_v8  ;;  %v2939_v21 = vrot.slane %v7800_v20, 7  ;;  %v2831_v53 = vadd.f32 %v7734_v7, %v2783_v10  ;;  %v5753_v37 = vpack.c.bf16 %v3028_v44, %v3027_v4 }
 0x99c   :  { %4424 = vmatmul.mubr.msk.f32.vlgmr.msra.gmra.mrb[14].mxu1 %vm6315_vm1, %v2937_v25  ;;  %v2942_v58 = vsel %vm147_vm0, %v2938_v48, %v2941_v51  ;;  %v2832_v43 = vadd.f32 %v7754_v33, %v2784_v14  ;;  %v7839_v42 = vcombine.low %v2909_v2, %v2916_v8  ;;  %v5755_v38 = vpack.c.bf16 %v3046_v6, %v3045_v49  ;;  %v3051_v14 = vld [vmem:[%s8444_s18 + $0x1d0] sm:$0xff]  ;;  %v3052_v48 = vld [vmem:[%s8444_s18 + $0x1d8] sm:$0xff]  ;;  %v3053_v6 = vld [vmem:[%s8444_s18 + $0x1e0] sm:$0xff] }
 0x99d   :  { %5750 = vmatpush3.bf16.msra.mxu1 %v5749_v54  ;;  %3133 = vmatprep.mubr.f32.mxu1 %v2942_v58  ;;  %v2845_v12 = vmax.f32 %v2829_v39, 0.0  ;;  %v2846_v28 = vmax.f32 %v2830_v23, 0.0  ;;  %v2847_v7 = vmax.f32 %v2831_v53, 0.0  ;;  %v2961_v24 = vrot.slane %v7788_v59, 1  ;;  %v3036_v49 = vld [vmem:[%s8444_s18 + $0x158] sm:$0xff]  ;;  %v3054_v39 = vld [vmem:[%s8444_s18 + $0x1e8] sm:$0xff] }
 0x99e   :  { %3368 = vmatmul.mubr.f32.gmra.mrb[12].mxu0 %v7800_v20  ;;  %5752 = vmatprep.subr.bf16.mxu1 %v5751_v19  ;;  %v2848_v27 = vmax.f32 %v2832_v43, 0.0  ;;  %v2962_v33 = vrot.slane %v7800_v20, 1  ;;  %v2940_v54 = vsel %vm147_vm0, %v2937_v25, %v2939_v21  ;;  %v2944_v29 = vrot.slane %v7828_v13, 7  ;;  %v3035_v19 = vld [vmem:[%s8444_s18 + $0x150] sm:$0xff]  ;;  %v3037_v53 = vld [vmem:[%s8444_s18 + $0x160] sm:$0xff]  ;;  %v3038_v58 = vld [vmem:[%s8444_s18 + $0x168] sm:$0xff] }
 0x99f   :  { %3372 = vmatprep.mubr.f32.mxu0 %v7828_v13  ;;  %v2919_v60 = vcombine.low %v2845_v12, %v2846_v28  ;;  %v5757_v50 = vpack.c.bf16 %v3030_v26, %v3029_v18  ;;  %v2943_v11 = vrot.slane %v7839_v42, 7  ;;  %v5759_v3 = vpack.c.bf16 %v3048_v63, %v3047_v0  ;;  %v3056_v43 = vld [vmem:[%s8444_s18 + $0x1f8] sm:$0xff]  ;;  %v3039_v28 = vld [vmem:[%s8444_s18 + $0x170] sm:$0xff]  ;;  %v3283_v18 = vld [vmem:[%s8445_s19 + $0x188] sm:$0xff] }
 0x9a0   :  { %3134 = vmatmul.mubr.f32.gmra.mrb[16].mxu1 %v2940_v54  ;;  %v2920_v36 = vcombine.low %v2847_v7, %v2848_v27  ;;  %v7862_v45 = vsel %vm154_vm2, %v2961_v24, %v2962_v33  ;;  %v2970_v31 = vrot.slane %v7828_v13, 1  ;;  %v2967_v17 = vrot.slane %v7839_v42, 1  ;;  %v3040_v7 = vld [vmem:[%s8444_s18 + $0x178] sm:$0xff]  ;;  %v3282_v27 = vld [vmem:[%s8445_s19 + $0x180] sm:$0xff] }
 0x9a1   :  { %5754 = vmatpush3.bf16.msra.mxu1 %v5753_v37  ;;  %4426 = vmatprep.mubr.msk.f32.mxu1 %vm6315_vm1, %v2944_v29  ;;  %v2927_v62 = vrot.slane %v2919_v60, %v6982_v5  ;;  %v5761_v40 = vpack.c.bf16 %v3032_v46, %v3031_v1  ;;  %v5763_v9 = vpack.c.bf16 %v3050_v22, %v3049_v61  ;;  %v3055_v37 = vld [vmem:[%s8444_s18 + $0x1f0] sm:$0xff]  ;;  %v3266_v54 = vld [vmem:[%s8445_s19 + $0x100] sm:$0xff]  ;;  %v3285_v0 = vld [vmem:[%s8445_s19 + $0x198] sm:$0xff] }
 0x9a2   :  { %3373 = vmatmul.mubr.f32.gmra.mrb[14].mxu0 %v7839_v42  ;;  %5756 = vmatprep.subr.bf16.mxu1 %v5755_v38  ;;  %v2934_v34 = vrot.slane %v2920_v36, %v6982_v5  ;;  %v5765_v44 = vpack.c.bf16 %v3034_v15, %v3033_v52  ;;  %v5767_v51 = vpack.c.bf16 %v3052_v48, %v3051_v14  ;;  %v3284_v60 = vld [vmem:[%s8445_s19 + $0x190] sm:$0xff]  ;;  %v3286_v1 = vld [vmem:[%s8445_s19 + $0x1a0] sm:$0xff]  ;;  %v3271_v61 = vld [vmem:[%s8445_s19 + $0x128] sm:$0xff]  ;;  %v2965_v52 = vrot.slane %v7798_v16, 1 }
 0x9a3   :  { %v5769_v23 = vpack.c.bf16 %v3036_v49, %v3035_v19  ;;  %v5771_v21 = vpack.c.bf16 %v3054_v39, %v3053_v6  ;;  %v5773_v38 = vpack.c.bf16 %v3038_v58, %v3037_v53  ;;  %v5775_v12 = vpack.c.bf16 %v3056_v43, %v3055_v37  ;;  %v3270_v46 = vld [vmem:[%s8445_s19 + $0x120] sm:$0xff]  ;;  %v3288_v22 = vld [vmem:[%s8445_s19 + $0x1b0] sm:$0xff]  ;;  %v3277_v19 = vld [vmem:[%s8445_s19 + $0x158] sm:$0xff] }
 0x9a4   :  { %v7882_v56 = vcombine.high %v2927_v62, %v2934_v34  ;;  %4428 = vmatmul.mubr.msk.f32.gmra.mrb[18].mxu1 %vm6315_vm1, %v2943_v11  ;;  %v7886_v55 = vcombine.low %v2927_v62, %v2934_v34  ;;  %v5777_v26 = vpack.c.bf16 %v3040_v7, %v3039_v28  ;;  %v5811_v24 = vpack.c.bf16 %v3283_v18, %v3282_v27  ;;  %v3268_v62 = vld [vmem:[%s8445_s19 + $0x110] sm:$0xff]  ;;  %v3287_v34 = vld [vmem:[%s8445_s19 + $0x1a8] sm:$0xff]  ;;  %v3274_v48 = vld [vmem:[%s8445_s19 + $0x140] sm:$0xff] }
 0x9a5   :  { %5758 = vmatpush3.bf16.msra.mxu1 %v5757_v50  ;;  %v5815_v36 = vpack.c.bf16 %v3285_v0, %v3284_v60  ;;  %v3269_v50 = vld [vmem:[%s8445_s19 + $0x118] sm:$0xff]  ;;  %v3294_v49 = vld [vmem:[%s8445_s19 + $0x1e0] sm:$0xff]  ;;  %v3295_v6 = vld [vmem:[%s8445_s19 + $0x1e8] sm:$0xff] }
 0x9a6   :  { %3377 = vmatprep.mubr.f32.mxu0 %v7882_v56  ;;  %v2947_v35 = vrot.slane %v7882_v56, 7  ;;  %5760 = vmatprep.subr.bf16.mxu1 %v5759_v3  ;;  %v2945_v41 = vrot.slane %v7886_v55, 7  ;;  %v2971_v47 = vrot.slane %v7882_v56, 1  ;;  %v2968_v10 = vrot.slane %v7886_v55, 1  ;;  %v3279_v53 = vld [vmem:[%s8445_s19 + $0x168] sm:$0xff]  ;;  %v3296_v58 = vld [vmem:[%s8445_s19 + $0x1f0] sm:$0xff] }
 0x9a7   :  { %3378 = vmatmul.mubr.f32.gmra.mrb[16].mxu0 %v7886_v55  ;;  %v5819_v3 = vpack.c.bf16 %v3287_v34, %v3286_v1  ;;  %v3297_v37 = vld [vmem:[%s8445_s19 + $0x1f8] sm:$0xff] }
 0x9a8   :  { %v2948_v25 = vsel %vm147_vm0, %v2944_v29, %v2947_v35  ;;  %v7912_v2 = vsel %vm154_vm2, %v2970_v31, %v2971_v47  ;;  %v7917_v8 = vsel %vm154_vm2, %v2967_v17, %v2968_v10  ;;  %v2946_v4 = vsel %vm147_vm0, %v2943_v11, %v2945_v41  ;;  %v3267_v29 = vld [vmem:[%s8445_s19 + $0x108] sm:$0xff]  ;;  %v3290_v35 = vld [vmem:[%s8445_s19 + $0x1c0] sm:$0xff]  ;;  %v3281_v28 = vld [vmem:[%s8445_s19 + $0x178] sm:$0xff] }
 0x9a9   :  { %3143 = vmatprep.mubr.f32.mxu1 %v2948_v25  ;;  %5762 = vmatpush3.bf16.msra.mxu1 %v5761_v40  ;;  %v5813_v63 = vpack.c.bf16 %v3267_v29, %v3266_v54  ;;  %v5817_v11 = vpack.c.bf16 %v3269_v50, %v3268_v62  ;;  %v5821_v31 = vpack.c.bf16 %v3271_v61, %v3270_v46  ;;  %v3272_v40 = vld [vmem:[%s8445_s19 + $0x130] sm:$0xff]  ;;  %v2964_v41 = vrot.slane %v7790_v30, 1  ;;  %v3275_v25 = vld [vmem:[%s8445_s19 + $0x148] sm:$0xff]  ;;  %v4420_v46 = vld [vmem:[%s8489_s21] ss:$0 sm:$0xff] }
 0x9aa   :  { %3144 = vmatmul.mubr.f32.gmra.mrb[20].mxu1 %v2946_v4  ;;  %5764 = vmatprep.subr.bf16.mxu1 %v5763_v9  ;;  %v3273_v9 = vld [vmem:[%s8445_s19 + $0x138] sm:$0xff]  ;;  %v5829_v4 = vpack.c.bf16 %v3275_v25, %v3274_v48 }
 0x9ab   :  { %3213 = vmatprep.mubr.f32.mxu1 %v7790_v30  ;;  %v5825_v15 = vpack.c.bf16 %v3273_v9, %v3272_v40  ;;  %v3292_v30 = vld [vmem:[%s8445_s19 + $0x1d0] sm:$0xff] }
 0x9ad   :  { %5766 = vmatpush3.bf16.msra.mxu1 %v5765_v44 }
 0x9ae   :  { %5768 = vmatprep.subr.bf16.mxu1 %v5767_v51  ;;  %v3276_v51 = vld [vmem:[%s8445_s19 + $0x150] sm:$0xff] }
 0x9af   :  { %v5833_v39 = vpack.c.bf16 %v3277_v19, %v3276_v51 }
 0x9b1   :  { %5770 = vmatpush3.bf16.msra.mxu1 %v5769_v23  ;;  %v5835_v23 = vpack.c.bf16 %v3295_v6, %v3294_v49 }
 0x9b2   :  { %5772 = vmatprep.subr.bf16.mxu1 %v5771_v21  ;;  %v3278_v21 = vld [vmem:[%s8445_s19 + $0x160] sm:$0xff] }
 0x9b3   :  { %v5837_v43 = vpack.c.bf16 %v3279_v53, %v3278_v21 }
 0x9b5   :  { %5774 = vmatpush3.bf16.msra.mxu1 %v5773_v38  ;;  %v5839_v38 = vpack.c.bf16 %v3297_v37, %v3296_v58 }
 0x9b6   :  { %5776 = vmatprep.subr.bf16.mxu1 %v5775_v12  ;;  %v3280_v12 = vld [vmem:[%s8445_s19 + $0x170] sm:$0xff] }
 0x9b7   :  { %v5841_v7 = vpack.c.bf16 %v3281_v28, %v3280_v12 }
 0x9b9   :  { %5778 = vmatpush3.bf16.msra.mxu1 %v5777_v26 }
 0x9ba   :  { %5812 = vmatprep.subr.bf16.mxu1 %v5811_v24 }
 0x9bc   :  { %3214 = vmatmul.mubr.f32.vlgmr.msra.gmra.mrb[22].mxu1 %v7788_v59  ;;  %v3289_v59 = vld [vmem:[%s8445_s19 + $0x1b8] sm:$0xff] }
 0x9bd   :  { %3218 = vmatprep.mubr.f32.mxu1 %v7798_v16  ;;  %5814 = vmatpush3.bf16.msra.mxu1 %v5813_v63  ;;  %v5823_v17 = vpack.c.bf16 %v3289_v59, %v3288_v22  ;;  %v3293_v16 = vld [vmem:[%s8445_s19 + $0x1d8] sm:$0xff] }
 0x9be   :  { %5816 = vmatprep.subr.bf16.mxu1 %v5815_v36  ;;  %v5831_v44 = vpack.c.bf16 %v3293_v16, %v3292_v30 }
 0x9c0   :  { %3219 = vmatmul.mubr.f32.gmra.mrb[24].mxu1 %v7800_v20 }
 0x9c1   :  { %3223 = vmatprep.mubr.f32.mxu1 %v7828_v13  ;;  %5818 = vmatpush3.bf16.msra.mxu1 %v5817_v11  ;;  %v3291_v13 = vld [vmem:[%s8445_s19 + $0x1c8] sm:$0xff] }
 0x9c2   :  { %5820 = vmatprep.subr.bf16.mxu1 %v5819_v3  ;;  %v5827_v14 = vpack.c.bf16 %v3291_v13, %v3290_v35 }
 0x9c4   :  { %3224 = vmatmul.mubr.f32.gmra.mrb[26].mxu1 %v7839_v42  ;;  %v2966_v42 = vsel %vm154_vm2, %v2964_v41, %v2965_v52 }
 0x9c5   :  { %3228 = vmatprep.mubr.f32.mxu1 %v7882_v56  ;;  %5822 = vmatpush3.bf16.msra.mxu1 %v5821_v31 }
 0x9c6   :  { %5824 = vmatprep.subr.bf16.mxu1 %v5823_v17 }
 0x9c8   :  { %3229 = vmatmul.mubr.f32.gmra.mrb[28].mxu1 %v7886_v55 }
 0x9c9   :  { %5826 = vmatpush3.bf16.msra.mxu1 %v5825_v15  ;;  %3447 = vmatprep.mubr.f32.mxu1 %v2966_v42 }
 0x9ca   :  { %5828 = vmatprep.subr.bf16.mxu1 %v5827_v14 }
 0x9cd   :  { %5830 = vmatpush3.bf16.msra.mxu1 %v5829_v4 }
 0x9ce   :  { %5832 = vmatprep.subr.bf16.mxu1 %v5831_v44 }
 0x9d1   :  { %5834 = vmatpush3.bf16.msra.mxu1 %v5833_v39 }
 0x9d2   :  { %5836 = vmatprep.subr.bf16.mxu1 %v5835_v23 }
 0x9d5   :  { %5838 = vmatpush3.bf16.msra.mxu1 %v5837_v43 }
 0x9d6   :  { %5840 = vmatprep.subr.bf16.mxu1 %v5839_v38 }
 0x9d9   :  { %5842 = vmatpush3.bf16.msra.mxu1 %v5841_v7 }
 0x9dc   :  { %3448 = vmatmul.mubr.f32.vlgmr.msra.gmra.mrb[30].mxu1 %v7862_v45 }
 0x9dd   :  { %4429 = vmatprep.mubr.msk.f32.mxu1 %vm154_vm2, %v2965_v52 }
 0x9e0   :  { %4430 = vmatmul.mubr.msk.f32.gmra.mrb[32].mxu1 %vm154_vm2, %v2962_v33 }
 0x9e1   :  { %3457 = vmatprep.mubr.f32.mxu1 %v7912_v2 }
 0x9e4   :  { %3458 = vmatmul.mubr.f32.gmra.mrb[34].mxu1 %v7917_v8 }
 0x9e5   :  { %4431 = vmatprep.mubr.msk.f32.mxu1 %vm154_vm2, %v2971_v47 }
 0x9e8   :  { %4432 = vmatmul.mubr.msk.f32.gmra.mrb[36].mxu1 %vm154_vm2, %v2968_v10 }
 0xa6d   :  { %v4733_v27 = vpop.f32.mrb[10].mxu0 }
 0xa6e   :  { %v4734_v45 = vpop.f32.mrb[11].mxu0 }
 0xa6f   :  { %v4735_v18 = vadd.f32 %v4734_v45, %v4733_v27  ;;  %v4645_v26 = vpop.f32.mrb[14].mxu1 }
 0xa70   :  { %v4646_v24 = vpop.f32.mrb[15].mxu1 }
 0xa71   :  { %v4647_v20 = vadd.f32 %v4646_v24, %v4645_v26  ;;  %v4736_v54 = vpop.f32.mrb[12].mxu0  ;;  %v3365_v12 = vadd.f32 %v4735_v18, %v4420_v46 }
 0xa72   :  { %v4737_v33 = vpop.f32.mrb[13].mxu0 }
 0xa73   :  { %v4738_v29 = vadd.f32 %v4737_v33, %v4736_v54  ;;  %v4648_v2 = vpop.f32.mrb[16].mxu1  ;;  %v3131_v22 = vadd.f32 %v4647_v20, %v4420_v46 }
 0xa74   :  { %v4649_v60 = vpop.f32.mrb[17].mxu1 }
 0xa75   :  { %v4650_v8 = vadd.f32 %v4649_v60, %v4648_v2  ;;  %v4739_v0 = vpop.f32.mrb[14].mxu0  ;;  %v3370_v45 = vadd.f32 %v4738_v29, %v4420_v46 }
 0xa76   :  { %v4740_v56 = vpop.f32.mrb[15].mxu0 }
 0xa77   :  { %v4741_v63 = vadd.f32 %v4740_v56, %v4739_v0  ;;  %v4651_v47 = vpop.f32.mrb[18].mxu1  ;;  %v3136_v9 = vadd.f32 %v4650_v8, %v4420_v46 }
 0xa78   :  { %v4652_v36 = vpop.f32.mrb[19].mxu1 }
 0xa79   :  { %v4653_v55 = vadd.f32 %v4652_v36, %v4651_v47  ;;  %v8088_v26 = vadd.f32 %v4741_v63, %v4420_v46 }
 0xa7a   :  { %v4742_v62 = vpop.f32.mrb[16].mxu0 }
 0xa7b   :  { %v4743_v10 = vpop.f32.mrb[17].mxu0  ;;  %v3141_v15 = vadd.f32 %v4653_v55, %v4420_v46 }
 0xa7c   :  { %v4744_v50 = vadd.f32 %v4743_v10, %v4742_v62 }
 0xa7d   :  { %v4654_v1 = vpop.f32.mrb[20].mxu1 }
 0xa7e   :  { %v4655_v34 = vpop.f32.mrb[21].mxu1  ;;  %v8090_v54 = vadd.f32 %v4744_v50, %v4420_v46 }
 0xa7f   :  { %v4656_v11 = vadd.f32 %v4655_v34, %v4654_v1 }
 0xa81   :  { %v3146_v16 = vadd.f32 %v4656_v11, %v4420_v46 }
 0xa8f   :  { %v4689_v3 = vpop.f32.mrb[22].mxu1 }
 0xa90   :  { %v4690_v61 = vpop.f32.mrb[23].mxu1 }
 0xa91   :  { %v4691_v59 = vadd.f32 %v4690_v61, %v4689_v3 }
 0xa93   :  { %v3216_v31 = vadd.f32 %v4691_v59, %v3131_v22  ;;  %v4692_v17 = vpop.f32.mrb[24].mxu1 }
 0xa94   :  { %v4693_v40 = vpop.f32.mrb[25].mxu1 }
 0xa95   :  { %v4694_v35 = vadd.f32 %v4693_v40, %v4692_v17  ;;  %v3472_v44 = vcombine.high %v3216_v31, %v3216_v31  ;;  %v3479_v51 = vrot.slane %v3216_v31, %v6979_v57 }
 0xa97   :  { %v3221_v13 = vadd.f32 %v4694_v35, %v3136_v9  ;;  %v4695_v41 = vpop.f32.mrb[26].mxu1  ;;  %v3486_v49 = vrot.slane %v3472_v44, %v6979_v57  ;;  %v3487_v23 = vcombine.high %v3479_v51, %v3479_v51  ;;  %v8079_v37 = vrot.slane %v3479_v51, %v6979_v57 }
 0xa98   :  { %v4696_v52 = vpop.f32.mrb[27].mxu1 }
 0xa99   :  { %v4697_v14 = vadd.f32 %v4696_v52, %v4695_v41  ;;  %v3521_v19 = vcombine.high %v3221_v13, %v3221_v13  ;;  %v3528_v6 = vrot.slane %v3221_v13, %v6979_v57  ;;  %v3488_v58 = vcombine.high %v3486_v49, %v3486_v49 }
 0xa9a   :  { %v8083_v28 = vrot.slane %v3486_v49, %v6979_v57  ;;  %v8086_v7 = vrot.slane %v3487_v23, %v6979_v57  ;;  %v3517_v8 = vcombine.high %v8079_v37, %v8079_v37 }
 0xa9b   :  { %v4698_v48 = vpop.f32.mrb[28].mxu1  ;;  %v3226_v25 = vadd.f32 %v4697_v14, %v3141_v15  ;;  %v3535_v21 = vrot.slane %v3521_v19, %v6979_v57  ;;  %v3536_v43 = vcombine.high %v3528_v6, %v3528_v6  ;;  %v8093_v33 = vrot.slane %v3488_v58, %v6979_v57 }
 0xa9c   :  { %v4699_v30 = vpop.f32.mrb[29].mxu1  ;;  %v8096_v2 = vrot.slane %v3528_v6, %v6979_v57  ;;  %v3518_v47 = vcombine.high %v8083_v28, %v8083_v28  ;;  %v3519_v36 = vcombine.high %v8086_v7, %v8086_v7 }
 0xa9d   :  { %v4700_v42 = vadd.f32 %v4699_v30, %v4698_v48  ;;  %v3570_v39 = vcombine.high %v3226_v25, %v3226_v25  ;;  %v3577_v53 = vrot.slane %v3226_v25, %v6979_v57  ;;  %v3537_v27 = vcombine.high %v3535_v21, %v3535_v21 }
 0xa9e   :  { %v8099_v18 = vrot.slane %v3535_v21, %v6979_v57  ;;  %v8104_v29 = vrot.slane %v3536_v43, %v6979_v57  ;;  %v3520_v11 = vcombine.high %v8093_v33, %v8093_v33  ;;  %v3566_v3 = vcombine.high %v8096_v2, %v8096_v2 }
 0xa9f   :  { %v3231_v4 = vadd.f32 %v4700_v42, %v3146_v16  ;;  %v3584_v38 = vrot.slane %v3570_v39, %v6979_v57  ;;  %v3585_v24 = vcombine.high %v3577_v53, %v3577_v53  ;;  %v8112_v55 = vrot.slane %v3537_v27, %v6979_v57 }
 0xaa0   :  { %v8115_v10 = vrot.slane %v3577_v53, %v6979_v57  ;;  %v3567_v46 = vcombine.high %v8099_v18, %v8099_v18  ;;  %v3568_v59 = vcombine.high %v8104_v29, %v8104_v29 }
 0xaa1   :  { %v3619_v20 = vcombine.high %v3231_v4, %v3231_v4  ;;  %v3586_v0 = vcombine.high %v3584_v38, %v3584_v38  ;;  %v3626_v56 = vrot.slane %v3231_v4, %v6979_v57  ;;  %v8118_v50 = vrot.slane %v3584_v38, %v6979_v57 }
 0xaa2   :  { %v8121_v1 = vrot.slane %v3585_v24, %v6979_v57  ;;  %v3569_v35 = vcombine.high %v8112_v55, %v8112_v55  ;;  %v3615_v15 = vcombine.high %v8115_v10, %v8115_v10 }
 0xaa3   :  { %v3633_v34 = vrot.slane %v3619_v20, %v6979_v57  ;;  %v8133_v31 = vrot.slane %v3586_v0, %v6979_v57  ;;  %v3634_v17 = vcombine.high %v3626_v56, %v3626_v56  ;;  %v8136_v40 = vrot.slane %v3626_v56, %v6979_v57 }
 0xaa4   :  { %v3616_v14 = vcombine.high %v8118_v50, %v8118_v50  ;;  %v3617_v48 = vcombine.high %v8121_v1, %v8121_v1 }
 0xaa5   :  { %v3635_v25 = vcombine.high %v3633_v34, %v3633_v34  ;;  %v3618_v51 = vcombine.high %v8133_v31, %v8133_v31  ;;  %v8152_v19 = vrot.slane %v3633_v34, %v6979_v57  ;;  %v8155_v49 = vrot.slane %v3634_v17, %v6979_v57 }
 0xaa6   :  { %v3664_v6 = vcombine.high %v8136_v40, %v8136_v40 }
 0xaaf   :  { %v4777_v60 = vpop.f32.mrb[30].mxu1 }
 0xab0   :  { %v4778_v63 = vpop.f32.mrb[31].mxu1 }
 0xab1   :  { %v4779_v62 = vadd.f32 %v4778_v63, %v4777_v60 }
 0xab3   :  { %v3450_v61 = vadd.f32 %v4779_v62, %v3365_v12  ;;  %v4780_v22 = vpop.f32.mrb[32].mxu1 }
 0xab4   :  { %v4781_v9 = vpop.f32.mrb[33].mxu1 }
 0xab5   :  { %v3704_v13 = vcombine.high %v3450_v61, %v3450_v61  ;;  %v3711_v41 = vrot.slane %v3450_v61, %v6979_v57  ;;  %v4782_v52 = vadd.f32 %v4781_v9, %v4780_v22 }
 0xab7   :  { %v3718_v30 = vrot.slane %v3704_v13, %v6979_v57  ;;  %v3719_v16 = vcombine.high %v3711_v41, %v3711_v41  ;;  %v3727_v42 = vrot.slane %v3711_v41, %v6979_v57  ;;  %v3455_v4 = vadd.f32 %v4782_v52, %v3370_v45  ;;  %v4783_v44 = vpop.f32.mrb[34].mxu1 }
 0xab8   :  { %v4784_v39 = vpop.f32.mrb[35].mxu1  ;;  %v8174_v41 = vrot.slane %v3635_v25, %v6979_v57 }
 0xab9   :  { %v3720_v23 = vcombine.high %v3718_v30, %v3718_v30  ;;  %v3734_v21 = vrot.slane %v3718_v30, %v6979_v57  ;;  %v3741_v53 = vrot.slane %v3719_v16, %v6979_v57  ;;  %v3749_v58 = vcombine.high %v3727_v42, %v3727_v42 }
 0xaba   :  { %v3903_v43 = vrot.slane %v3727_v42, %v6354_v32  ;;  %v3753_v38 = vcombine.high %v3455_v4, %v3455_v4  ;;  %v3760_v12 = vrot.slane %v3455_v4, %v6979_v57  ;;  %v4785_v27 = vadd.f32 %v4784_v39, %v4783_v44 }
 0xabb   :  { %v3748_v45 = vrot.slane %v3720_v23, %v6979_v57  ;;  %v3750_v24 = vcombine.high %v3734_v21, %v3734_v21  ;;  %v3751_v20 = vcombine.high %v3741_v53, %v3741_v53  ;;  %v3907_v60 = vrot.slane %v3741_v53, %v6354_v32  ;;  %v4786_v0 = vpop.f32.mrb[36].mxu1 }
 0xabc   :  { %v3911_v56 = vrot.slane %v3749_v58, %v6354_v32  ;;  %v3919_v63 = vrot.slane %v3734_v21, %v6354_v32  ;;  %v4060_v62 = vsel %vm147_vm0, %v8079_v37, %v3903_v43  ;;  %v3767_v34 = vrot.slane %v3753_v38, %v6979_v57  ;;  %v4787_v61 = vpop.f32.mrb[37].mxu1 }
 0xabd   :  { %v3752_v22 = vcombine.high %v3748_v45, %v3748_v45  ;;  %v3915_v17 = vrot.slane %v3751_v20, %v6354_v32  ;;  %v3923_v9 = vrot.slane %v3748_v45, %v6354_v32  ;;  %v3927_v13 = vrot.slane %v3750_v24, %v6354_v32 }
 0xabe   :  { %v4061_v52 = vsel %vm147_vm0, %v8086_v7, %v3907_v60  ;;  %v4062_v30 = vsel %vm147_vm0, %v3517_v8, %v3911_v56  ;;  %v4064_v16 = vsel %vm147_vm0, %v8083_v28, %v3919_v63  ;;  %v3768_v8 = vcombine.high %v3760_v12, %v3760_v12 }
 0xabf   :  { %v3931_v42 = vrot.slane %v3752_v22, %v6354_v32  ;;  %v4063_v4 = vsel %vm147_vm0, %v3519_v36, %v3915_v17  ;;  %v4065_v25 = vsel %vm147_vm0, %v8093_v33, %v3923_v9  ;;  %v4066_v37 = vsel %vm147_vm0, %v3518_v47, %v3927_v13 }
 0xac0   :  { %5881 = vtanh.f32 %v4061_v52  ;;  %v3769_v44 = vcombine.high %v3767_v34, %v3767_v34  ;;  %v3776_v39 = vrot.slane %v3760_v12, %v6979_v57  ;;  %v3783_v36 = vrot.slane %v3767_v34, %v6979_v57 }
 0xac1   :  { %v8200_v7 = vsel %vm147_vm0, %v3520_v11, %v3931_v42  ;;  %5883 = vtanh.f32 %v4060_v62  ;;  %v3460_v23 = vadd.f32 %v4785_v27, %v8088_v26  ;;  %v3790_v28 = vrot.slane %v3768_v8, %v6979_v57 }
 0xac2   :  { %5885 = vtanh.f32 %v4062_v30  ;;  %v3797_v47 = vrot.slane %v3769_v44, %v6979_v57  ;;  %v3798_v21 = vcombine.high %v3776_v39, %v3776_v39  ;;  %v3799_v53 = vcombine.high %v3783_v36, %v3783_v36 }
 0xac3   :  { %5887 = vtanh.f32 %v4063_v4  ;;  %v3935_v58 = vrot.slane %v3776_v39, %v6354_v32  ;;  %v3951_v33 = vrot.slane %v3783_v36, %v6354_v32  ;;  %v3800_v11 = vcombine.high %v3790_v28, %v3790_v28 }
 0xac4   :  { %5889 = vtanh.f32 %v4064_v16  ;;  %v3801_v43 = vcombine.high %v3797_v47, %v3797_v47  ;;  %v3939_v38 = vrot.slane %v3790_v28, %v6354_v32  ;;  %v3943_v26 = vrot.slane %v3798_v21, %v6354_v32 }
 0xac5   :  { %5891 = vtanh.f32 %v4065_v25  ;;  %v3955_v12 = vrot.slane %v3797_v47, %v6354_v32  ;;  %v3959_v27 = vrot.slane %v3799_v53, %v6354_v32  ;;  %v3947_v45 = vrot.slane %v3800_v11, %v6354_v32 }
 0xac6   :  { %v3963_v24 = vrot.slane %v3801_v43, %v6354_v32  ;;  %v4068_v20 = vsel %vm147_vm0, %v8096_v2, %v3935_v58  ;;  %v4069_v60 = vsel %vm147_vm0, %v8104_v29, %v3939_v38  ;;  %v4070_v56 = vsel %vm147_vm0, %v3566_v3, %v3943_v26 }
 0xac7   :  { %v4072_v63 = vsel %vm147_vm0, %v8099_v18, %v3951_v33  ;;  %v4073_v62 = vsel %vm147_vm0, %v8112_v55, %v3955_v12  ;;  %v8230_v34 = vsel %vm147_vm0, %v3567_v46, %v3959_v27  ;;  %5893 = vtanh.f32 %v4066_v37 }
 0xac8   :  { %v4071_v2 = vsel %vm147_vm0, %v3568_v59, %v3947_v45  ;;  %v8240_v3 = vsel %vm147_vm0, %v3569_v35, %v3963_v24  ;;  %v3802_v22 = vcombine.high %v3460_v23, %v3460_v23  ;;  %v3665_v17 = vcombine.high %v8152_v19, %v8152_v19 }
 0xac9   :  { %5895 = vtanh.f32 %v4069_v60  ;;  %v3809_v18 = vrot.slane %v3460_v23, %v6979_v57  ;;  %v4788_v46 = vadd.f32 %v4787_v61, %v4786_v0  ;;  %v3666_v29 = vcombine.high %v8155_v49, %v8155_v49 }
 0xaca   :  { %v5882_v9 = vpop.eup %5881  ;;  %v3667_v59 = vcombine.high %v8174_v41, %v8174_v41  ;;  %5897 = vtanh.f32 %v4068_v20  ;;  %v3816_v55 = vrot.slane %v3802_v22, %v6979_v57 }
 0xacb   :  { %v5884_v35 = vpop.eup %5883  ;;  %5899 = vtanh.f32 %v4070_v56  ;;  %v3817_v13 = vcombine.high %v3809_v18, %v3809_v18  ;;  %v3825_v52 = vrot.slane %v3809_v18, %v6979_v57  ;;  %v3465_v30 = vadd.f32 %v4788_v46, %v8090_v54 }
 0xacc   :  { %v5886_v16 = vpop.eup %5885  ;;  %5901 = vtanh.f32 %v4071_v2  ;;  %v3818_v0 = vcombine.high %v3816_v55, %v3816_v55  ;;  %v3832_v61 = vrot.slane %v3816_v55, %v6979_v57  ;;  %v4140_v42 = vcombine.low %v5884_v35, %v5882_v9 }
 0xacd   :  { %v5888_v4 = vpop.eup %5887  ;;  %5903 = vtanh.f32 %v4072_v63  ;;  %v3839_v25 = vrot.slane %v3817_v13, %v6979_v57  ;;  %v3847_v37 = vcombine.high %v3825_v52, %v3825_v52  ;;  %v3967_v8 = vrot.slane %v3825_v52, %v6354_v32 }
 0xace   :  { %v8255_v44 = vpop.eup %5889  ;;  %5905 = vtanh.f32 %v4073_v62  ;;  %v3846_v39 = vrot.slane %v3818_v0, %v6979_v57  ;;  %v3848_v36 = vcombine.high %v3832_v61, %v3832_v61  ;;  %v3983_v54 = vrot.slane %v3832_v61, %v6354_v32 }
 0xacf   :  { %v8259_v23 = vpop.eup %5891  ;;  %v3849_v28 = vcombine.high %v3839_v25, %v3839_v25  ;;  %v3971_v47 = vrot.slane %v3839_v25, %v6354_v32  ;;  %v3975_v21 = vrot.slane %v3847_v37, %v6354_v32  ;;  %v4076_v53 = vsel %vm147_vm0, %v8115_v10, %v3967_v8 }
 0xad0   :  { %v3850_v58 = vcombine.high %v3846_v39, %v3846_v39  ;;  %v3987_v33 = vrot.slane %v3846_v39, %v6354_v32  ;;  %v3991_v11 = vrot.slane %v3848_v36, %v6354_v32  ;;  %v4080_v43 = vsel %vm147_vm0, %v8118_v50, %v3983_v54 }
 0xad1   :  { %v3979_v38 = vrot.slane %v3849_v28, %v6354_v32  ;;  %v4077_v26 = vsel %vm147_vm0, %v8121_v1, %v3971_v47  ;;  %v4078_v12 = vsel %vm147_vm0, %v3615_v15, %v3975_v21  ;;  %5907 = vtanh.f32 %v4076_v53  ;;  %v8276_v27 = vpop.eup %5893 }
 0xad2   :  { %v3995_v45 = vrot.slane %v3850_v58, %v6354_v32  ;;  %v4081_v24 = vsel %vm147_vm0, %v8133_v31, %v3987_v33  ;;  %v4082_v20 = vsel %vm147_vm0, %v3616_v14, %v3991_v11  ;;  %5909 = vtanh.f32 %v4077_v26 }
 0xad3   :  { %v8285_v60 = vpop.eup %5895  ;;  %v4079_v10 = vsel %vm147_vm0, %v3617_v48, %v3979_v38  ;;  %5911 = vtanh.f32 %v4078_v12  ;;  %v3851_v15 = vcombine.high %v3465_v30, %v3465_v30  ;;  %v3858_v56 = vrot.slane %v3465_v30, %v6979_v57 }
 0xad4   :  { %v8292_v63 = vpop.eup %5897  ;;  %v8298_v50 = vsel %vm147_vm0, %v3618_v51, %v3995_v45  ;;  %5913 = vtanh.f32 %v4079_v10  ;;  %v4141_v14 = vcombine.low %v5886_v16, %v5888_v4  ;;  %v4148_v62 = vrot.slane %v4140_v42, %v6982_v5 }
 0xad5   :  { %v5900_v2 = vpop.eup %5899  ;;  %5915 = vtanh.f32 %v4080_v43  ;;  %v3865_v1 = vrot.slane %v3851_v15, %v6979_v57  ;;  %v3866_v48 = vcombine.high %v3858_v56, %v3858_v56  ;;  %v3874_v22 = vrot.slane %v3858_v56, %v6979_v57 }
 0xad6   :  { %v5902_v18 = vpop.eup %5901  ;;  %5917 = vtanh.f32 %v4081_v24  ;;  %v4155_v46 = vrot.slane %v4141_v14, %v6982_v5  ;;  %v4157_v31 = vcombine.low %v8255_v44, %v8259_v23  ;;  %v4174_v51 = vcombine.low %v8292_v63, %v8285_v60 }
 0xad7   :  { %v8308_v9 = vpop.eup %5903  ;;  %5919 = vtanh.f32 %v8230_v34  ;;  %v3867_v55 = vcombine.high %v3865_v1, %v3865_v1  ;;  %v3881_v35 = vrot.slane %v3865_v1, %v6979_v57  ;;  %v3888_v13 = vrot.slane %v3866_v48, %v6979_v57 }
 0xad8   :  { %v8313_v52 = vpop.eup %5905  ;;  %v3896_v30 = vcombine.high %v3874_v22, %v3874_v22  ;;  %v3999_v16 = vrot.slane %v3874_v22, %v6354_v32  ;;  %v4156_v0 = vcombine.low %v4148_v62, %v4155_v46  ;;  %5921 = vtanh.f32 %v8200_v7 }
 0xad9   :  { %v3895_v61 = vrot.slane %v3867_v55, %v6979_v57  ;;  %v3897_v42 = vcombine.high %v3881_v35, %v3881_v35  ;;  %v3898_v4 = vcombine.high %v3888_v13, %v3888_v13  ;;  %v4003_v25 = vrot.slane %v3888_v13, %v6354_v32 }
 0xada   :  { %5923 = vtanh.f32 %v4082_v20  ;;  %v4007_v34 = vrot.slane %v3896_v30, %v6354_v32  ;;  %v4015_v37 = vrot.slane %v3881_v35, %v6354_v32  ;;  %v4084_v8 = vsel %vm147_vm0, %v8136_v40, %v3999_v16  ;;  %4217 = vrot.lane.b32.xlu0 %v4156_v0, %s6094_s3  ;;  %4213 = vst.msk [vmem:[#allocation11] sm:$0xff] %vm4212_vm3, %v4156_v0 }
 0xadb   :  { %v5908_v7 = vpop.eup %5907  ;;  %v3899_v39 = vcombine.high %v3895_v61, %v3895_v61  ;;  %v4011_v57 = vrot.slane %v3898_v4, %v6354_v32  ;;  %v4019_v36 = vrot.slane %v3895_v61, %v6354_v32  ;;  %v4023_v54 = vrot.slane %v3897_v42, %v6354_v32 }
 0xadc   :  { %v5910_v28 = vpop.eup %5909  ;;  %v4085_v47 = vsel %vm147_vm0, %v8155_v49, %v4003_v25  ;;  %v4086_v21 = vsel %vm147_vm0, %v3664_v6, %v4007_v34  ;;  %v4088_v53 = vsel %vm147_vm0, %v8152_v19, %v4015_v37  ;;  %5925 = vtanh.f32 %v4084_v8 }
 0xadd   :  { %v5912_v58 = vpop.eup %5911  ;;  %v4027_v33 = vrot.slane %v3899_v39, %v6354_v32  ;;  %v4087_v11 = vsel %vm147_vm0, %v3666_v29, %v4011_v57  ;;  %v4089_v43 = vsel %vm147_vm0, %v8174_v41, %v4019_v36  ;;  %v4090_v40 = vsel %vm147_vm0, %v3665_v17, %v4023_v54 }
 0xade   :  { %v5914_v6 = vpop.eup %5913  ;;  %5927 = vtanh.f32 %v4085_v47  ;;  %4234 = vrot.lane.b32.xlu0 %v4156_v0, %s6095_s14  ;;  %v4175_v38 = vcombine.low %v5900_v2, %v5902_v18  ;;  %v4191_v32 = vcombine.low %v8308_v9, %v8313_v52  ;;  %v4267_v26 = vcombine.low %v5908_v7, %v5910_v28 }
 0xadf   :  { %v5916_v49 = vpop.eup %5915  ;;  %v4091_v29 = vsel %vm147_vm0, %v3667_v59, %v4027_v33  ;;  %5929 = vtanh.f32 %v4086_v21  ;;  %v4268_v19 = vcombine.low %v5912_v58, %v5914_v6  ;;  %v4182_v17 = vrot.slane %v4174_v51, %v6982_v5 }
 0xae0   :  { %v5918_v12 = vpop.eup %5917  ;;  %5931 = vtanh.f32 %v4087_v11  ;;  %v4189_v45 = vrot.slane %v4175_v38, %v6982_v5  ;;  %v4275_v20 = vrot.slane %v4267_v26, %v6982_v5  ;;  %v4165_v14 = vrot.slane %v4157_v31, %v6982_v5 }
 0xae1   :  { %v5920_v24 = vpop.eup %5919  ;;  %5933 = vtanh.f32 %v4088_v53  ;;  %v4282_v60 = vrot.slane %v4268_v19, %v6982_v5  ;;  %v4284_v10 = vcombine.low %v5916_v49, %v5918_v12  ;;  %v4199_v16 = vrot.slane %v4191_v32, %v6982_v5 }
 0xae2   :  { %v5922_v15 = vpop.eup %5921  ;;  %5935 = vtanh.f32 %v4089_v43  ;;  %v4190_v41 = vcombine.low %v4182_v17, %v4189_v45 }
 0xae3   :  { %5937 = vtanh.f32 %v4090_v40  ;;  %v4158_v59 = vcombine.low %v8276_v27, %v5922_v15  ;;  %v4283_v56 = vcombine.low %v4275_v20, %v4282_v60  ;;  %v4292_v42 = vrot.slane %v4284_v10, %v6982_v5 }
 0xae4   :  { %v5924_v63 = vpop.eup %5923  ;;  %4215 = vst.msk [vmem:[#allocation11 + $0x10] sm:$0xff] %vm4212_vm3, %v4190_v41  ;;  %5939 = vtanh.f32 %v8240_v3 }
 0xae5   :  { %v4172_v62 = vrot.slane %v4158_v59, %v6982_v5  ;;  %4340 = vst.msk [vmem:[#allocation11 + $0x60] sm:$0xff] %vm4212_vm3, %v4283_v56  ;;  %5941 = vtanh.f32 %v8298_v50 }
 0xae6   :  { %v5926_v2 = vpop.eup %5925  ;;  %5943 = vtanh.f32 %v4091_v29 }
 0xae7   :  { %v4173_v27 = vcombine.low %v4165_v14, %v4172_v62 }
 0xae8   :  { %v5928_v1 = vpop.eup %5927 }
 0xae9   :  { %v5930_v48 = vpop.eup %5929  ;;  %4236 = vrot.lane.b32.xlu1 %v4173_v27, %s6095_s14  ;;  %4214 = vst.msk [vmem:[#allocation11 + $0x8] sm:$0xff] %vm4212_vm3, %v4173_v27  ;;  %4219 = vrot.lane.b32.xlu0 %v4173_v27, %s6094_s3  ;;  %v4301_v3 = vcombine.low %v5926_v2, %v5928_v1 }
 0xaea   :  { %v5932_v44 = vpop.eup %5931 }
 0xaeb   :  { %v5934_v23 = vpop.eup %5933  ;;  %v4302_v22 = vcombine.low %v5930_v48, %v5932_v44  ;;  %v4309_v50 = vrot.slane %v4301_v3, %v6982_v5 }
 0xaec   :  { %v5936_v18 = vpop.eup %5935 }
 0xaed   :  { %v5938_v46 = vpop.eup %5937  ;;  %4221 = vrot.lane.b32.xlu1 %v4190_v41, %s6094_s3  ;;  %4238 = vrot.lane.b32.xlu0 %v4190_v41, %s6095_s14  ;;  %v4316_v31 = vrot.slane %v4302_v22, %v6982_v5  ;;  %v4318_v51 = vcombine.low %v5934_v23, %v5936_v18 }
 0xaee   :  { %v5940_v9 = vpop.eup %5939 }
 0xaef   :  { %v5942_v55 = vpop.eup %5941  ;;  %v4192_v35 = vcombine.low %v5920_v24, %v5940_v9  ;;  %v4317_v13 = vcombine.low %v4309_v50, %v4316_v31  ;;  %v4326_v34 = vrot.slane %v4318_v51, %v6982_v5 }
 0xaf0   :  { %v5944_v52 = vpop.eup %5943  ;;  %v4285_v30 = vcombine.low %v5924_v63, %v5942_v55 }
 0xaf1   :  { %v4206_v0 = vrot.slane %v4192_v35, %v6982_v5  ;;  %4344 = vrot.lane.b32.xlu0 %v4283_v56, %s6094_s3  ;;  %4342 = vst.msk [vmem:[#allocation11 + $0x70] sm:$0xff] %vm4212_vm3, %v4317_v13  ;;  %v4319_v61 = vcombine.low %v5938_v46, %v5944_v52 }
 0xaf2   :  { %v4299_v4 = vrot.slane %v4285_v30, %v6982_v5 }
 0xaf3   :  { %v4207_v25 = vcombine.low %v4199_v16, %v4206_v0  ;;  %v4333_v37 = vrot.slane %v4319_v61, %v6982_v5 }
 0xaf4   :  { %v4300_v8 = vcombine.low %v4292_v42, %v4299_v4 }
 0xaf5   :  { %4223 = vrot.lane.b32.xlu1 %v4207_v25, %s6094_s3  ;;  %4216 = vst.msk [vmem:[#allocation11 + $0x18] sm:$0xff] %vm4212_vm3, %v4207_v25  ;;  %4361 = vrot.lane.b32.xlu0 %v4283_v56, %s6095_s14  ;;  %v4334_v7 = vcombine.low %v4326_v34, %v4333_v37 }
 0xaf6   :  { %4341 = vst.msk [vmem:[#allocation11 + $0x68] sm:$0xff] %vm4212_vm3, %v4300_v8 }
 0xaf7   :  { %4343 = vst.msk [vmem:[#allocation11 + $0x78] sm:$0xff] %vm4212_vm3, %v4334_v7 }
 0xaf9   :  { %4240 = vrot.lane.b32.xlu1 %v4207_v25, %s6095_s14  ;;  %4348 = vrot.lane.b32.xlu0 %v4317_v13, %s6094_s3 }
 0xafd   :  { %4346 = vrot.lane.b32.xlu1 %v4300_v8, %s6094_s3  ;;  %4365 = vrot.lane.b32.xlu0 %v4317_v13, %s6095_s14 }
 0xb01   :  { %4363 = vrot.lane.b32.xlu1 %v4300_v8, %s6095_s14 }
 0xb05   :  { %4350 = vrot.lane.b32.xlu1 %v4334_v7, %s6094_s3 }
 0xb09   :  { %4367 = vrot.lane.b32.xlu1 %v4334_v7, %s6095_s14 }
 0xb4c   :  { %v4218_v5 = vpop.permute.xlu0 %4217 }
 0xb4d   :  { %4230 = vst.msk [vmem:[#allocation11 + $0x20] sm:$0xff] %vm4212_vm3, %v4218_v5 }
 0xb50   :  { %v4235_v39 = vpop.permute.xlu0 %4234 }
 0xb51   :  { %4247 = vst.msk [vmem:[#allocation11 + $0x40] sm:$0xff] %vm4212_vm3, %v4235_v39 }
 0xb5b   :  { %v4237_v57 = vpop.permute.xlu1 %4236  ;;  %v4220_v36 = vpop.permute.xlu0 %4219 }
 0xb5c   :  { %4248 = vst.msk [vmem:[#allocation11 + $0x48] sm:$0xff] %vm4212_vm3, %v4237_v57  ;;  %4231 = vst.msk [vmem:[#allocation11 + $0x28] sm:$0xff] %vm4212_vm3, %v4220_v36 }
 0xb5f   :  { %v4222_v54 = vpop.permute.xlu1 %4221  ;;  %v4239_v28 = vpop.permute.xlu0 %4238 }
 0xb60   :  { %4232 = vst.msk [vmem:[#allocation11 + $0x30] sm:$0xff] %vm4212_vm3, %v4222_v54  ;;  %4249 = vst.msk [vmem:[#allocation11 + $0x50] sm:$0xff] %vm4212_vm3, %v4239_v28 }
 0xb63   :  { %v4345_v47 = vpop.permute.xlu0 %4344 }
 0xb64   :  { %4357 = vst.msk [vmem:[#allocation11 + $0x80] sm:$0xff] %vm4212_vm3, %v4345_v47 }
 0xb67   :  { %v4224_v21 = vpop.permute.xlu1 %4223  ;;  %v4362_v53 = vpop.permute.xlu0 %4361 }
 0xb68   :  { %4233 = vst.msk [vmem:[#allocation11 + $0x38] sm:$0xff] %vm4212_vm3, %v4224_v21  ;;  %4374 = vst.msk [vmem:[#allocation11 + $0xa0] sm:$0xff] %vm4212_vm3, %v4362_v53 }
 0xb6b   :  { %v4241_v58 = vpop.permute.xlu1 %4240  ;;  %v4349_v33 = vpop.permute.xlu0 %4348 }
 0xb6c   :  { %4250 = vst.msk [vmem:[#allocation11 + $0x58] sm:$0xff] %vm4212_vm3, %v4241_v58  ;;  %4359 = vst.msk [vmem:[#allocation11 + $0x90] sm:$0xff] %vm4212_vm3, %v4349_v33 }
 0xb6f   :  { %v4347_v11 = vpop.permute.xlu1 %4346  ;;  %v4366_v43 = vpop.permute.xlu0 %4365 }
 0xb70   :  { %4358 = vst.msk [vmem:[#allocation11 + $0x88] sm:$0xff] %vm4212_vm3, %v4347_v11  ;;  %4376 = vst.msk [vmem:[#allocation11 + $0xb0] sm:$0xff] %vm4212_vm3, %v4366_v43 }
 0xb73   :  { %v4364_v40 = vpop.permute.xlu1 %4363 }
 0xb74   :  { %4375 = vst.msk [vmem:[#allocation11 + $0xa8] sm:$0xff] %vm4212_vm3, %v4364_v40 }
 0xb77   :  { %v4351_v6 = vpop.permute.xlu1 %4350 }
 0xb78   :  { %4360 = vst.msk [vmem:[#allocation11 + $0x98] sm:$0xff] %vm4212_vm3, %v4351_v6 }
 0xb7b   :  { %v4368_v38 = vpop.permute.xlu1 %4367 }
 0xb7c   :  { %4377 = vst.msk [vmem:[#allocation11 + $0xb8] sm:$0xff] %vm4212_vm3, %v4368_v38 }
 0xb7d   :  { %6066 = shalt.err (!%p6063_p2)
}
 0xb7e   :  { %s8490_s28 = sld [smem:[#allocation23_spill]] }
 0xb84   :  { %s6067_s20 = scalar_lea.hbm %s8490_s28, 3072 }
 0xb85   :  { %p6068_p3 = scmp.ne.s32.totalorder %s8490_s28, %s6067_s20  ;;  %p6071_p4 = scmp.lt.u32.totalorder %s6067_s20, %s8490_s28 }
 0xb87   :  { %p6073_p5 = pnand %p6071_p4, %p6068_p3 }
 0xb89   :  { %6076 = shalt.err (!%p6073_p5)
}
 0xb8a   :  { %4389 = dma.vmem_to_hbm [thread:$0]  %s4384_s0, 3072, %s8490_s28, [#allocation4], %s6087_s1, %s6087_s1, %s6088_s24  }
 0xb8b   :  { %6083 = dma.done.wait [#allocation4], 3072  }
 0xb8c   :  { %6084 = vsyncadd [#allocation4], 4294964224 }
 0xb8d   :  { %4393 = vsyncpa [#allocation3], 1 }
 0xb8e   :  { %4394 = vsyncpa [#allocation6], 1 }
 0xb8f   :  { %4395 = vsyncpa [#allocation9], 1 }
 0xb90   :  { %4396 = vsyncpa [#allocation4], 1 }

</bundles_post_ra>
